<compile_context>
chip_gen: v6e
topology: v6e:2x2x1
jax: 0.10.0
libtpu: 0.0.40
codegen_flags: <defaults>
</compile_context>

<pallas_src>
import functools
import math

import jax
import jax.numpy as jnp
from jax.experimental import pallas as pl
from jax.experimental.pallas import tpu as pltpu


# ---------------------------------------------------------------------------
# Fused encoder kernel.
#   x_idx_ref : (S, B) int32 in SMEM (scalar prefetch) -- token indices.
#   emb_ref   : (n_chars, E) embedding table (VMEM resident).
#   per layer l: w_ih_l (In_l, 8H)  [fwd(i,f,o,g) | bwd(i,f,o,g)] columns,
#                w_hh_l (2H, 8H)    block-diagonal [fwd | bwd], pre-transposed,
#                b_l    (1, 8H)     fused b_ih + b_hh, gate-reordered.
#   outputs   : hidden_ref, cell_ref (2L, B, H).
#   scratch   : hf_seq (S,B,H), hb_seq (S,B,H), xg (S,B,8H) -- all VMEM.
# ---------------------------------------------------------------------------
def _encoder_kernel(x_idx_ref, emb_ref, *args):
    S, B = x_idx_ref.shape
    L = (len(args) - 5) // 3
    layer_refs = args[:3 * L]
    hidden_ref, cell_ref, hf_seq_ref, hb_seq_ref, xg_ref = args[3 * L:]
    H = hidden_ref.shape[-1]
    G = 4 * H

    # TODO(synk): nn.Dropout (embeddings + LSTM inter-layer) is train-mode
    # stochastic; implemented as eval-mode identity here.

    for l in range(L):
        # Per-layer weights: loaded once, VMEM resident for the whole layer.
        w_ih = layer_refs[3 * l][...]        # (In_l, 8H)
        w_hh = layer_refs[3 * l + 1][...]    # (2H, 8H) block-diag [fwd | bwd]
        bias = layer_refs[3 * l + 2][...]    # (1, 8H)

        # --- Hoisted, time-independent input projection (layer prologue). ---
        # Layer 0 fuses the embedding gather directly into the projection:
        # dynamic-row loads from the table, sublane-concat to (B, E), one dot.
        # Results stay in the VMEM xg scratch (never written to HBM).
        for t in range(S):
            if l == 0:
                x_t = jnp.concatenate(
                    [emb_ref[pl.ds(x_idx_ref[t, b], 1), :] for b in range(B)],
                    axis=0)                                        # (B, E)
            else:
                # Next-layer input = concat(fwd_out, bwd_out), time-aligned.
                x_t = jnp.concatenate([hf_seq_ref[t], hb_seq_ref[t]], axis=-1)
            xg_ref[t] = jnp.dot(x_t, w_ih,
                                preferred_element_type=jnp.float32) + bias

        write_seq = l < L - 1   # last layer only needs the final (h, c)

        def step(t, carry, w_hh=w_hh, write_seq=write_seq):
            # Four separate (B, H) vreg carries -- no stack / leading-axis idx.
            h_f, h_b, c_f, c_b = carry
            tb = S - 1 - t

            # Single block-diagonal recurrent matmul for both directions:
            # [h_f | h_b] (B,2H) @ W_hh_blk (2H,8H) -> lane-dense (B,8H).
            h_cat = jnp.concatenate([h_f, h_b], axis=-1)
            rec = jnp.dot(h_cat, w_hh, preferred_element_type=jnp.float32)

            # Backward direction walks the forward-ordered gate inputs in
            # reverse (no jnp.flip / HBM copies).  Lane slices are 128-aligned.
            g_f = xg_ref[t, :, :G] + rec[:, :G]
            g_b = xg_ref[tb, :, G:] + rec[:, G:]

            def lstm_cell(gates, c):
                # Packing (i, f, o, g): one sigmoid over the contiguous 3H
                # block, one tanh over the trailing H block.
                sig = jax.nn.sigmoid(gates[:, :3 * H])
                i_g = sig[:, 0 * H:1 * H]
                f_g = sig[:, 1 * H:2 * H]
                o_g = sig[:, 2 * H:3 * H]
                g_g = jnp.tanh(gates[:, 3 * H:])
                c_new = f_g * c + i_g * g_g
                return o_g * jnp.tanh(c_new), c_new

            h_f, c_f = lstm_cell(g_f, c_f)
            h_b, c_b = lstm_cell(g_b, c_b)

            if write_seq:
                # Next layer's input stays VMEM resident; no HBM intermediates.
                hf_seq_ref[t] = h_f          # forward hidden at time t
                hb_seq_ref[tb] = h_b         # backward hidden, time-aligned
            return h_f, h_b, c_f, c_b

        zeros = jnp.zeros((B, H), jnp.float32)
        h_f, h_b, c_f, c_b = jax.lax.fori_loop(
            0, S, step, (zeros, zeros, zeros, zeros), unroll=min(S, 8))

        # Final states, PyTorch order [layer_l fwd, layer_l bwd].
        hidden_ref[2 * l, :, :] = h_f
        hidden_ref[2 * l + 1, :, :] = h_b
        cell_ref[2 * l, :, :] = c_f
        cell_ref[2 * l + 1, :, :] = c_b


# ---------------------------------------------------------------------------
# Wrapper: single pallas_call for the whole encoder.
# ---------------------------------------------------------------------------
def encoder_forward(params, x_idx, num_layers):
    S, B = x_idx.shape
    emb = params["embedding"]                       # (n_chars, E)
    H = params["w_hh_l0"].shape[0] // 2
    E = emb.shape[1]
    L = num_layers

    inputs = [emb]
    for l in range(L):
        inputs += [params[f"w_ih_l{l}"], params[f"w_hh_l{l}"], params[f"b_l{l}"]]

    def const_map(ndim):
        zeros = (0,) * ndim
        return lambda i, xi: zeros                  # (grid idx, prefetch ref)

    in_specs = [pl.BlockSpec(a.shape, const_map(a.ndim)) for a in inputs]
    out_specs = [pl.BlockSpec((2 * L, B, H), const_map(3)),
                 pl.BlockSpec((2 * L, B, H), const_map(3))]
    out_shape = (jax.ShapeDtypeStruct((2 * L, B, H), jnp.float32),
                 jax.ShapeDtypeStruct((2 * L, B, H), jnp.float32))

    scratch_shapes = [
        pltpu.VMEM((S, B, H), jnp.float32),         # fwd hidden sequence
        pltpu.VMEM((S, B, H), jnp.float32),         # bwd hidden sequence
        pltpu.VMEM((S, B, 8 * H), jnp.float32),     # per-layer gate inputs
    ]

    grid_spec = pltpu.PrefetchScalarGridSpec(
        num_scalar_prefetch=1,          # x_idx -> SMEM scalars for the gather
        grid=(1,),                      # everything fused in one invocation
        in_specs=in_specs,
        out_specs=out_specs,
        scratch_shapes=scratch_shapes,
    )
    return pl.pallas_call(
        _encoder_kernel,
        out_shape=out_shape,
        grid_spec=grid_spec,
        compiler_params=pltpu.CompilerParams(
            dimension_semantics=("arbitrary",),
            vmem_limit_bytes=32 * 1024 * 1024),
    )(x_idx.astype(jnp.int32), *inputs)


# ---------------------------------------------------------------------------
# Deterministic parameter construction (mirrors nn.Embedding / nn.LSTM init),
# re-packed for the kernel:
#   * gate reorder (i,f,g,o) -> (i,f,o,g)
#   * pre-transpose (4H,In)->(In,4H), (4H,H)->(H,4H)
#   * fwd/bwd concatenated along lanes: W_ih (In, 8H), bias (1, 8H)
#   * block-diagonal recurrent weight W_hh (2H, 8H)
#   * fuse b_ih + b_hh
# ---------------------------------------------------------------------------
def _reorder_gates(w, H):
    i, f, g, o = jnp.split(w, 4, axis=0)
    return jnp.concatenate([i, f, o, g], axis=0)


def make_params(key, n_chars, embed_dim, hidden_size, num_layers):
    H = hidden_size
    params = {}
    key, k_emb = jax.random.split(key)
    params["embedding"] = jax.random.normal(
        k_emb, (n_chars, embed_dim), dtype=jnp.float32)

    bound = 1.0 / math.sqrt(H)
    for l in range(num_layers):
        in_dim = embed_dim if l == 0 else 2 * H
        w_ih_cols, w_hh_dirs, b_cols = [], [], []
        for d in range(2):
            key, k1, k2, k3, k4 = jax.random.split(key, 5)
            w_ih = jax.random.uniform(k1, (4 * H, in_dim), jnp.float32, -bound, bound)
            w_hh = jax.random.uniform(k2, (4 * H, H), jnp.float32, -bound, bound)
            b_ih = jax.random.uniform(k3, (4 * H,), jnp.float32, -bound, bound)
            b_hh = jax.random.uniform(k4, (4 * H,), jnp.float32, -bound, bound)
            w_ih_cols.append(_reorder_gates(w_ih, H).T)        # (In, 4H)
            w_hh_dirs.append(_reorder_gates(w_hh, H).T)        # (H, 4H)
            b_cols.append(_reorder_gates(b_ih + b_hh, H))      # (4H,)
        params[f"w_ih_l{l}"] = jnp.concatenate(w_ih_cols, axis=1)      # (In, 8H)
        z = jnp.zeros((H, 4 * H), jnp.float32)
        params[f"w_hh_l{l}"] = jnp.concatenate(                         # (2H, 8H)
            [jnp.concatenate([w_hh_dirs[0], z], axis=1),
             jnp.concatenate([z, w_hh_dirs[1]], axis=1)], axis=0)
        params[f"b_l{l}"] = jnp.concatenate(b_cols)[None, :]            # (1, 8H)
    return params


if __name__ == "__main__":
    # Small shapes consistent with the module.
    n_chars, embed_dim, hidden_size, num_layers = 50, 32, 32, 2
    seq_len, batch = 8, 2

    key = jax.random.PRNGKey(0)
    key, k_idx = jax.random.split(key)
    x_idx = jax.random.randint(k_idx, (seq_len, batch), 0, n_chars, dtype=jnp.int32)

    params = make_params(key, n_chars, embed_dim, hidden_size, num_layers)

    fwd = jax.jit(functools.partial(encoder_forward, num_layers=num_layers))
    hidden, cell = fwd(params, x_idx)
    jax.block_until_ready((hidden, cell))

    assert hidden.shape == (num_layers * 2, batch, hidden_size)
    assert cell.shape == (num_layers * 2, batch, hidden_size)
    print("KERNEL_OK")
</pallas_src>

<mosaic_0001>
module attributes {stable_mosaic.version = 11 : i64} {
  func.func @_encoder_kernel(%arg0: i32, %arg1: memref<8x2xi32, #tpu.memory_space<smem>>, %arg2: memref<50x32xf32, #tpu.memory_space<vmem>>, %arg3: memref<32x256xf32, #tpu.memory_space<vmem>>, %arg4: memref<64x256xf32, #tpu.memory_space<vmem>>, %arg5: memref<1x256xf32, #tpu.memory_space<vmem>>, %arg6: memref<64x256xf32, #tpu.memory_space<vmem>>, %arg7: memref<64x256xf32, #tpu.memory_space<vmem>>, %arg8: memref<1x256xf32, #tpu.memory_space<vmem>>, %arg9: memref<4x2x32xf32, #tpu.memory_space<vmem>>, %arg10: memref<4x2x32xf32, #tpu.memory_space<vmem>>, %arg11: memref<8x2x32xf32, #tpu.memory_space<vmem>>, %arg12: memref<8x2x32xf32, #tpu.memory_space<vmem>>, %arg13: memref<8x2x256xf32, #tpu.memory_space<vmem>>) attributes {dimension_semantics = [#tpu.dimension_semantics<arbitrary>], iteration_bounds = array<i64: 1>, scalar_prefetch = 1 : i64, scratch_operands = 3 : i64, tpu.core_type = #tpu.core_type<tc>, window_params = [{pipeline_mode = #tpu.pipeline_mode<synchronous>, transform_indices = @transform_0, window_bounds = array<i64: 50, 32>}, {pipeline_mode = #tpu.pipeline_mode<synchronous>, transform_indices = @transform_1, window_bounds = array<i64: 32, 256>}, {pipeline_mode = #tpu.pipeline_mode<synchronous>, transform_indices = @transform_2, window_bounds = array<i64: 64, 256>}, {pipeline_mode = #tpu.pipeline_mode<synchronous>, transform_indices = @transform_3, window_bounds = array<i64: 1, 256>}, {pipeline_mode = #tpu.pipeline_mode<synchronous>, transform_indices = @transform_4, window_bounds = array<i64: 64, 256>}, {pipeline_mode = #tpu.pipeline_mode<synchronous>, transform_indices = @transform_5, window_bounds = array<i64: 64, 256>}, {pipeline_mode = #tpu.pipeline_mode<synchronous>, transform_indices = @transform_6, window_bounds = array<i64: 1, 256>}, {pipeline_mode = #tpu.pipeline_mode<synchronous>, transform_indices = @transform_7, window_bounds = array<i64: 4, 2, 32>}, {pipeline_mode = #tpu.pipeline_mode<synchronous>, transform_indices = @transform_8, window_bounds = array<i64: 4, 2, 32>}]} {
    %c0 = arith.constant 0 : index
    %c0_0 = arith.constant 0 : index
    %0 = vector.load %arg3[%c0, %c0_0] : memref<32x256xf32, #tpu.memory_space<vmem>>, vector<32x256xf32>
    %c0_1 = arith.constant 0 : index
    %c0_2 = arith.constant 0 : index
    %1 = vector.load %arg4[%c0_1, %c0_2] : memref<64x256xf32, #tpu.memory_space<vmem>>, vector<64x256xf32>
    %c0_3 = arith.constant 0 : index
    %c0_4 = arith.constant 0 : index
    %2 = vector.load %arg5[%c0_3, %c0_4] : memref<1x256xf32, #tpu.memory_space<vmem>>, vector<1x256xf32>
    %c0_5 = arith.constant 0 : index
    %c0_6 = arith.constant 0 : index
    %3 = memref.load %arg1[%c0_5, %c0_6] : memref<8x2xi32, #tpu.memory_space<smem>>
    %4 = arith.index_cast %3 : i32 to index
    %c0_7 = arith.constant 0 : index
    %5 = vector.load %arg2[%4, %c0_7] : memref<50x32xf32, #tpu.memory_space<vmem>>, vector<1x32xf32>
    %c0_8 = arith.constant 0 : index
    %c1 = arith.constant 1 : index
    %6 = memref.load %arg1[%c0_8, %c1] : memref<8x2xi32, #tpu.memory_space<smem>>
    %7 = arith.index_cast %6 : i32 to index
    %c0_9 = arith.constant 0 : index
    %8 = vector.load %arg2[%7, %c0_9] : memref<50x32xf32, #tpu.memory_space<vmem>>, vector<1x32xf32>
    %9 = tpu.concatenate %5, %8 in 0 : vector<1x32xf32>, vector<1x32xf32> -> vector<2x32xf32>
    %cst = arith.constant dense<0.000000e+00> : vector<2x256xf32>
    %10 = tpu.matmul %9, %0, %cst {dimension_numbers = #tpu.dot_dimension_numbers<[1], [0], [0], [1], [0, 0, 1, 1], [], []>} : vector<2x32xf32>, vector<32x256xf32>, vector<2x256xf32> -> vector<2x256xf32>
    %11 = vector.broadcast %2 : vector<1x256xf32> to vector<2x256xf32>
    %12 = arith.addf %10, %11 : vector<2x256xf32>
    %c0_10 = arith.constant 0 : index
    %c0_11 = arith.constant 0 : index
    %c0_12 = arith.constant 0 : index
    %13 = vector.load %arg13[%c0_10, %c0_11, %c0_12] : memref<8x2x256xf32, #tpu.memory_space<vmem>>, vector<1x2x256xf32>
    %14 = vector.shape_cast %13 : vector<1x2x256xf32> to vector<2x256xf32>
    %15 = vector.shape_cast %12 : vector<2x256xf32> to vector<1x2x256xf32>
    tpu.vector_store %arg13[%c0_10, %c0_11, %c0_12], %15 {strides = array<i32>} : memref<8x2x256xf32, #tpu.memory_space<vmem>>, vector<1x2x256xf32>,
    %c1_13 = arith.constant 1 : index
    %c0_14 = arith.constant 0 : index
    %16 = memref.load %arg1[%c1_13, %c0_14] : memref<8x2xi32, #tpu.memory_space<smem>>
    %17 = arith.index_cast %16 : i32 to index
    %c0_15 = arith.constant 0 : index
    %18 = vector.load %arg2[%17, %c0_15] : memref<50x32xf32, #tpu.memory_space<vmem>>, vector<1x32xf32>
    %c1_16 = arith.constant 1 : index
    %c1_17 = arith.constant 1 : index
    %19 = memref.load %arg1[%c1_16, %c1_17] : memref<8x2xi32, #tpu.memory_space<smem>>
    %20 = arith.index_cast %19 : i32 to index
    %c0_18 = arith.constant 0 : index
    %21 = vector.load %arg2[%20, %c0_18] : memref<50x32xf32, #tpu.memory_space<vmem>>, vector<1x32xf32>
    %22 = tpu.concatenate %18, %21 in 0 : vector<1x32xf32>, vector<1x32xf32> -> vector<2x32xf32>
    %cst_19 = arith.constant dense<0.000000e+00> : vector<2x256xf32>
    %23 = tpu.matmul %22, %0, %cst_19 {dimension_numbers = #tpu.dot_dimension_numbers<[1], [0], [0], [1], [0, 0, 1, 1], [], []>} : vector<2x32xf32>, vector<32x256xf32>, vector<2x256xf32> -> vector<2x256xf32>
    %24 = vector.broadcast %2 : vector<1x256xf32> to vector<2x256xf32>
    %25 = arith.addf %23, %24 : vector<2x256xf32>
    %c1_20 = arith.constant 1 : index
    %c0_21 = arith.constant 0 : index
    %c0_22 = arith.constant 0 : index
    %26 = vector.load %arg13[%c1_20, %c0_21, %c0_22] : memref<8x2x256xf32, #tpu.memory_space<vmem>>, vector<1x2x256xf32>
    %27 = vector.shape_cast %26 : vector<1x2x256xf32> to vector<2x256xf32>
    %28 = vector.shape_cast %25 : vector<2x256xf32> to vector<1x2x256xf32>
    tpu.vector_store %arg13[%c1_20, %c0_21, %c0_22], %28 {strides = array<i32>} : memref<8x2x256xf32, #tpu.memory_space<vmem>>, vector<1x2x256xf32>,
    %c2 = arith.constant 2 : index
    %c0_23 = arith.constant 0 : index
    %29 = memref.load %arg1[%c2, %c0_23] : memref<8x2xi32, #tpu.memory_space<smem>>
    %30 = arith.index_cast %29 : i32 to index
    %c0_24 = arith.constant 0 : index
    %31 = vector.load %arg2[%30, %c0_24] : memref<50x32xf32, #tpu.memory_space<vmem>>, vector<1x32xf32>
    %c2_25 = arith.constant 2 : index
    %c1_26 = arith.constant 1 : index
    %32 = memref.load %arg1[%c2_25, %c1_26] : memref<8x2xi32, #tpu.memory_space<smem>>
    %33 = arith.index_cast %32 : i32 to index
    %c0_27 = arith.constant 0 : index
    %34 = vector.load %arg2[%33, %c0_27] : memref<50x32xf32, #tpu.memory_space<vmem>>, vector<1x32xf32>
    %35 = tpu.concatenate %31, %34 in 0 : vector<1x32xf32>, vector<1x32xf32> -> vector<2x32xf32>
    %cst_28 = arith.constant dense<0.000000e+00> : vector<2x256xf32>
    %36 = tpu.matmul %35, %0, %cst_28 {dimension_numbers = #tpu.dot_dimension_numbers<[1], [0], [0], [1], [0, 0, 1, 1], [], []>} : vector<2x32xf32>, vector<32x256xf32>, vector<2x256xf32> -> vector<2x256xf32>
    %37 = vector.broadcast %2 : vector<1x256xf32> to vector<2x256xf32>
    %38 = arith.addf %36, %37 : vector<2x256xf32>
    %c2_29 = arith.constant 2 : index
    %c0_30 = arith.constant 0 : index
    %c0_31 = arith.constant 0 : index
    %39 = vector.load %arg13[%c2_29, %c0_30, %c0_31] : memref<8x2x256xf32, #tpu.memory_space<vmem>>, vector<1x2x256xf32>
    %40 = vector.shape_cast %39 : vector<1x2x256xf32> to vector<2x256xf32>
    %41 = vector.shape_cast %38 : vector<2x256xf32> to vector<1x2x256xf32>
    tpu.vector_store %arg13[%c2_29, %c0_30, %c0_31], %41 {strides = array<i32>} : memref<8x2x256xf32, #tpu.memory_space<vmem>>, vector<1x2x256xf32>,
    %c3 = arith.constant 3 : index
    %c0_32 = arith.constant 0 : index
    %42 = memref.load %arg1[%c3, %c0_32] : memref<8x2xi32, #tpu.memory_space<smem>>
    %43 = arith.index_cast %42 : i32 to index
    %c0_33 = arith.constant 0 : index
    %44 = vector.load %arg2[%43, %c0_33] : memref<50x32xf32, #tpu.memory_space<vmem>>, vector<1x32xf32>
    %c3_34 = arith.constant 3 : index
    %c1_35 = arith.constant 1 : index
    %45 = memref.load %arg1[%c3_34, %c1_35] : memref<8x2xi32, #tpu.memory_space<smem>>
    %46 = arith.index_cast %45 : i32 to index
    %c0_36 = arith.constant 0 : index
    %47 = vector.load %arg2[%46, %c0_36] : memref<50x32xf32, #tpu.memory_space<vmem>>, vector<1x32xf32>
    %48 = tpu.concatenate %44, %47 in 0 : vector<1x32xf32>, vector<1x32xf32> -> vector<2x32xf32>
    %cst_37 = arith.constant dense<0.000000e+00> : vector<2x256xf32>
    %49 = tpu.matmul %48, %0, %cst_37 {dimension_numbers = #tpu.dot_dimension_numbers<[1], [0], [0], [1], [0, 0, 1, 1], [], []>} : vector<2x32xf32>, vector<32x256xf32>, vector<2x256xf32> -> vector<2x256xf32>
    %50 = vector.broadcast %2 : vector<1x256xf32> to vector<2x256xf32>
    %51 = arith.addf %49, %50 : vector<2x256xf32>
    %c3_38 = arith.constant 3 : index
    %c0_39 = arith.constant 0 : index
    %c0_40 = arith.constant 0 : index
    %52 = vector.load %arg13[%c3_38, %c0_39, %c0_40] : memref<8x2x256xf32, #tpu.memory_space<vmem>>, vector<1x2x256xf32>
    %53 = vector.shape_cast %52 : vector<1x2x256xf32> to vector<2x256xf32>
    %54 = vector.shape_cast %51 : vector<2x256xf32> to vector<1x2x256xf32>
    tpu.vector_store %arg13[%c3_38, %c0_39, %c0_40], %54 {strides = array<i32>} : memref<8x2x256xf32, #tpu.memory_space<vmem>>, vector<1x2x256xf32>,
    %c4 = arith.constant 4 : index
    %c0_41 = arith.constant 0 : index
    %55 = memref.load %arg1[%c4, %c0_41] : memref<8x2xi32, #tpu.memory_space<smem>>
    %56 = arith.index_cast %55 : i32 to index
    %c0_42 = arith.constant 0 : index
    %57 = vector.load %arg2[%56, %c0_42] : memref<50x32xf32, #tpu.memory_space<vmem>>, vector<1x32xf32>
    %c4_43 = arith.constant 4 : index
    %c1_44 = arith.constant 1 : index
    %58 = memref.load %arg1[%c4_43, %c1_44] : memref<8x2xi32, #tpu.memory_space<smem>>
    %59 = arith.index_cast %58 : i32 to index
    %c0_45 = arith.constant 0 : index
    %60 = vector.load %arg2[%59, %c0_45] : memref<50x32xf32, #tpu.memory_space<vmem>>, vector<1x32xf32>
    %61 = tpu.concatenate %57, %60 in 0 : vector<1x32xf32>, vector<1x32xf32> -> vector<2x32xf32>
    %cst_46 = arith.constant dense<0.000000e+00> : vector<2x256xf32>
    %62 = tpu.matmul %61, %0, %cst_46 {dimension_numbers = #tpu.dot_dimension_numbers<[1], [0], [0], [1], [0, 0, 1, 1], [], []>} : vector<2x32xf32>, vector<32x256xf32>, vector<2x256xf32> -> vector<2x256xf32>
    %63 = vector.broadcast %2 : vector<1x256xf32> to vector<2x256xf32>
    %64 = arith.addf %62, %63 : vector<2x256xf32>
    %c4_47 = arith.constant 4 : index
    %c0_48 = arith.constant 0 : index
    %c0_49 = arith.constant 0 : index
    %65 = vector.load %arg13[%c4_47, %c0_48, %c0_49] : memref<8x2x256xf32, #tpu.memory_space<vmem>>, vector<1x2x256xf32>
    %66 = vector.shape_cast %65 : vector<1x2x256xf32> to vector<2x256xf32>
    %67 = vector.shape_cast %64 : vector<2x256xf32> to vector<1x2x256xf32>
    tpu.vector_store %arg13[%c4_47, %c0_48, %c0_49], %67 {strides = array<i32>} : memref<8x2x256xf32, #tpu.memory_space<vmem>>, vector<1x2x256xf32>,
    %c5 = arith.constant 5 : index
    %c0_50 = arith.constant 0 : index
    %68 = memref.load %arg1[%c5, %c0_50] : memref<8x2xi32, #tpu.memory_space<smem>>
    %69 = arith.index_cast %68 : i32 to index
    %c0_51 = arith.constant 0 : index
    %70 = vector.load %arg2[%69, %c0_51] : memref<50x32xf32, #tpu.memory_space<vmem>>, vector<1x32xf32>
    %c5_52 = arith.constant 5 : index
    %c1_53 = arith.constant 1 : index
    %71 = memref.load %arg1[%c5_52, %c1_53] : memref<8x2xi32, #tpu.memory_space<smem>>
    %72 = arith.index_cast %71 : i32 to index
    %c0_54 = arith.constant 0 : index
    %73 = vector.load %arg2[%72, %c0_54] : memref<50x32xf32, #tpu.memory_space<vmem>>, vector<1x32xf32>
    %74 = tpu.concatenate %70, %73 in 0 : vector<1x32xf32>, vector<1x32xf32> -> vector<2x32xf32>
    %cst_55 = arith.constant dense<0.000000e+00> : vector<2x256xf32>
    %75 = tpu.matmul %74, %0, %cst_55 {dimension_numbers = #tpu.dot_dimension_numbers<[1], [0], [0], [1], [0, 0, 1, 1], [], []>} : vector<2x32xf32>, vector<32x256xf32>, vector<2x256xf32> -> vector<2x256xf32>
    %76 = vector.broadcast %2 : vector<1x256xf32> to vector<2x256xf32>
    %77 = arith.addf %75, %76 : vector<2x256xf32>
    %c5_56 = arith.constant 5 : index
    %c0_57 = arith.constant 0 : index
    %c0_58 = arith.constant 0 : index
    %78 = vector.load %arg13[%c5_56, %c0_57, %c0_58] : memref<8x2x256xf32, #tpu.memory_space<vmem>>, vector<1x2x256xf32>
    %79 = vector.shape_cast %78 : vector<1x2x256xf32> to vector<2x256xf32>
    %80 = vector.shape_cast %77 : vector<2x256xf32> to vector<1x2x256xf32>
    tpu.vector_store %arg13[%c5_56, %c0_57, %c0_58], %80 {strides = array<i32>} : memref<8x2x256xf32, #tpu.memory_space<vmem>>, vector<1x2x256xf32>,
    %c6 = arith.constant 6 : index
    %c0_59 = arith.constant 0 : index
    %81 = memref.load %arg1[%c6, %c0_59] : memref<8x2xi32, #tpu.memory_space<smem>>
    %82 = arith.index_cast %81 : i32 to index
    %c0_60 = arith.constant 0 : index
    %83 = vector.load %arg2[%82, %c0_60] : memref<50x32xf32, #tpu.memory_space<vmem>>, vector<1x32xf32>
    %c6_61 = arith.constant 6 : index
    %c1_62 = arith.constant 1 : index
    %84 = memref.load %arg1[%c6_61, %c1_62] : memref<8x2xi32, #tpu.memory_space<smem>>
    %85 = arith.index_cast %84 : i32 to index
    %c0_63 = arith.constant 0 : index
    %86 = vector.load %arg2[%85, %c0_63] : memref<50x32xf32, #tpu.memory_space<vmem>>, vector<1x32xf32>
    %87 = tpu.concatenate %83, %86 in 0 : vector<1x32xf32>, vector<1x32xf32> -> vector<2x32xf32>
    %cst_64 = arith.constant dense<0.000000e+00> : vector<2x256xf32>
    %88 = tpu.matmul %87, %0, %cst_64 {dimension_numbers = #tpu.dot_dimension_numbers<[1], [0], [0], [1], [0, 0, 1, 1], [], []>} : vector<2x32xf32>, vector<32x256xf32>, vector<2x256xf32> -> vector<2x256xf32>
    %89 = vector.broadcast %2 : vector<1x256xf32> to vector<2x256xf32>
    %90 = arith.addf %88, %89 : vector<2x256xf32>
    %c6_65 = arith.constant 6 : index
    %c0_66 = arith.constant 0 : index
    %c0_67 = arith.constant 0 : index
    %91 = vector.load %arg13[%c6_65, %c0_66, %c0_67] : memref<8x2x256xf32, #tpu.memory_space<vmem>>, vector<1x2x256xf32>
    %92 = vector.shape_cast %91 : vector<1x2x256xf32> to vector<2x256xf32>
    %93 = vector.shape_cast %90 : vector<2x256xf32> to vector<1x2x256xf32>
    tpu.vector_store %arg13[%c6_65, %c0_66, %c0_67], %93 {strides = array<i32>} : memref<8x2x256xf32, #tpu.memory_space<vmem>>, vector<1x2x256xf32>,
    %c7 = arith.constant 7 : index
    %c0_68 = arith.constant 0 : index
    %94 = memref.load %arg1[%c7, %c0_68] : memref<8x2xi32, #tpu.memory_space<smem>>
    %95 = arith.index_cast %94 : i32 to index
    %c0_69 = arith.constant 0 : index
    %96 = vector.load %arg2[%95, %c0_69] : memref<50x32xf32, #tpu.memory_space<vmem>>, vector<1x32xf32>
    %c7_70 = arith.constant 7 : index
    %c1_71 = arith.constant 1 : index
    %97 = memref.load %arg1[%c7_70, %c1_71] : memref<8x2xi32, #tpu.memory_space<smem>>
    %98 = arith.index_cast %97 : i32 to index
    %c0_72 = arith.constant 0 : index
    %99 = vector.load %arg2[%98, %c0_72] : memref<50x32xf32, #tpu.memory_space<vmem>>, vector<1x32xf32>
    %100 = tpu.concatenate %96, %99 in 0 : vector<1x32xf32>, vector<1x32xf32> -> vector<2x32xf32>
    %cst_73 = arith.constant dense<0.000000e+00> : vector<2x256xf32>
    %101 = tpu.matmul %100, %0, %cst_73 {dimension_numbers = #tpu.dot_dimension_numbers<[1], [0], [0], [1], [0, 0, 1, 1], [], []>} : vector<2x32xf32>, vector<32x256xf32>, vector<2x256xf32> -> vector<2x256xf32>
    %102 = vector.broadcast %2 : vector<1x256xf32> to vector<2x256xf32>
    %103 = arith.addf %101, %102 : vector<2x256xf32>
    %c7_74 = arith.constant 7 : index
    %c0_75 = arith.constant 0 : index
    %c0_76 = arith.constant 0 : index
    %104 = vector.load %arg13[%c7_74, %c0_75, %c0_76] : memref<8x2x256xf32, #tpu.memory_space<vmem>>, vector<1x2x256xf32>
    %105 = vector.shape_cast %104 : vector<1x2x256xf32> to vector<2x256xf32>
    %106 = vector.shape_cast %103 : vector<2x256xf32> to vector<1x2x256xf32>
    tpu.vector_store %arg13[%c7_74, %c0_75, %c0_76], %106 {strides = array<i32>} : memref<8x2x256xf32, #tpu.memory_space<vmem>>, vector<1x2x256xf32>,
    %cst_77 = arith.constant 0.000000e+00 : f32
    %107 = vector.broadcast %cst_77 : f32 to vector<2x32xf32>
    %c0_i32 = arith.constant 0 : i32
    %c7_i32 = arith.constant 7 : i32
    %108 = arith.subi %c7_i32, %c0_i32 : i32
    %109 = tpu.concatenate %107, %107 in 1 : vector<2x32xf32>, vector<2x32xf32> -> vector<2x64xf32>
    %cst_78 = arith.constant dense<0.000000e+00> : vector<2x256xf32>
    %110 = tpu.matmul %109, %1, %cst_78 {dimension_numbers = #tpu.dot_dimension_numbers<[1], [0], [0], [1], [0, 0, 1, 1], [], []>} : vector<2x64xf32>, vector<64x256xf32>, vector<2x256xf32> -> vector<2x256xf32>
    %111 = arith.index_cast %c0_i32 : i32 to index
    %c0_79 = arith.constant 0 : index
    %c0_80 = arith.constant 0 : index
    %112 = vector.load %arg13[%111, %c0_79, %c0_80] : memref<8x2x256xf32, #tpu.memory_space<vmem>>, vector<1x2x128xf32>
    %113 = vector.shape_cast %112 : vector<1x2x128xf32> to vector<2x128xf32>
    %114 = vector.extract_strided_slice %110 {offsets = [0, 0], sizes = [2, 128], strides = [1, 1]} : vector<2x256xf32> to vector<2x128xf32>
    %115 = arith.addf %113, %114 : vector<2x128xf32>
    %116 = arith.index_cast %108 : i32 to index
    %c0_81 = arith.constant 0 : index
    %c128 = arith.constant 128 : index
    %117 = vector.load %arg13[%116, %c0_81, %c128] : memref<8x2x256xf32, #tpu.memory_space<vmem>>, vector<1x2x128xf32>
    %118 = vector.shape_cast %117 : vector<1x2x128xf32> to vector<2x128xf32>
    %119 = vector.extract_strided_slice %110 {offsets = [0, 128], sizes = [2, 128], strides = [1, 1]} : vector<2x256xf32> to vector<2x128xf32>
    %120 = arith.addf %118, %119 : vector<2x128xf32>
    %121 = vector.extract_strided_slice %115 {offsets = [0, 0], sizes = [2, 96], strides = [1, 1]} : vector<2x128xf32> to vector<2x96xf32>
    %122 = arith.negf %121 : vector<2x96xf32>
    %123 = math.exp %122 : vector<2x96xf32>
    %cst_82 = arith.constant 1.000000e+00 : f32
    %124 = vector.broadcast %cst_82 : f32 to vector<2x96xf32>
    %125 = arith.addf %124, %123 : vector<2x96xf32>
    %126 = arith.divf %124, %125 : vector<2x96xf32>
    %127 = vector.extract_strided_slice %126 {offsets = [0, 0], sizes = [2, 32], strides = [1, 1]} : vector<2x96xf32> to vector<2x32xf32>
    %128 = vector.extract_strided_slice %126 {offsets = [0, 32], sizes = [2, 32], strides = [1, 1]} : vector<2x96xf32> to vector<2x32xf32>
    %129 = vector.extract_strided_slice %126 {offsets = [0, 64], sizes = [2, 32], strides = [1, 1]} : vector<2x96xf32> to vector<2x32xf32>
    %130 = vector.extract_strided_slice %115 {offsets = [0, 96], sizes = [2, 32], strides = [1, 1]} : vector<2x128xf32> to vector<2x32xf32>
    %131 = math.tanh %130 : vector<2x32xf32>
    %132 = arith.mulf %128, %107 : vector<2x32xf32>
    %133 = arith.mulf %127, %131 : vector<2x32xf32>
    %134 = arith.addf %132, %133 : vector<2x32xf32>
    %135 = math.tanh %134 : vector<2x32xf32>
    %136 = arith.mulf %129, %135 : vector<2x32xf32>
    %137 = vector.extract_strided_slice %120 {offsets = [0, 0], sizes = [2, 96], strides = [1, 1]} : vector<2x128xf32> to vector<2x96xf32>
    %138 = arith.negf %137 : vector<2x96xf32>
    %139 = math.exp %138 : vector<2x96xf32>
    %cst_83 = arith.constant 1.000000e+00 : f32
    %140 = vector.broadcast %cst_83 : f32 to vector<2x96xf32>
    %141 = arith.addf %140, %139 : vector<2x96xf32>
    %142 = arith.divf %140, %141 : vector<2x96xf32>
    %143 = vector.extract_strided_slice %142 {offsets = [0, 0], sizes = [2, 32], strides = [1, 1]} : vector<2x96xf32> to vector<2x32xf32>
    %144 = vector.extract_strided_slice %142 {offsets = [0, 32], sizes = [2, 32], strides = [1, 1]} : vector<2x96xf32> to vector<2x32xf32>
    %145 = vector.extract_strided_slice %142 {offsets = [0, 64], sizes = [2, 32], strides = [1, 1]} : vector<2x96xf32> to vector<2x32xf32>
    %146 = vector.extract_strided_slice %120 {offsets = [0, 96], sizes = [2, 32], strides = [1, 1]} : vector<2x128xf32> to vector<2x32xf32>
    %147 = math.tanh %146 : vector<2x32xf32>
    %148 = arith.mulf %144, %107 : vector<2x32xf32>
    %149 = arith.mulf %143, %147 : vector<2x32xf32>
    %150 = arith.addf %148, %149 : vector<2x32xf32>
    %151 = math.tanh %150 : vector<2x32xf32>
    %152 = arith.mulf %145, %151 : vector<2x32xf32>
    %153 = arith.index_cast %c0_i32 : i32 to index
    %c0_84 = arith.constant 0 : index
    %c0_85 = arith.constant 0 : index
    %154 = vector.load %arg11[%153, %c0_84, %c0_85] : memref<8x2x32xf32, #tpu.memory_space<vmem>>, vector<1x2x32xf32>
    %155 = vector.shape_cast %154 : vector<1x2x32xf32> to vector<2x32xf32>
    %156 = vector.shape_cast %136 : vector<2x32xf32> to vector<1x2x32xf32>
    tpu.vector_store %arg11[%153, %c0_84, %c0_85], %156 {strides = array<i32>} : memref<8x2x32xf32, #tpu.memory_space<vmem>>, vector<1x2x32xf32>,
    %157 = arith.index_cast %108 : i32 to index
    %c0_86 = arith.constant 0 : index
    %c0_87 = arith.constant 0 : index
    %158 = vector.load %arg12[%157, %c0_86, %c0_87] : memref<8x2x32xf32, #tpu.memory_space<vmem>>, vector<1x2x32xf32>
    %159 = vector.shape_cast %158 : vector<1x2x32xf32> to vector<2x32xf32>
    %160 = vector.shape_cast %152 : vector<2x32xf32> to vector<1x2x32xf32>
    tpu.vector_store %arg12[%157, %c0_86, %c0_87], %160 {strides = array<i32>} : memref<8x2x32xf32, #tpu.memory_space<vmem>>, vector<1x2x32xf32>,
    %c1_i32 = arith.constant 1 : i32
    %c7_i32_88 = arith.constant 7 : i32
    %161 = arith.subi %c7_i32_88, %c1_i32 : i32
    %162 = tpu.concatenate %136, %152 in 1 : vector<2x32xf32>, vector<2x32xf32> -> vector<2x64xf32>
    %cst_89 = arith.constant dense<0.000000e+00> : vector<2x256xf32>
    %163 = tpu.matmul %162, %1, %cst_89 {dimension_numbers = #tpu.dot_dimension_numbers<[1], [0], [0], [1], [0, 0, 1, 1], [], []>} : vector<2x64xf32>, vector<64x256xf32>, vector<2x256xf32> -> vector<2x256xf32>
    %164 = arith.index_cast %c1_i32 : i32 to index
    %c0_90 = arith.constant 0 : index
    %c0_91 = arith.constant 0 : index
    %165 = vector.load %arg13[%164, %c0_90, %c0_91] : memref<8x2x256xf32, #tpu.memory_space<vmem>>, vector<1x2x128xf32>
    %166 = vector.shape_cast %165 : vector<1x2x128xf32> to vector<2x128xf32>
    %167 = vector.extract_strided_slice %163 {offsets = [0, 0], sizes = [2, 128], strides = [1, 1]} : vector<2x256xf32> to vector<2x128xf32>
    %168 = arith.addf %166, %167 : vector<2x128xf32>
    %169 = arith.index_cast %161 : i32 to index
    %c0_92 = arith.constant 0 : index
    %c128_93 = arith.constant 128 : index
    %170 = vector.load %arg13[%169, %c0_92, %c128_93] : memref<8x2x256xf32, #tpu.memory_space<vmem>>, vector<1x2x128xf32>
    %171 = vector.shape_cast %170 : vector<1x2x128xf32> to vector<2x128xf32>
    %172 = vector.extract_strided_slice %163 {offsets = [0, 128], sizes = [2, 128], strides = [1, 1]} : vector<2x256xf32> to vector<2x128xf32>
    %173 = arith.addf %171, %172 : vector<2x128xf32>
    %174 = vector.extract_strided_slice %168 {offsets = [0, 0], sizes = [2, 96], strides = [1, 1]} : vector<2x128xf32> to vector<2x96xf32>
    %175 = arith.negf %174 : vector<2x96xf32>
    %176 = math.exp %175 : vector<2x96xf32>
    %cst_94 = arith.constant 1.000000e+00 : f32
    %177 = vector.broadcast %cst_94 : f32 to vector<2x96xf32>
    %178 = arith.addf %177, %176 : vector<2x96xf32>
    %179 = arith.divf %177, %178 : vector<2x96xf32>
    %180 = vector.extract_strided_slice %179 {offsets = [0, 0], sizes = [2, 32], strides = [1, 1]} : vector<2x96xf32> to vector<2x32xf32>
    %181 = vector.extract_strided_slice %179 {offsets = [0, 32], sizes = [2, 32], strides = [1, 1]} : vector<2x96xf32> to vector<2x32xf32>
    %182 = vector.extract_strided_slice %179 {offsets = [0, 64], sizes = [2, 32], strides = [1, 1]} : vector<2x96xf32> to vector<2x32xf32>
    %183 = vector.extract_strided_slice %168 {offsets = [0, 96], sizes = [2, 32], strides = [1, 1]} : vector<2x128xf32> to vector<2x32xf32>
    %184 = math.tanh %183 : vector<2x32xf32>
    %185 = arith.mulf %181, %134 : vector<2x32xf32>
    %186 = arith.mulf %180, %184 : vector<2x32xf32>
    %187 = arith.addf %185, %186 : vector<2x32xf32>
    %188 = math.tanh %187 : vector<2x32xf32>
    %189 = arith.mulf %182, %188 : vector<2x32xf32>
    %190 = vector.extract_strided_slice %173 {offsets = [0, 0], sizes = [2, 96], strides = [1, 1]} : vector<2x128xf32> to vector<2x96xf32>
    %191 = arith.negf %190 : vector<2x96xf32>
    %192 = math.exp %191 : vector<2x96xf32>
    %cst_95 = arith.constant 1.000000e+00 : f32
    %193 = vector.broadcast %cst_95 : f32 to vector<2x96xf32>
    %194 = arith.addf %193, %192 : vector<2x96xf32>
    %195 = arith.divf %193, %194 : vector<2x96xf32>
    %196 = vector.extract_strided_slice %195 {offsets = [0, 0], sizes = [2, 32], strides = [1, 1]} : vector<2x96xf32> to vector<2x32xf32>
    %197 = vector.extract_strided_slice %195 {offsets = [0, 32], sizes = [2, 32], strides = [1, 1]} : vector<2x96xf32> to vector<2x32xf32>
    %198 = vector.extract_strided_slice %195 {offsets = [0, 64], sizes = [2, 32], strides = [1, 1]} : vector<2x96xf32> to vector<2x32xf32>
    %199 = vector.extract_strided_slice %173 {offsets = [0, 96], sizes = [2, 32], strides = [1, 1]} : vector<2x128xf32> to vector<2x32xf32>
    %200 = math.tanh %199 : vector<2x32xf32>
    %201 = arith.mulf %197, %150 : vector<2x32xf32>
    %202 = arith.mulf %196, %200 : vector<2x32xf32>
    %203 = arith.addf %201, %202 : vector<2x32xf32>
    %204 = math.tanh %203 : vector<2x32xf32>
    %205 = arith.mulf %198, %204 : vector<2x32xf32>
    %206 = arith.index_cast %c1_i32 : i32 to index
    %c0_96 = arith.constant 0 : index
    %c0_97 = arith.constant 0 : index
    %207 = vector.load %arg11[%206, %c0_96, %c0_97] : memref<8x2x32xf32, #tpu.memory_space<vmem>>, vector<1x2x32xf32>
    %208 = vector.shape_cast %207 : vector<1x2x32xf32> to vector<2x32xf32>
    %209 = vector.shape_cast %189 : vector<2x32xf32> to vector<1x2x32xf32>
    tpu.vector_store %arg11[%206, %c0_96, %c0_97], %209 {strides = array<i32>} : memref<8x2x32xf32, #tpu.memory_space<vmem>>, vector<1x2x32xf32>,
    %210 = arith.index_cast %161 : i32 to index
    %c0_98 = arith.constant 0 : index
    %c0_99 = arith.constant 0 : index
    %211 = vector.load %arg12[%210, %c0_98, %c0_99] : memref<8x2x32xf32, #tpu.memory_space<vmem>>, vector<1x2x32xf32>
    %212 = vector.shape_cast %211 : vector<1x2x32xf32> to vector<2x32xf32>
    %213 = vector.shape_cast %205 : vector<2x32xf32> to vector<1x2x32xf32>
    tpu.vector_store %arg12[%210, %c0_98, %c0_99], %213 {strides = array<i32>} : memref<8x2x32xf32, #tpu.memory_space<vmem>>, vector<1x2x32xf32>,
    %c2_i32 = arith.constant 2 : i32
    %c7_i32_100 = arith.constant 7 : i32
    %214 = arith.subi %c7_i32_100, %c2_i32 : i32
    %215 = tpu.concatenate %189, %205 in 1 : vector<2x32xf32>, vector<2x32xf32> -> vector<2x64xf32>
    %cst_101 = arith.constant dense<0.000000e+00> : vector<2x256xf32>
    %216 = tpu.matmul %215, %1, %cst_101 {dimension_numbers = #tpu.dot_dimension_numbers<[1], [0], [0], [1], [0, 0, 1, 1], [], []>} : vector<2x64xf32>, vector<64x256xf32>, vector<2x256xf32> -> vector<2x256xf32>
    %217 = arith.index_cast %c2_i32 : i32 to index
    %c0_102 = arith.constant 0 : index
    %c0_103 = arith.constant 0 : index
    %218 = vector.load %arg13[%217, %c0_102, %c0_103] : memref<8x2x256xf32, #tpu.memory_space<vmem>>, vector<1x2x128xf32>
    %219 = vector.shape_cast %218 : vector<1x2x128xf32> to vector<2x128xf32>
    %220 = vector.extract_strided_slice %216 {offsets = [0, 0], sizes = [2, 128], strides = [1, 1]} : vector<2x256xf32> to vector<2x128xf32>
    %221 = arith.addf %219, %220 : vector<2x128xf32>
    %222 = arith.index_cast %214 : i32 to index
    %c0_104 = arith.constant 0 : index
    %c128_105 = arith.constant 128 : index
    %223 = vector.load %arg13[%222, %c0_104, %c128_105] : memref<8x2x256xf32, #tpu.memory_space<vmem>>, vector<1x2x128xf32>
    %224 = vector.shape_cast %223 : vector<1x2x128xf32> to vector<2x128xf32>
    %225 = vector.extract_strided_slice %216 {offsets = [0, 128], sizes = [2, 128], strides = [1, 1]} : vector<2x256xf32> to vector<2x128xf32>
    %226 = arith.addf %224, %225 : vector<2x128xf32>
    %227 = vector.extract_strided_slice %221 {offsets = [0, 0], sizes = [2, 96], strides = [1, 1]} : vector<2x128xf32> to vector<2x96xf32>
    %228 = arith.negf %227 : vector<2x96xf32>
    %229 = math.exp %228 : vector<2x96xf32>
    %cst_106 = arith.constant 1.000000e+00 : f32
    %230 = vector.broadcast %cst_106 : f32 to vector<2x96xf32>
    %231 = arith.addf %230, %229 : vector<2x96xf32>
    %232 = arith.divf %230, %231 : vector<2x96xf32>
    %233 = vector.extract_strided_slice %232 {offsets = [0, 0], sizes = [2, 32], strides = [1, 1]} : vector<2x96xf32> to vector<2x32xf32>
    %234 = vector.extract_strided_slice %232 {offsets = [0, 32], sizes = [2, 32], strides = [1, 1]} : vector<2x96xf32> to vector<2x32xf32>
    %235 = vector.extract_strided_slice %232 {offsets = [0, 64], sizes = [2, 32], strides = [1, 1]} : vector<2x96xf32> to vector<2x32xf32>
    %236 = vector.extract_strided_slice %221 {offsets = [0, 96], sizes = [2, 32], strides = [1, 1]} : vector<2x128xf32> to vector<2x32xf32>
    %237 = math.tanh %236 : vector<2x32xf32>
    %238 = arith.mulf %234, %187 : vector<2x32xf32>
    %239 = arith.mulf %233, %237 : vector<2x32xf32>
    %240 = arith.addf %238, %239 : vector<2x32xf32>
    %241 = math.tanh %240 : vector<2x32xf32>
    %242 = arith.mulf %235, %241 : vector<2x32xf32>
    %243 = vector.extract_strided_slice %226 {offsets = [0, 0], sizes = [2, 96], strides = [1, 1]} : vector<2x128xf32> to vector<2x96xf32>
    %244 = arith.negf %243 : vector<2x96xf32>
    %245 = math.exp %244 : vector<2x96xf32>
    %cst_107 = arith.constant 1.000000e+00 : f32
    %246 = vector.broadcast %cst_107 : f32 to vector<2x96xf32>
    %247 = arith.addf %246, %245 : vector<2x96xf32>
    %248 = arith.divf %246, %247 : vector<2x96xf32>
    %249 = vector.extract_strided_slice %248 {offsets = [0, 0], sizes = [2, 32], strides = [1, 1]} : vector<2x96xf32> to vector<2x32xf32>
    %250 = vector.extract_strided_slice %248 {offsets = [0, 32], sizes = [2, 32], strides = [1, 1]} : vector<2x96xf32> to vector<2x32xf32>
    %251 = vector.extract_strided_slice %248 {offsets = [0, 64], sizes = [2, 32], strides = [1, 1]} : vector<2x96xf32> to vector<2x32xf32>
    %252 = vector.extract_strided_slice %226 {offsets = [0, 96], sizes = [2, 32], strides = [1, 1]} : vector<2x128xf32> to vector<2x32xf32>
    %253 = math.tanh %252 : vector<2x32xf32>
    %254 = arith.mulf %250, %203 : vector<2x32xf32>
    %255 = arith.mulf %249, %253 : vector<2x32xf32>
    %256 = arith.addf %254, %255 : vector<2x32xf32>
    %257 = math.tanh %256 : vector<2x32xf32>
    %258 = arith.mulf %251, %257 : vector<2x32xf32>
    %259 = arith.index_cast %c2_i32 : i32 to index
    %c0_108 = arith.constant 0 : index
    %c0_109 = arith.constant 0 : index
    %260 = vector.load %arg11[%259, %c0_108, %c0_109] : memref<8x2x32xf32, #tpu.memory_space<vmem>>, vector<1x2x32xf32>
    %261 = vector.shape_cast %260 : vector<1x2x32xf32> to vector<2x32xf32>
    %262 = vector.shape_cast %242 : vector<2x32xf32> to vector<1x2x32xf32>
    tpu.vector_store %arg11[%259, %c0_108, %c0_109], %262 {strides = array<i32>} : memref<8x2x32xf32, #tpu.memory_space<vmem>>, vector<1x2x32xf32>,
    %263 = arith.index_cast %214 : i32 to index
    %c0_110 = arith.constant 0 : index
    %c0_111 = arith.constant 0 : index
    %264 = vector.load %arg12[%263, %c0_110, %c0_111] : memref<8x2x32xf32, #tpu.memory_space<vmem>>, vector<1x2x32xf32>
    %265 = vector.shape_cast %264 : vector<1x2x32xf32> to vector<2x32xf32>
    %266 = vector.shape_cast %258 : vector<2x32xf32> to vector<1x2x32xf32>
    tpu.vector_store %arg12[%263, %c0_110, %c0_111], %266 {strides = array<i32>} : memref<8x2x32xf32, #tpu.memory_space<vmem>>, vector<1x2x32xf32>,
    %c3_i32 = arith.constant 3 : i32
    %c7_i32_112 = arith.constant 7 : i32
    %267 = arith.subi %c7_i32_112, %c3_i32 : i32
    %268 = tpu.concatenate %242, %258 in 1 : vector<2x32xf32>, vector<2x32xf32> -> vector<2x64xf32>
    %cst_113 = arith.constant dense<0.000000e+00> : vector<2x256xf32>
    %269 = tpu.matmul %268, %1, %cst_113 {dimension_numbers = #tpu.dot_dimension_numbers<[1], [0], [0], [1], [0, 0, 1, 1], [], []>} : vector<2x64xf32>, vector<64x256xf32>, vector<2x256xf32> -> vector<2x256xf32>
    %270 = arith.index_cast %c3_i32 : i32 to index
    %c0_114 = arith.constant 0 : index
    %c0_115 = arith.constant 0 : index
    %271 = vector.load %arg13[%270, %c0_114, %c0_115] : memref<8x2x256xf32, #tpu.memory_space<vmem>>, vector<1x2x128xf32>
    %272 = vector.shape_cast %271 : vector<1x2x128xf32> to vector<2x128xf32>
    %273 = vector.extract_strided_slice %269 {offsets = [0, 0], sizes = [2, 128], strides = [1, 1]} : vector<2x256xf32> to vector<2x128xf32>
    %274 = arith.addf %272, %273 : vector<2x128xf32>
    %275 = arith.index_cast %267 : i32 to index
    %c0_116 = arith.constant 0 : index
    %c128_117 = arith.constant 128 : index
    %276 = vector.load %arg13[%275, %c0_116, %c128_117] : memref<8x2x256xf32, #tpu.memory_space<vmem>>, vector<1x2x128xf32>
    %277 = vector.shape_cast %276 : vector<1x2x128xf32> to vector<2x128xf32>
    %278 = vector.extract_strided_slice %269 {offsets = [0, 128], sizes = [2, 128], strides = [1, 1]} : vector<2x256xf32> to vector<2x128xf32>
    %279 = arith.addf %277, %278 : vector<2x128xf32>
    %280 = vector.extract_strided_slice %274 {offsets = [0, 0], sizes = [2, 96], strides = [1, 1]} : vector<2x128xf32> to vector<2x96xf32>
    %281 = arith.negf %280 : vector<2x96xf32>
    %282 = math.exp %281 : vector<2x96xf32>
    %cst_118 = arith.constant 1.000000e+00 : f32
    %283 = vector.broadcast %cst_118 : f32 to vector<2x96xf32>
    %284 = arith.addf %283, %282 : vector<2x96xf32>
    %285 = arith.divf %283, %284 : vector<2x96xf32>
    %286 = vector.extract_strided_slice %285 {offsets = [0, 0], sizes = [2, 32], strides = [1, 1]} : vector<2x96xf32> to vector<2x32xf32>
    %287 = vector.extract_strided_slice %285 {offsets = [0, 32], sizes = [2, 32], strides = [1, 1]} : vector<2x96xf32> to vector<2x32xf32>
    %288 = vector.extract_strided_slice %285 {offsets = [0, 64], sizes = [2, 32], strides = [1, 1]} : vector<2x96xf32> to vector<2x32xf32>
    %289 = vector.extract_strided_slice %274 {offsets = [0, 96], sizes = [2, 32], strides = [1, 1]} : vector<2x128xf32> to vector<2x32xf32>
    %290 = math.tanh %289 : vector<2x32xf32>
    %291 = arith.mulf %287, %240 : vector<2x32xf32>
    %292 = arith.mulf %286, %290 : vector<2x32xf32>
    %293 = arith.addf %291, %292 : vector<2x32xf32>
    %294 = math.tanh %293 : vector<2x32xf32>
    %295 = arith.mulf %288, %294 : vector<2x32xf32>
    %296 = vector.extract_strided_slice %279 {offsets = [0, 0], sizes = [2, 96], strides = [1, 1]} : vector<2x128xf32> to vector<2x96xf32>
    %297 = arith.negf %296 : vector<2x96xf32>
    %298 = math.exp %297 : vector<2x96xf32>
    %cst_119 = arith.constant 1.000000e+00 : f32
    %299 = vector.broadcast %cst_119 : f32 to vector<2x96xf32>
    %300 = arith.addf %299, %298 : vector<2x96xf32>
    %301 = arith.divf %299, %300 : vector<2x96xf32>
    %302 = vector.extract_strided_slice %301 {offsets = [0, 0], sizes = [2, 32], strides = [1, 1]} : vector<2x96xf32> to vector<2x32xf32>
    %303 = vector.extract_strided_slice %301 {offsets = [0, 32], sizes = [2, 32], strides = [1, 1]} : vector<2x96xf32> to vector<2x32xf32>
    %304 = vector.extract_strided_slice %301 {offsets = [0, 64], sizes = [2, 32], strides = [1, 1]} : vector<2x96xf32> to vector<2x32xf32>
    %305 = vector.extract_strided_slice %279 {offsets = [0, 96], sizes = [2, 32], strides = [1, 1]} : vector<2x128xf32> to vector<2x32xf32>
    %306 = math.tanh %305 : vector<2x32xf32>
    %307 = arith.mulf %303, %256 : vector<2x32xf32>
    %308 = arith.mulf %302, %306 : vector<2x32xf32>
    %309 = arith.addf %307, %308 : vector<2x32xf32>
    %310 = math.tanh %309 : vector<2x32xf32>
    %311 = arith.mulf %304, %310 : vector<2x32xf32>
    %312 = arith.index_cast %c3_i32 : i32 to index
    %c0_120 = arith.constant 0 : index
    %c0_121 = arith.constant 0 : index
    %313 = vector.load %arg11[%312, %c0_120, %c0_121] : memref<8x2x32xf32, #tpu.memory_space<vmem>>, vector<1x2x32xf32>
    %314 = vector.shape_cast %313 : vector<1x2x32xf32> to vector<2x32xf32>
    %315 = vector.shape_cast %295 : vector<2x32xf32> to vector<1x2x32xf32>
    tpu.vector_store %arg11[%312, %c0_120, %c0_121], %315 {strides = array<i32>} : memref<8x2x32xf32, #tpu.memory_space<vmem>>, vector<1x2x32xf32>,
    %316 = arith.index_cast %267 : i32 to index
    %c0_122 = arith.constant 0 : index
    %c0_123 = arith.constant 0 : index
    %317 = vector.load %arg12[%316, %c0_122, %c0_123] : memref<8x2x32xf32, #tpu.memory_space<vmem>>, vector<1x2x32xf32>
    %318 = vector.shape_cast %317 : vector<1x2x32xf32> to vector<2x32xf32>
    %319 = vector.shape_cast %311 : vector<2x32xf32> to vector<1x2x32xf32>
    tpu.vector_store %arg12[%316, %c0_122, %c0_123], %319 {strides = array<i32>} : memref<8x2x32xf32, #tpu.memory_space<vmem>>, vector<1x2x32xf32>,
    %c4_i32 = arith.constant 4 : i32
    %c7_i32_124 = arith.constant 7 : i32
    %320 = arith.subi %c7_i32_124, %c4_i32 : i32
    %321 = tpu.concatenate %295, %311 in 1 : vector<2x32xf32>, vector<2x32xf32> -> vector<2x64xf32>
    %cst_125 = arith.constant dense<0.000000e+00> : vector<2x256xf32>
    %322 = tpu.matmul %321, %1, %cst_125 {dimension_numbers = #tpu.dot_dimension_numbers<[1], [0], [0], [1], [0, 0, 1, 1], [], []>} : vector<2x64xf32>, vector<64x256xf32>, vector<2x256xf32> -> vector<2x256xf32>
    %323 = arith.index_cast %c4_i32 : i32 to index
    %c0_126 = arith.constant 0 : index
    %c0_127 = arith.constant 0 : index
    %324 = vector.load %arg13[%323, %c0_126, %c0_127] : memref<8x2x256xf32, #tpu.memory_space<vmem>>, vector<1x2x128xf32>
    %325 = vector.shape_cast %324 : vector<1x2x128xf32> to vector<2x128xf32>
    %326 = vector.extract_strided_slice %322 {offsets = [0, 0], sizes = [2, 128], strides = [1, 1]} : vector<2x256xf32> to vector<2x128xf32>
    %327 = arith.addf %325, %326 : vector<2x128xf32>
    %328 = arith.index_cast %320 : i32 to index
    %c0_128 = arith.constant 0 : index
    %c128_129 = arith.constant 128 : index
    %329 = vector.load %arg13[%328, %c0_128, %c128_129] : memref<8x2x256xf32, #tpu.memory_space<vmem>>, vector<1x2x128xf32>
    %330 = vector.shape_cast %329 : vector<1x2x128xf32> to vector<2x128xf32>
    %331 = vector.extract_strided_slice %322 {offsets = [0, 128], sizes = [2, 128], strides = [1, 1]} : vector<2x256xf32> to vector<2x128xf32>
    %332 = arith.addf %330, %331 : vector<2x128xf32>
    %333 = vector.extract_strided_slice %327 {offsets = [0, 0], sizes = [2, 96], strides = [1, 1]} : vector<2x128xf32> to vector<2x96xf32>
    %334 = arith.negf %333 : vector<2x96xf32>
    %335 = math.exp %334 : vector<2x96xf32>
    %cst_130 = arith.constant 1.000000e+00 : f32
    %336 = vector.broadcast %cst_130 : f32 to vector<2x96xf32>
    %337 = arith.addf %336, %335 : vector<2x96xf32>
    %338 = arith.divf %336, %337 : vector<2x96xf32>
    %339 = vector.extract_strided_slice %338 {offsets = [0, 0], sizes = [2, 32], strides = [1, 1]} : vector<2x96xf32> to vector<2x32xf32>
    %340 = vector.extract_strided_slice %338 {offsets = [0, 32], sizes = [2, 32], strides = [1, 1]} : vector<2x96xf32> to vector<2x32xf32>
    %341 = vector.extract_strided_slice %338 {offsets = [0, 64], sizes = [2, 32], strides = [1, 1]} : vector<2x96xf32> to vector<2x32xf32>
    %342 = vector.extract_strided_slice %327 {offsets = [0, 96], sizes = [2, 32], strides = [1, 1]} : vector<2x128xf32> to vector<2x32xf32>
    %343 = math.tanh %342 : vector<2x32xf32>
    %344 = arith.mulf %340, %293 : vector<2x32xf32>
    %345 = arith.mulf %339, %343 : vector<2x32xf32>
    %346 = arith.addf %344, %345 : vector<2x32xf32>
    %347 = math.tanh %346 : vector<2x32xf32>
    %348 = arith.mulf %341, %347 : vector<2x32xf32>
    %349 = vector.extract_strided_slice %332 {offsets = [0, 0], sizes = [2, 96], strides = [1, 1]} : vector<2x128xf32> to vector<2x96xf32>
    %350 = arith.negf %349 : vector<2x96xf32>
    %351 = math.exp %350 : vector<2x96xf32>
    %cst_131 = arith.constant 1.000000e+00 : f32
    %352 = vector.broadcast %cst_131 : f32 to vector<2x96xf32>
    %353 = arith.addf %352, %351 : vector<2x96xf32>
    %354 = arith.divf %352, %353 : vector<2x96xf32>
    %355 = vector.extract_strided_slice %354 {offsets = [0, 0], sizes = [2, 32], strides = [1, 1]} : vector<2x96xf32> to vector<2x32xf32>
    %356 = vector.extract_strided_slice %354 {offsets = [0, 32], sizes = [2, 32], strides = [1, 1]} : vector<2x96xf32> to vector<2x32xf32>
    %357 = vector.extract_strided_slice %354 {offsets = [0, 64], sizes = [2, 32], strides = [1, 1]} : vector<2x96xf32> to vector<2x32xf32>
    %358 = vector.extract_strided_slice %332 {offsets = [0, 96], sizes = [2, 32], strides = [1, 1]} : vector<2x128xf32> to vector<2x32xf32>
    %359 = math.tanh %358 : vector<2x32xf32>
    %360 = arith.mulf %356, %309 : vector<2x32xf32>
    %361 = arith.mulf %355, %359 : vector<2x32xf32>
    %362 = arith.addf %360, %361 : vector<2x32xf32>
    %363 = math.tanh %362 : vector<2x32xf32>
    %364 = arith.mulf %357, %363 : vector<2x32xf32>
    %365 = arith.index_cast %c4_i32 : i32 to index
    %c0_132 = arith.constant 0 : index
    %c0_133 = arith.constant 0 : index
    %366 = vector.load %arg11[%365, %c0_132, %c0_133] : memref<8x2x32xf32, #tpu.memory_space<vmem>>, vector<1x2x32xf32>
    %367 = vector.shape_cast %366 : vector<1x2x32xf32> to vector<2x32xf32>
    %368 = vector.shape_cast %348 : vector<2x32xf32> to vector<1x2x32xf32>
    tpu.vector_store %arg11[%365, %c0_132, %c0_133], %368 {strides = array<i32>} : memref<8x2x32xf32, #tpu.memory_space<vmem>>, vector<1x2x32xf32>,
    %369 = arith.index_cast %320 : i32 to index
    %c0_134 = arith.constant 0 : index
    %c0_135 = arith.constant 0 : index
    %370 = vector.load %arg12[%369, %c0_134, %c0_135] : memref<8x2x32xf32, #tpu.memory_space<vmem>>, vector<1x2x32xf32>
    %371 = vector.shape_cast %370 : vector<1x2x32xf32> to vector<2x32xf32>
    %372 = vector.shape_cast %364 : vector<2x32xf32> to vector<1x2x32xf32>
    tpu.vector_store %arg12[%369, %c0_134, %c0_135], %372 {strides = array<i32>} : memref<8x2x32xf32, #tpu.memory_space<vmem>>, vector<1x2x32xf32>,
    %c5_i32 = arith.constant 5 : i32
    %c7_i32_136 = arith.constant 7 : i32
    %373 = arith.subi %c7_i32_136, %c5_i32 : i32
    %374 = tpu.concatenate %348, %364 in 1 : vector<2x32xf32>, vector<2x32xf32> -> vector<2x64xf32>
    %cst_137 = arith.constant dense<0.000000e+00> : vector<2x256xf32>
    %375 = tpu.matmul %374, %1, %cst_137 {dimension_numbers = #tpu.dot_dimension_numbers<[1], [0], [0], [1], [0, 0, 1, 1], [], []>} : vector<2x64xf32>, vector<64x256xf32>, vector<2x256xf32> -> vector<2x256xf32>
    %376 = arith.index_cast %c5_i32 : i32 to index
    %c0_138 = arith.constant 0 : index
    %c0_139 = arith.constant 0 : index
    %377 = vector.load %arg13[%376, %c0_138, %c0_139] : memref<8x2x256xf32, #tpu.memory_space<vmem>>, vector<1x2x128xf32>
    %378 = vector.shape_cast %377 : vector<1x2x128xf32> to vector<2x128xf32>
    %379 = vector.extract_strided_slice %375 {offsets = [0, 0], sizes = [2, 128], strides = [1, 1]} : vector<2x256xf32> to vector<2x128xf32>
    %380 = arith.addf %378, %379 : vector<2x128xf32>
    %381 = arith.index_cast %373 : i32 to index
    %c0_140 = arith.constant 0 : index
    %c128_141 = arith.constant 128 : index
    %382 = vector.load %arg13[%381, %c0_140, %c128_141] : memref<8x2x256xf32, #tpu.memory_space<vmem>>, vector<1x2x128xf32>
    %383 = vector.shape_cast %382 : vector<1x2x128xf32> to vector<2x128xf32>
    %384 = vector.extract_strided_slice %375 {offsets = [0, 128], sizes = [2, 128], strides = [1, 1]} : vector<2x256xf32> to vector<2x128xf32>
    %385 = arith.addf %383, %384 : vector<2x128xf32>
    %386 = vector.extract_strided_slice %380 {offsets = [0, 0], sizes = [2, 96], strides = [1, 1]} : vector<2x128xf32> to vector<2x96xf32>
    %387 = arith.negf %386 : vector<2x96xf32>
    %388 = math.exp %387 : vector<2x96xf32>
    %cst_142 = arith.constant 1.000000e+00 : f32
    %389 = vector.broadcast %cst_142 : f32 to vector<2x96xf32>
    %390 = arith.addf %389, %388 : vector<2x96xf32>
    %391 = arith.divf %389, %390 : vector<2x96xf32>
    %392 = vector.extract_strided_slice %391 {offsets = [0, 0], sizes = [2, 32], strides = [1, 1]} : vector<2x96xf32> to vector<2x32xf32>
    %393 = vector.extract_strided_slice %391 {offsets = [0, 32], sizes = [2, 32], strides = [1, 1]} : vector<2x96xf32> to vector<2x32xf32>
    %394 = vector.extract_strided_slice %391 {offsets = [0, 64], sizes = [2, 32], strides = [1, 1]} : vector<2x96xf32> to vector<2x32xf32>
    %395 = vector.extract_strided_slice %380 {offsets = [0, 96], sizes = [2, 32], strides = [1, 1]} : vector<2x128xf32> to vector<2x32xf32>
    %396 = math.tanh %395 : vector<2x32xf32>
    %397 = arith.mulf %393, %346 : vector<2x32xf32>
    %398 = arith.mulf %392, %396 : vector<2x32xf32>
    %399 = arith.addf %397, %398 : vector<2x32xf32>
    %400 = math.tanh %399 : vector<2x32xf32>
    %401 = arith.mulf %394, %400 : vector<2x32xf32>
    %402 = vector.extract_strided_slice %385 {offsets = [0, 0], sizes = [2, 96], strides = [1, 1]} : vector<2x128xf32> to vector<2x96xf32>
    %403 = arith.negf %402 : vector<2x96xf32>
    %404 = math.exp %403 : vector<2x96xf32>
    %cst_143 = arith.constant 1.000000e+00 : f32
    %405 = vector.broadcast %cst_143 : f32 to vector<2x96xf32>
    %406 = arith.addf %405, %404 : vector<2x96xf32>
    %407 = arith.divf %405, %406 : vector<2x96xf32>
    %408 = vector.extract_strided_slice %407 {offsets = [0, 0], sizes = [2, 32], strides = [1, 1]} : vector<2x96xf32> to vector<2x32xf32>
    %409 = vector.extract_strided_slice %407 {offsets = [0, 32], sizes = [2, 32], strides = [1, 1]} : vector<2x96xf32> to vector<2x32xf32>
    %410 = vector.extract_strided_slice %407 {offsets = [0, 64], sizes = [2, 32], strides = [1, 1]} : vector<2x96xf32> to vector<2x32xf32>
    %411 = vector.extract_strided_slice %385 {offsets = [0, 96], sizes = [2, 32], strides = [1, 1]} : vector<2x128xf32> to vector<2x32xf32>
    %412 = math.tanh %411 : vector<2x32xf32>
    %413 = arith.mulf %409, %362 : vector<2x32xf32>
    %414 = arith.mulf %408, %412 : vector<2x32xf32>
    %415 = arith.addf %413, %414 : vector<2x32xf32>
    %416 = math.tanh %415 : vector<2x32xf32>
    %417 = arith.mulf %410, %416 : vector<2x32xf32>
    %418 = arith.index_cast %c5_i32 : i32 to index
    %c0_144 = arith.constant 0 : index
    %c0_145 = arith.constant 0 : index
    %419 = vector.load %arg11[%418, %c0_144, %c0_145] : memref<8x2x32xf32, #tpu.memory_space<vmem>>, vector<1x2x32xf32>
    %420 = vector.shape_cast %419 : vector<1x2x32xf32> to vector<2x32xf32>
    %421 = vector.shape_cast %401 : vector<2x32xf32> to vector<1x2x32xf32>
    tpu.vector_store %arg11[%418, %c0_144, %c0_145], %421 {strides = array<i32>} : memref<8x2x32xf32, #tpu.memory_space<vmem>>, vector<1x2x32xf32>,
    %422 = arith.index_cast %373 : i32 to index
    %c0_146 = arith.constant 0 : index
    %c0_147 = arith.constant 0 : index
    %423 = vector.load %arg12[%422, %c0_146, %c0_147] : memref<8x2x32xf32, #tpu.memory_space<vmem>>, vector<1x2x32xf32>
    %424 = vector.shape_cast %423 : vector<1x2x32xf32> to vector<2x32xf32>
    %425 = vector.shape_cast %417 : vector<2x32xf32> to vector<1x2x32xf32>
    tpu.vector_store %arg12[%422, %c0_146, %c0_147], %425 {strides = array<i32>} : memref<8x2x32xf32, #tpu.memory_space<vmem>>, vector<1x2x32xf32>,
    %c6_i32 = arith.constant 6 : i32
    %c7_i32_148 = arith.constant 7 : i32
    %426 = arith.subi %c7_i32_148, %c6_i32 : i32
    %427 = tpu.concatenate %401, %417 in 1 : vector<2x32xf32>, vector<2x32xf32> -> vector<2x64xf32>
    %cst_149 = arith.constant dense<0.000000e+00> : vector<2x256xf32>
    %428 = tpu.matmul %427, %1, %cst_149 {dimension_numbers = #tpu.dot_dimension_numbers<[1], [0], [0], [1], [0, 0, 1, 1], [], []>} : vector<2x64xf32>, vector<64x256xf32>, vector<2x256xf32> -> vector<2x256xf32>
    %429 = arith.index_cast %c6_i32 : i32 to index
    %c0_150 = arith.constant 0 : index
    %c0_151 = arith.constant 0 : index
    %430 = vector.load %arg13[%429, %c0_150, %c0_151] : memref<8x2x256xf32, #tpu.memory_space<vmem>>, vector<1x2x128xf32>
    %431 = vector.shape_cast %430 : vector<1x2x128xf32> to vector<2x128xf32>
    %432 = vector.extract_strided_slice %428 {offsets = [0, 0], sizes = [2, 128], strides = [1, 1]} : vector<2x256xf32> to vector<2x128xf32>
    %433 = arith.addf %431, %432 : vector<2x128xf32>
    %434 = arith.index_cast %426 : i32 to index
    %c0_152 = arith.constant 0 : index
    %c128_153 = arith.constant 128 : index
    %435 = vector.load %arg13[%434, %c0_152, %c128_153] : memref<8x2x256xf32, #tpu.memory_space<vmem>>, vector<1x2x128xf32>
    %436 = vector.shape_cast %435 : vector<1x2x128xf32> to vector<2x128xf32>
    %437 = vector.extract_strided_slice %428 {offsets = [0, 128], sizes = [2, 128], strides = [1, 1]} : vector<2x256xf32> to vector<2x128xf32>
    %438 = arith.addf %436, %437 : vector<2x128xf32>
    %439 = vector.extract_strided_slice %433 {offsets = [0, 0], sizes = [2, 96], strides = [1, 1]} : vector<2x128xf32> to vector<2x96xf32>
    %440 = arith.negf %439 : vector<2x96xf32>
    %441 = math.exp %440 : vector<2x96xf32>
    %cst_154 = arith.constant 1.000000e+00 : f32
    %442 = vector.broadcast %cst_154 : f32 to vector<2x96xf32>
    %443 = arith.addf %442, %441 : vector<2x96xf32>
    %444 = arith.divf %442, %443 : vector<2x96xf32>
    %445 = vector.extract_strided_slice %444 {offsets = [0, 0], sizes = [2, 32], strides = [1, 1]} : vector<2x96xf32> to vector<2x32xf32>
    %446 = vector.extract_strided_slice %444 {offsets = [0, 32], sizes = [2, 32], strides = [1, 1]} : vector<2x96xf32> to vector<2x32xf32>
    %447 = vector.extract_strided_slice %444 {offsets = [0, 64], sizes = [2, 32], strides = [1, 1]} : vector<2x96xf32> to vector<2x32xf32>
    %448 = vector.extract_strided_slice %433 {offsets = [0, 96], sizes = [2, 32], strides = [1, 1]} : vector<2x128xf32> to vector<2x32xf32>
    %449 = math.tanh %448 : vector<2x32xf32>
    %450 = arith.mulf %446, %399 : vector<2x32xf32>
    %451 = arith.mulf %445, %449 : vector<2x32xf32>
    %452 = arith.addf %450, %451 : vector<2x32xf32>
    %453 = math.tanh %452 : vector<2x32xf32>
    %454 = arith.mulf %447, %453 : vector<2x32xf32>
    %455 = vector.extract_strided_slice %438 {offsets = [0, 0], sizes = [2, 96], strides = [1, 1]} : vector<2x128xf32> to vector<2x96xf32>
    %456 = arith.negf %455 : vector<2x96xf32>
    %457 = math.exp %456 : vector<2x96xf32>
    %cst_155 = arith.constant 1.000000e+00 : f32
    %458 = vector.broadcast %cst_155 : f32 to vector<2x96xf32>
    %459 = arith.addf %458, %457 : vector<2x96xf32>
    %460 = arith.divf %458, %459 : vector<2x96xf32>
    %461 = vector.extract_strided_slice %460 {offsets = [0, 0], sizes = [2, 32], strides = [1, 1]} : vector<2x96xf32> to vector<2x32xf32>
    %462 = vector.extract_strided_slice %460 {offsets = [0, 32], sizes = [2, 32], strides = [1, 1]} : vector<2x96xf32> to vector<2x32xf32>
    %463 = vector.extract_strided_slice %460 {offsets = [0, 64], sizes = [2, 32], strides = [1, 1]} : vector<2x96xf32> to vector<2x32xf32>
    %464 = vector.extract_strided_slice %438 {offsets = [0, 96], sizes = [2, 32], strides = [1, 1]} : vector<2x128xf32> to vector<2x32xf32>
    %465 = math.tanh %464 : vector<2x32xf32>
    %466 = arith.mulf %462, %415 : vector<2x32xf32>
    %467 = arith.mulf %461, %465 : vector<2x32xf32>
    %468 = arith.addf %466, %467 : vector<2x32xf32>
    %469 = math.tanh %468 : vector<2x32xf32>
    %470 = arith.mulf %463, %469 : vector<2x32xf32>
    %471 = arith.index_cast %c6_i32 : i32 to index
    %c0_156 = arith.constant 0 : index
    %c0_157 = arith.constant 0 : index
    %472 = vector.load %arg11[%471, %c0_156, %c0_157] : memref<8x2x32xf32, #tpu.memory_space<vmem>>, vector<1x2x32xf32>
    %473 = vector.shape_cast %472 : vector<1x2x32xf32> to vector<2x32xf32>
    %474 = vector.shape_cast %454 : vector<2x32xf32> to vector<1x2x32xf32>
    tpu.vector_store %arg11[%471, %c0_156, %c0_157], %474 {strides = array<i32>} : memref<8x2x32xf32, #tpu.memory_space<vmem>>, vector<1x2x32xf32>,
    %475 = arith.index_cast %426 : i32 to index
    %c0_158 = arith.constant 0 : index
    %c0_159 = arith.constant 0 : index
    %476 = vector.load %arg12[%475, %c0_158, %c0_159] : memref<8x2x32xf32, #tpu.memory_space<vmem>>, vector<1x2x32xf32>
    %477 = vector.shape_cast %476 : vector<1x2x32xf32> to vector<2x32xf32>
    %478 = vector.shape_cast %470 : vector<2x32xf32> to vector<1x2x32xf32>
    tpu.vector_store %arg12[%475, %c0_158, %c0_159], %478 {strides = array<i32>} : memref<8x2x32xf32, #tpu.memory_space<vmem>>, vector<1x2x32xf32>,
    %c7_i32_160 = arith.constant 7 : i32
    %c7_i32_161 = arith.constant 7 : i32
    %479 = arith.subi %c7_i32_161, %c7_i32_160 : i32
    %480 = tpu.concatenate %454, %470 in 1 : vector<2x32xf32>, vector<2x32xf32> -> vector<2x64xf32>
    %cst_162 = arith.constant dense<0.000000e+00> : vector<2x256xf32>
    %481 = tpu.matmul %480, %1, %cst_162 {dimension_numbers = #tpu.dot_dimension_numbers<[1], [0], [0], [1], [0, 0, 1, 1], [], []>} : vector<2x64xf32>, vector<64x256xf32>, vector<2x256xf32> -> vector<2x256xf32>
    %482 = arith.index_cast %c7_i32_160 : i32 to index
    %c0_163 = arith.constant 0 : index
    %c0_164 = arith.constant 0 : index
    %483 = vector.load %arg13[%482, %c0_163, %c0_164] : memref<8x2x256xf32, #tpu.memory_space<vmem>>, vector<1x2x128xf32>
    %484 = vector.shape_cast %483 : vector<1x2x128xf32> to vector<2x128xf32>
    %485 = vector.extract_strided_slice %481 {offsets = [0, 0], sizes = [2, 128], strides = [1, 1]} : vector<2x256xf32> to vector<2x128xf32>
    %486 = arith.addf %484, %485 : vector<2x128xf32>
    %487 = arith.index_cast %479 : i32 to index
    %c0_165 = arith.constant 0 : index
    %c128_166 = arith.constant 128 : index
    %488 = vector.load %arg13[%487, %c0_165, %c128_166] : memref<8x2x256xf32, #tpu.memory_space<vmem>>, vector<1x2x128xf32>
    %489 = vector.shape_cast %488 : vector<1x2x128xf32> to vector<2x128xf32>
    %490 = vector.extract_strided_slice %481 {offsets = [0, 128], sizes = [2, 128], strides = [1, 1]} : vector<2x256xf32> to vector<2x128xf32>
    %491 = arith.addf %489, %490 : vector<2x128xf32>
    %492 = vector.extract_strided_slice %486 {offsets = [0, 0], sizes = [2, 96], strides = [1, 1]} : vector<2x128xf32> to vector<2x96xf32>
    %493 = arith.negf %492 : vector<2x96xf32>
    %494 = math.exp %493 : vector<2x96xf32>
    %cst_167 = arith.constant 1.000000e+00 : f32
    %495 = vector.broadcast %cst_167 : f32 to vector<2x96xf32>
    %496 = arith.addf %495, %494 : vector<2x96xf32>
    %497 = arith.divf %495, %496 : vector<2x96xf32>
    %498 = vector.extract_strided_slice %497 {offsets = [0, 0], sizes = [2, 32], strides = [1, 1]} : vector<2x96xf32> to vector<2x32xf32>
    %499 = vector.extract_strided_slice %497 {offsets = [0, 32], sizes = [2, 32], strides = [1, 1]} : vector<2x96xf32> to vector<2x32xf32>
    %500 = vector.extract_strided_slice %497 {offsets = [0, 64], sizes = [2, 32], strides = [1, 1]} : vector<2x96xf32> to vector<2x32xf32>
    %501 = vector.extract_strided_slice %486 {offsets = [0, 96], sizes = [2, 32], strides = [1, 1]} : vector<2x128xf32> to vector<2x32xf32>
    %502 = math.tanh %501 : vector<2x32xf32>
    %503 = arith.mulf %499, %452 : vector<2x32xf32>
    %504 = arith.mulf %498, %502 : vector<2x32xf32>
    %505 = arith.addf %503, %504 : vector<2x32xf32>
    %506 = math.tanh %505 : vector<2x32xf32>
    %507 = arith.mulf %500, %506 : vector<2x32xf32>
    %508 = vector.extract_strided_slice %491 {offsets = [0, 0], sizes = [2, 96], strides = [1, 1]} : vector<2x128xf32> to vector<2x96xf32>
    %509 = arith.negf %508 : vector<2x96xf32>
    %510 = math.exp %509 : vector<2x96xf32>
    %cst_168 = arith.constant 1.000000e+00 : f32
    %511 = vector.broadcast %cst_168 : f32 to vector<2x96xf32>
    %512 = arith.addf %511, %510 : vector<2x96xf32>
    %513 = arith.divf %511, %512 : vector<2x96xf32>
    %514 = vector.extract_strided_slice %513 {offsets = [0, 0], sizes = [2, 32], strides = [1, 1]} : vector<2x96xf32> to vector<2x32xf32>
    %515 = vector.extract_strided_slice %513 {offsets = [0, 32], sizes = [2, 32], strides = [1, 1]} : vector<2x96xf32> to vector<2x32xf32>
    %516 = vector.extract_strided_slice %513 {offsets = [0, 64], sizes = [2, 32], strides = [1, 1]} : vector<2x96xf32> to vector<2x32xf32>
    %517 = vector.extract_strided_slice %491 {offsets = [0, 96], sizes = [2, 32], strides = [1, 1]} : vector<2x128xf32> to vector<2x32xf32>
    %518 = math.tanh %517 : vector<2x32xf32>
    %519 = arith.mulf %515, %468 : vector<2x32xf32>
    %520 = arith.mulf %514, %518 : vector<2x32xf32>
    %521 = arith.addf %519, %520 : vector<2x32xf32>
    %522 = math.tanh %521 : vector<2x32xf32>
    %523 = arith.mulf %516, %522 : vector<2x32xf32>
    %524 = arith.index_cast %c7_i32_160 : i32 to index
    %c0_169 = arith.constant 0 : index
    %c0_170 = arith.constant 0 : index
    %525 = vector.load %arg11[%524, %c0_169, %c0_170] : memref<8x2x32xf32, #tpu.memory_space<vmem>>, vector<1x2x32xf32>
    %526 = vector.shape_cast %525 : vector<1x2x32xf32> to vector<2x32xf32>
    %527 = vector.shape_cast %507 : vector<2x32xf32> to vector<1x2x32xf32>
    tpu.vector_store %arg11[%524, %c0_169, %c0_170], %527 {strides = array<i32>} : memref<8x2x32xf32, #tpu.memory_space<vmem>>, vector<1x2x32xf32>,
    %528 = arith.index_cast %479 : i32 to index
    %c0_171 = arith.constant 0 : index
    %c0_172 = arith.constant 0 : index
    %529 = vector.load %arg12[%528, %c0_171, %c0_172] : memref<8x2x32xf32, #tpu.memory_space<vmem>>, vector<1x2x32xf32>
    %530 = vector.shape_cast %529 : vector<1x2x32xf32> to vector<2x32xf32>
    %531 = vector.shape_cast %523 : vector<2x32xf32> to vector<1x2x32xf32>
    tpu.vector_store %arg12[%528, %c0_171, %c0_172], %531 {strides = array<i32>} : memref<8x2x32xf32, #tpu.memory_space<vmem>>, vector<1x2x32xf32>,
    %c8_i32 = arith.constant 8 : i32
    %c0_173 = arith.constant 0 : index
    %c0_174 = arith.constant 0 : index
    %c0_175 = arith.constant 0 : index
    %532 = vector.load %arg9[%c0_173, %c0_174, %c0_175] : memref<4x2x32xf32, #tpu.memory_space<vmem>>, vector<1x2x32xf32>
    %533 = vector.shape_cast %532 : vector<1x2x32xf32> to vector<2x32xf32>
    %534 = vector.shape_cast %507 : vector<2x32xf32> to vector<1x2x32xf32>
    tpu.vector_store %arg9[%c0_173, %c0_174, %c0_175], %534 {strides = array<i32>} : memref<4x2x32xf32, #tpu.memory_space<vmem>>, vector<1x2x32xf32>,
    %c1_176 = arith.constant 1 : index
    %c0_177 = arith.constant 0 : index
    %c0_178 = arith.constant 0 : index
    %535 = vector.load %arg9[%c1_176, %c0_177, %c0_178] : memref<4x2x32xf32, #tpu.memory_space<vmem>>, vector<1x2x32xf32>
    %536 = vector.shape_cast %535 : vector<1x2x32xf32> to vector<2x32xf32>
    %537 = vector.shape_cast %523 : vector<2x32xf32> to vector<1x2x32xf32>
    tpu.vector_store %arg9[%c1_176, %c0_177, %c0_178], %537 {strides = array<i32>} : memref<4x2x32xf32, #tpu.memory_space<vmem>>, vector<1x2x32xf32>,
    %c0_179 = arith.constant 0 : index
    %c0_180 = arith.constant 0 : index
    %c0_181 = arith.constant 0 : index
    %538 = vector.load %arg10[%c0_179, %c0_180, %c0_181] : memref<4x2x32xf32, #tpu.memory_space<vmem>>, vector<1x2x32xf32>
    %539 = vector.shape_cast %538 : vector<1x2x32xf32> to vector<2x32xf32>
    %540 = vector.shape_cast %505 : vector<2x32xf32> to vector<1x2x32xf32>
    tpu.vector_store %arg10[%c0_179, %c0_180, %c0_181], %540 {strides = array<i32>} : memref<4x2x32xf32, #tpu.memory_space<vmem>>, vector<1x2x32xf32>,
    %c1_182 = arith.constant 1 : index
    %c0_183 = arith.constant 0 : index
    %c0_184 = arith.constant 0 : index
    %541 = vector.load %arg10[%c1_182, %c0_183, %c0_184] : memref<4x2x32xf32, #tpu.memory_space<vmem>>, vector<1x2x32xf32>
    %542 = vector.shape_cast %541 : vector<1x2x32xf32> to vector<2x32xf32>
    %543 = vector.shape_cast %521 : vector<2x32xf32> to vector<1x2x32xf32>
    tpu.vector_store %arg10[%c1_182, %c0_183, %c0_184], %543 {strides = array<i32>} : memref<4x2x32xf32, #tpu.memory_space<vmem>>, vector<1x2x32xf32>,
    %c0_185 = arith.constant 0 : index
    %c0_186 = arith.constant 0 : index
    %544 = vector.load %arg6[%c0_185, %c0_186] : memref<64x256xf32, #tpu.memory_space<vmem>>, vector<64x256xf32>
    %c0_187 = arith.constant 0 : index
    %c0_188 = arith.constant 0 : index
    %545 = vector.load %arg7[%c0_187, %c0_188] : memref<64x256xf32, #tpu.memory_space<vmem>>, vector<64x256xf32>
    %c0_189 = arith.constant 0 : index
    %c0_190 = arith.constant 0 : index
    %546 = vector.load %arg8[%c0_189, %c0_190] : memref<1x256xf32, #tpu.memory_space<vmem>>, vector<1x256xf32>
    %c0_191 = arith.constant 0 : index
    %c0_192 = arith.constant 0 : index
    %c0_193 = arith.constant 0 : index
    %547 = vector.load %arg11[%c0_191, %c0_192, %c0_193] : memref<8x2x32xf32, #tpu.memory_space<vmem>>, vector<1x2x32xf32>
    %548 = vector.shape_cast %547 : vector<1x2x32xf32> to vector<2x32xf32>
    %c0_194 = arith.constant 0 : index
    %c0_195 = arith.constant 0 : index
    %c0_196 = arith.constant 0 : index
    %549 = vector.load %arg12[%c0_194, %c0_195, %c0_196] : memref<8x2x32xf32, #tpu.memory_space<vmem>>, vector<1x2x32xf32>
    %550 = vector.shape_cast %549 : vector<1x2x32xf32> to vector<2x32xf32>
    %551 = tpu.concatenate %548, %550 in 1 : vector<2x32xf32>, vector<2x32xf32> -> vector<2x64xf32>
    %cst_197 = arith.constant dense<0.000000e+00> : vector<2x256xf32>
    %552 = tpu.matmul %551, %544, %cst_197 {dimension_numbers = #tpu.dot_dimension_numbers<[1], [0], [0], [1], [0, 0, 1, 1], [], []>} : vector<2x64xf32>, vector<64x256xf32>, vector<2x256xf32> -> vector<2x256xf32>
    %553 = vector.broadcast %546 : vector<1x256xf32> to vector<2x256xf32>
    %554 = arith.addf %552, %553 : vector<2x256xf32>
    %c0_198 = arith.constant 0 : index
    %c0_199 = arith.constant 0 : index
    %c0_200 = arith.constant 0 : index
    %555 = vector.load %arg13[%c0_198, %c0_199, %c0_200] : memref<8x2x256xf32, #tpu.memory_space<vmem>>, vector<1x2x256xf32>
    %556 = vector.shape_cast %555 : vector<1x2x256xf32> to vector<2x256xf32>
    %557 = vector.shape_cast %554 : vector<2x256xf32> to vector<1x2x256xf32>
    tpu.vector_store %arg13[%c0_198, %c0_199, %c0_200], %557 {strides = array<i32>} : memref<8x2x256xf32, #tpu.memory_space<vmem>>, vector<1x2x256xf32>,
    %c1_201 = arith.constant 1 : index
    %c0_202 = arith.constant 0 : index
    %c0_203 = arith.constant 0 : index
    %558 = vector.load %arg11[%c1_201, %c0_202, %c0_203] : memref<8x2x32xf32, #tpu.memory_space<vmem>>, vector<1x2x32xf32>
    %559 = vector.shape_cast %558 : vector<1x2x32xf32> to vector<2x32xf32>
    %c1_204 = arith.constant 1 : index
    %c0_205 = arith.constant 0 : index
    %c0_206 = arith.constant 0 : index
    %560 = vector.load %arg12[%c1_204, %c0_205, %c0_206] : memref<8x2x32xf32, #tpu.memory_space<vmem>>, vector<1x2x32xf32>
    %561 = vector.shape_cast %560 : vector<1x2x32xf32> to vector<2x32xf32>
    %562 = tpu.concatenate %559, %561 in 1 : vector<2x32xf32>, vector<2x32xf32> -> vector<2x64xf32>
    %cst_207 = arith.constant dense<0.000000e+00> : vector<2x256xf32>
    %563 = tpu.matmul %562, %544, %cst_207 {dimension_numbers = #tpu.dot_dimension_numbers<[1], [0], [0], [1], [0, 0, 1, 1], [], []>} : vector<2x64xf32>, vector<64x256xf32>, vector<2x256xf32> -> vector<2x256xf32>
    %564 = vector.broadcast %546 : vector<1x256xf32> to vector<2x256xf32>
    %565 = arith.addf %563, %564 : vector<2x256xf32>
    %c1_208 = arith.constant 1 : index
    %c0_209 = arith.constant 0 : index
    %c0_210 = arith.constant 0 : index
    %566 = vector.load %arg13[%c1_208, %c0_209, %c0_210] : memref<8x2x256xf32, #tpu.memory_space<vmem>>, vector<1x2x256xf32>
    %567 = vector.shape_cast %566 : vector<1x2x256xf32> to vector<2x256xf32>
    %568 = vector.shape_cast %565 : vector<2x256xf32> to vector<1x2x256xf32>
    tpu.vector_store %arg13[%c1_208, %c0_209, %c0_210], %568 {strides = array<i32>} : memref<8x2x256xf32, #tpu.memory_space<vmem>>, vector<1x2x256xf32>,
    %c2_211 = arith.constant 2 : index
    %c0_212 = arith.constant 0 : index
    %c0_213 = arith.constant 0 : index
    %569 = vector.load %arg11[%c2_211, %c0_212, %c0_213] : memref<8x2x32xf32, #tpu.memory_space<vmem>>, vector<1x2x32xf32>
    %570 = vector.shape_cast %569 : vector<1x2x32xf32> to vector<2x32xf32>
    %c2_214 = arith.constant 2 : index
    %c0_215 = arith.constant 0 : index
    %c0_216 = arith.constant 0 : index
    %571 = vector.load %arg12[%c2_214, %c0_215, %c0_216] : memref<8x2x32xf32, #tpu.memory_space<vmem>>, vector<1x2x32xf32>
    %572 = vector.shape_cast %571 : vector<1x2x32xf32> to vector<2x32xf32>
    %573 = tpu.concatenate %570, %572 in 1 : vector<2x32xf32>, vector<2x32xf32> -> vector<2x64xf32>
    %cst_217 = arith.constant dense<0.000000e+00> : vector<2x256xf32>
    %574 = tpu.matmul %573, %544, %cst_217 {dimension_numbers = #tpu.dot_dimension_numbers<[1], [0], [0], [1], [0, 0, 1, 1], [], []>} : vector<2x64xf32>, vector<64x256xf32>, vector<2x256xf32> -> vector<2x256xf32>
    %575 = vector.broadcast %546 : vector<1x256xf32> to vector<2x256xf32>
    %576 = arith.addf %574, %575 : vector<2x256xf32>
    %c2_218 = arith.constant 2 : index
    %c0_219 = arith.constant 0 : index
    %c0_220 = arith.constant 0 : index
    %577 = vector.load %arg13[%c2_218, %c0_219, %c0_220] : memref<8x2x256xf32, #tpu.memory_space<vmem>>, vector<1x2x256xf32>
    %578 = vector.shape_cast %577 : vector<1x2x256xf32> to vector<2x256xf32>
    %579 = vector.shape_cast %576 : vector<2x256xf32> to vector<1x2x256xf32>
    tpu.vector_store %arg13[%c2_218, %c0_219, %c0_220], %579 {strides = array<i32>} : memref<8x2x256xf32, #tpu.memory_space<vmem>>, vector<1x2x256xf32>,
    %c3_221 = arith.constant 3 : index
    %c0_222 = arith.constant 0 : index
    %c0_223 = arith.constant 0 : index
    %580 = vector.load %arg11[%c3_221, %c0_222, %c0_223] : memref<8x2x32xf32, #tpu.memory_space<vmem>>, vector<1x2x32xf32>
    %581 = vector.shape_cast %580 : vector<1x2x32xf32> to vector<2x32xf32>
    %c3_224 = arith.constant 3 : index
    %c0_225 = arith.constant 0 : index
    %c0_226 = arith.constant 0 : index
    %582 = vector.load %arg12[%c3_224, %c0_225, %c0_226] : memref<8x2x32xf32, #tpu.memory_space<vmem>>, vector<1x2x32xf32>
    %583 = vector.shape_cast %582 : vector<1x2x32xf32> to vector<2x32xf32>
    %584 = tpu.concatenate %581, %583 in 1 : vector<2x32xf32>, vector<2x32xf32> -> vector<2x64xf32>
    %cst_227 = arith.constant dense<0.000000e+00> : vector<2x256xf32>
    %585 = tpu.matmul %584, %544, %cst_227 {dimension_numbers = #tpu.dot_dimension_numbers<[1], [0], [0], [1], [0, 0, 1, 1], [], []>} : vector<2x64xf32>, vector<64x256xf32>, vector<2x256xf32> -> vector<2x256xf32>
    %586 = vector.broadcast %546 : vector<1x256xf32> to vector<2x256xf32>
    %587 = arith.addf %585, %586 : vector<2x256xf32>
    %c3_228 = arith.constant 3 : index
    %c0_229 = arith.constant 0 : index
    %c0_230 = arith.constant 0 : index
    %588 = vector.load %arg13[%c3_228, %c0_229, %c0_230] : memref<8x2x256xf32, #tpu.memory_space<vmem>>, vector<1x2x256xf32>
    %589 = vector.shape_cast %588 : vector<1x2x256xf32> to vector<2x256xf32>
    %590 = vector.shape_cast %587 : vector<2x256xf32> to vector<1x2x256xf32>
    tpu.vector_store %arg13[%c3_228, %c0_229, %c0_230], %590 {strides = array<i32>} : memref<8x2x256xf32, #tpu.memory_space<vmem>>, vector<1x2x256xf32>,
    %c4_231 = arith.constant 4 : index
    %c0_232 = arith.constant 0 : index
    %c0_233 = arith.constant 0 : index
    %591 = vector.load %arg11[%c4_231, %c0_232, %c0_233] : memref<8x2x32xf32, #tpu.memory_space<vmem>>, vector<1x2x32xf32>
    %592 = vector.shape_cast %591 : vector<1x2x32xf32> to vector<2x32xf32>
    %c4_234 = arith.constant 4 : index
    %c0_235 = arith.constant 0 : index
    %c0_236 = arith.constant 0 : index
    %593 = vector.load %arg12[%c4_234, %c0_235, %c0_236] : memref<8x2x32xf32, #tpu.memory_space<vmem>>, vector<1x2x32xf32>
    %594 = vector.shape_cast %593 : vector<1x2x32xf32> to vector<2x32xf32>
    %595 = tpu.concatenate %592, %594 in 1 : vector<2x32xf32>, vector<2x32xf32> -> vector<2x64xf32>
    %cst_237 = arith.constant dense<0.000000e+00> : vector<2x256xf32>
    %596 = tpu.matmul %595, %544, %cst_237 {dimension_numbers = #tpu.dot_dimension_numbers<[1], [0], [0], [1], [0, 0, 1, 1], [], []>} : vector<2x64xf32>, vector<64x256xf32>, vector<2x256xf32> -> vector<2x256xf32>
    %597 = vector.broadcast %546 : vector<1x256xf32> to vector<2x256xf32>
    %598 = arith.addf %596, %597 : vector<2x256xf32>
    %c4_238 = arith.constant 4 : index
    %c0_239 = arith.constant 0 : index
    %c0_240 = arith.constant 0 : index
    %599 = vector.load %arg13[%c4_238, %c0_239, %c0_240] : memref<8x2x256xf32, #tpu.memory_space<vmem>>, vector<1x2x256xf32>
    %600 = vector.shape_cast %599 : vector<1x2x256xf32> to vector<2x256xf32>
    %601 = vector.shape_cast %598 : vector<2x256xf32> to vector<1x2x256xf32>
    tpu.vector_store %arg13[%c4_238, %c0_239, %c0_240], %601 {strides = array<i32>} : memref<8x2x256xf32, #tpu.memory_space<vmem>>, vector<1x2x256xf32>,
    %c5_241 = arith.constant 5 : index
    %c0_242 = arith.constant 0 : index
    %c0_243 = arith.constant 0 : index
    %602 = vector.load %arg11[%c5_241, %c0_242, %c0_243] : memref<8x2x32xf32, #tpu.memory_space<vmem>>, vector<1x2x32xf32>
    %603 = vector.shape_cast %602 : vector<1x2x32xf32> to vector<2x32xf32>
    %c5_244 = arith.constant 5 : index
    %c0_245 = arith.constant 0 : index
    %c0_246 = arith.constant 0 : index
    %604 = vector.load %arg12[%c5_244, %c0_245, %c0_246] : memref<8x2x32xf32, #tpu.memory_space<vmem>>, vector<1x2x32xf32>
    %605 = vector.shape_cast %604 : vector<1x2x32xf32> to vector<2x32xf32>
    %606 = tpu.concatenate %603, %605 in 1 : vector<2x32xf32>, vector<2x32xf32> -> vector<2x64xf32>
    %cst_247 = arith.constant dense<0.000000e+00> : vector<2x256xf32>
    %607 = tpu.matmul %606, %544, %cst_247 {dimension_numbers = #tpu.dot_dimension_numbers<[1], [0], [0], [1], [0, 0, 1, 1], [], []>} : vector<2x64xf32>, vector<64x256xf32>, vector<2x256xf32> -> vector<2x256xf32>
    %608 = vector.broadcast %546 : vector<1x256xf32> to vector<2x256xf32>
    %609 = arith.addf %607, %608 : vector<2x256xf32>
    %c5_248 = arith.constant 5 : index
    %c0_249 = arith.constant 0 : index
    %c0_250 = arith.constant 0 : index
    %610 = vector.load %arg13[%c5_248, %c0_249, %c0_250] : memref<8x2x256xf32, #tpu.memory_space<vmem>>, vector<1x2x256xf32>
    %611 = vector.shape_cast %610 : vector<1x2x256xf32> to vector<2x256xf32>
    %612 = vector.shape_cast %609 : vector<2x256xf32> to vector<1x2x256xf32>
    tpu.vector_store %arg13[%c5_248, %c0_249, %c0_250], %612 {strides = array<i32>} : memref<8x2x256xf32, #tpu.memory_space<vmem>>, vector<1x2x256xf32>,
    %c6_251 = arith.constant 6 : index
    %c0_252 = arith.constant 0 : index
    %c0_253 = arith.constant 0 : index
    %613 = vector.load %arg11[%c6_251, %c0_252, %c0_253] : memref<8x2x32xf32, #tpu.memory_space<vmem>>, vector<1x2x32xf32>
    %614 = vector.shape_cast %613 : vector<1x2x32xf32> to vector<2x32xf32>
    %c6_254 = arith.constant 6 : index
    %c0_255 = arith.constant 0 : index
    %c0_256 = arith.constant 0 : index
    %615 = vector.load %arg12[%c6_254, %c0_255, %c0_256] : memref<8x2x32xf32, #tpu.memory_space<vmem>>, vector<1x2x32xf32>
    %616 = vector.shape_cast %615 : vector<1x2x32xf32> to vector<2x32xf32>
    %617 = tpu.concatenate %614, %616 in 1 : vector<2x32xf32>, vector<2x32xf32> -> vector<2x64xf32>
    %cst_257 = arith.constant dense<0.000000e+00> : vector<2x256xf32>
    %618 = tpu.matmul %617, %544, %cst_257 {dimension_numbers = #tpu.dot_dimension_numbers<[1], [0], [0], [1], [0, 0, 1, 1], [], []>} : vector<2x64xf32>, vector<64x256xf32>, vector<2x256xf32> -> vector<2x256xf32>
    %619 = vector.broadcast %546 : vector<1x256xf32> to vector<2x256xf32>
    %620 = arith.addf %618, %619 : vector<2x256xf32>
    %c6_258 = arith.constant 6 : index
    %c0_259 = arith.constant 0 : index
    %c0_260 = arith.constant 0 : index
    %621 = vector.load %arg13[%c6_258, %c0_259, %c0_260] : memref<8x2x256xf32, #tpu.memory_space<vmem>>, vector<1x2x256xf32>
    %622 = vector.shape_cast %621 : vector<1x2x256xf32> to vector<2x256xf32>
    %623 = vector.shape_cast %620 : vector<2x256xf32> to vector<1x2x256xf32>
    tpu.vector_store %arg13[%c6_258, %c0_259, %c0_260], %623 {strides = array<i32>} : memref<8x2x256xf32, #tpu.memory_space<vmem>>, vector<1x2x256xf32>,
    %c7_261 = arith.constant 7 : index
    %c0_262 = arith.constant 0 : index
    %c0_263 = arith.constant 0 : index
    %624 = vector.load %arg11[%c7_261, %c0_262, %c0_263] : memref<8x2x32xf32, #tpu.memory_space<vmem>>, vector<1x2x32xf32>
    %625 = vector.shape_cast %624 : vector<1x2x32xf32> to vector<2x32xf32>
    %c7_264 = arith.constant 7 : index
    %c0_265 = arith.constant 0 : index
    %c0_266 = arith.constant 0 : index
    %626 = vector.load %arg12[%c7_264, %c0_265, %c0_266] : memref<8x2x32xf32, #tpu.memory_space<vmem>>, vector<1x2x32xf32>
    %627 = vector.shape_cast %626 : vector<1x2x32xf32> to vector<2x32xf32>
    %628 = tpu.concatenate %625, %627 in 1 : vector<2x32xf32>, vector<2x32xf32> -> vector<2x64xf32>
    %cst_267 = arith.constant dense<0.000000e+00> : vector<2x256xf32>
    %629 = tpu.matmul %628, %544, %cst_267 {dimension_numbers = #tpu.dot_dimension_numbers<[1], [0], [0], [1], [0, 0, 1, 1], [], []>} : vector<2x64xf32>, vector<64x256xf32>, vector<2x256xf32> -> vector<2x256xf32>
    %630 = vector.broadcast %546 : vector<1x256xf32> to vector<2x256xf32>
    %631 = arith.addf %629, %630 : vector<2x256xf32>
    %c7_268 = arith.constant 7 : index
    %c0_269 = arith.constant 0 : index
    %c0_270 = arith.constant 0 : index
    %632 = vector.load %arg13[%c7_268, %c0_269, %c0_270] : memref<8x2x256xf32, #tpu.memory_space<vmem>>, vector<1x2x256xf32>
    %633 = vector.shape_cast %632 : vector<1x2x256xf32> to vector<2x256xf32>
    %634 = vector.shape_cast %631 : vector<2x256xf32> to vector<1x2x256xf32>
    tpu.vector_store %arg13[%c7_268, %c0_269, %c0_270], %634 {strides = array<i32>} : memref<8x2x256xf32, #tpu.memory_space<vmem>>, vector<1x2x256xf32>,
    %cst_271 = arith.constant 0.000000e+00 : f32
    %635 = vector.broadcast %cst_271 : f32 to vector<2x32xf32>
    %c0_i32_272 = arith.constant 0 : i32
    %c7_i32_273 = arith.constant 7 : i32
    %636 = arith.subi %c7_i32_273, %c0_i32_272 : i32
    %637 = tpu.concatenate %635, %635 in 1 : vector<2x32xf32>, vector<2x32xf32> -> vector<2x64xf32>
    %cst_274 = arith.constant dense<0.000000e+00> : vector<2x256xf32>
    %638 = tpu.matmul %637, %545, %cst_274 {dimension_numbers = #tpu.dot_dimension_numbers<[1], [0], [0], [1], [0, 0, 1, 1], [], []>} : vector<2x64xf32>, vector<64x256xf32>, vector<2x256xf32> -> vector<2x256xf32>
    %639 = arith.index_cast %c0_i32_272 : i32 to index
    %c0_275 = arith.constant 0 : index
    %c0_276 = arith.constant 0 : index
    %640 = vector.load %arg13[%639, %c0_275, %c0_276] : memref<8x2x256xf32, #tpu.memory_space<vmem>>, vector<1x2x128xf32>
    %641 = vector.shape_cast %640 : vector<1x2x128xf32> to vector<2x128xf32>
    %642 = vector.extract_strided_slice %638 {offsets = [0, 0], sizes = [2, 128], strides = [1, 1]} : vector<2x256xf32> to vector<2x128xf32>
    %643 = arith.addf %641, %642 : vector<2x128xf32>
    %644 = arith.index_cast %636 : i32 to index
    %c0_277 = arith.constant 0 : index
    %c128_278 = arith.constant 128 : index
    %645 = vector.load %arg13[%644, %c0_277, %c128_278] : memref<8x2x256xf32, #tpu.memory_space<vmem>>, vector<1x2x128xf32>
    %646 = vector.shape_cast %645 : vector<1x2x128xf32> to vector<2x128xf32>
    %647 = vector.extract_strided_slice %638 {offsets = [0, 128], sizes = [2, 128], strides = [1, 1]} : vector<2x256xf32> to vector<2x128xf32>
    %648 = arith.addf %646, %647 : vector<2x128xf32>
    %649 = vector.extract_strided_slice %643 {offsets = [0, 0], sizes = [2, 96], strides = [1, 1]} : vector<2x128xf32> to vector<2x96xf32>
    %650 = arith.negf %649 : vector<2x96xf32>
    %651 = math.exp %650 : vector<2x96xf32>
    %cst_279 = arith.constant 1.000000e+00 : f32
    %652 = vector.broadcast %cst_279 : f32 to vector<2x96xf32>
    %653 = arith.addf %652, %651 : vector<2x96xf32>
    %654 = arith.divf %652, %653 : vector<2x96xf32>
    %655 = vector.extract_strided_slice %654 {offsets = [0, 0], sizes = [2, 32], strides = [1, 1]} : vector<2x96xf32> to vector<2x32xf32>
    %656 = vector.extract_strided_slice %654 {offsets = [0, 32], sizes = [2, 32], strides = [1, 1]} : vector<2x96xf32> to vector<2x32xf32>
    %657 = vector.extract_strided_slice %654 {offsets = [0, 64], sizes = [2, 32], strides = [1, 1]} : vector<2x96xf32> to vector<2x32xf32>
    %658 = vector.extract_strided_slice %643 {offsets = [0, 96], sizes = [2, 32], strides = [1, 1]} : vector<2x128xf32> to vector<2x32xf32>
    %659 = math.tanh %658 : vector<2x32xf32>
    %660 = arith.mulf %656, %635 : vector<2x32xf32>
    %661 = arith.mulf %655, %659 : vector<2x32xf32>
    %662 = arith.addf %660, %661 : vector<2x32xf32>
    %663 = math.tanh %662 : vector<2x32xf32>
    %664 = arith.mulf %657, %663 : vector<2x32xf32>
    %665 = vector.extract_strided_slice %648 {offsets = [0, 0], sizes = [2, 96], strides = [1, 1]} : vector<2x128xf32> to vector<2x96xf32>
    %666 = arith.negf %665 : vector<2x96xf32>
    %667 = math.exp %666 : vector<2x96xf32>
    %cst_280 = arith.constant 1.000000e+00 : f32
    %668 = vector.broadcast %cst_280 : f32 to vector<2x96xf32>
    %669 = arith.addf %668, %667 : vector<2x96xf32>
    %670 = arith.divf %668, %669 : vector<2x96xf32>
    %671 = vector.extract_strided_slice %670 {offsets = [0, 0], sizes = [2, 32], strides = [1, 1]} : vector<2x96xf32> to vector<2x32xf32>
    %672 = vector.extract_strided_slice %670 {offsets = [0, 32], sizes = [2, 32], strides = [1, 1]} : vector<2x96xf32> to vector<2x32xf32>
    %673 = vector.extract_strided_slice %670 {offsets = [0, 64], sizes = [2, 32], strides = [1, 1]} : vector<2x96xf32> to vector<2x32xf32>
    %674 = vector.extract_strided_slice %648 {offsets = [0, 96], sizes = [2, 32], strides = [1, 1]} : vector<2x128xf32> to vector<2x32xf32>
    %675 = math.tanh %674 : vector<2x32xf32>
    %676 = arith.mulf %672, %635 : vector<2x32xf32>
    %677 = arith.mulf %671, %675 : vector<2x32xf32>
    %678 = arith.addf %676, %677 : vector<2x32xf32>
    %679 = math.tanh %678 : vector<2x32xf32>
    %680 = arith.mulf %673, %679 : vector<2x32xf32>
    %c1_i32_281 = arith.constant 1 : i32
    %c7_i32_282 = arith.constant 7 : i32
    %681 = arith.subi %c7_i32_282, %c1_i32_281 : i32
    %682 = tpu.concatenate %664, %680 in 1 : vector<2x32xf32>, vector<2x32xf32> -> vector<2x64xf32>
    %cst_283 = arith.constant dense<0.000000e+00> : vector<2x256xf32>
    %683 = tpu.matmul %682, %545, %cst_283 {dimension_numbers = #tpu.dot_dimension_numbers<[1], [0], [0], [1], [0, 0, 1, 1], [], []>} : vector<2x64xf32>, vector<64x256xf32>, vector<2x256xf32> -> vector<2x256xf32>
    %684 = arith.index_cast %c1_i32_281 : i32 to index
    %c0_284 = arith.constant 0 : index
    %c0_285 = arith.constant 0 : index
    %685 = vector.load %arg13[%684, %c0_284, %c0_285] : memref<8x2x256xf32, #tpu.memory_space<vmem>>, vector<1x2x128xf32>
    %686 = vector.shape_cast %685 : vector<1x2x128xf32> to vector<2x128xf32>
    %687 = vector.extract_strided_slice %683 {offsets = [0, 0], sizes = [2, 128], strides = [1, 1]} : vector<2x256xf32> to vector<2x128xf32>
    %688 = arith.addf %686, %687 : vector<2x128xf32>
    %689 = arith.index_cast %681 : i32 to index
    %c0_286 = arith.constant 0 : index
    %c128_287 = arith.constant 128 : index
    %690 = vector.load %arg13[%689, %c0_286, %c128_287] : memref<8x2x256xf32, #tpu.memory_space<vmem>>, vector<1x2x128xf32>
    %691 = vector.shape_cast %690 : vector<1x2x128xf32> to vector<2x128xf32>
    %692 = vector.extract_strided_slice %683 {offsets = [0, 128], sizes = [2, 128], strides = [1, 1]} : vector<2x256xf32> to vector<2x128xf32>
    %693 = arith.addf %691, %692 : vector<2x128xf32>
    %694 = vector.extract_strided_slice %688 {offsets = [0, 0], sizes = [2, 96], strides = [1, 1]} : vector<2x128xf32> to vector<2x96xf32>
    %695 = arith.negf %694 : vector<2x96xf32>
    %696 = math.exp %695 : vector<2x96xf32>
    %cst_288 = arith.constant 1.000000e+00 : f32
    %697 = vector.broadcast %cst_288 : f32 to vector<2x96xf32>
    %698 = arith.addf %697, %696 : vector<2x96xf32>
    %699 = arith.divf %697, %698 : vector<2x96xf32>
    %700 = vector.extract_strided_slice %699 {offsets = [0, 0], sizes = [2, 32], strides = [1, 1]} : vector<2x96xf32> to vector<2x32xf32>
    %701 = vector.extract_strided_slice %699 {offsets = [0, 32], sizes = [2, 32], strides = [1, 1]} : vector<2x96xf32> to vector<2x32xf32>
    %702 = vector.extract_strided_slice %699 {offsets = [0, 64], sizes = [2, 32], strides = [1, 1]} : vector<2x96xf32> to vector<2x32xf32>
    %703 = vector.extract_strided_slice %688 {offsets = [0, 96], sizes = [2, 32], strides = [1, 1]} : vector<2x128xf32> to vector<2x32xf32>
    %704 = math.tanh %703 : vector<2x32xf32>
    %705 = arith.mulf %701, %662 : vector<2x32xf32>
    %706 = arith.mulf %700, %704 : vector<2x32xf32>
    %707 = arith.addf %705, %706 : vector<2x32xf32>
    %708 = math.tanh %707 : vector<2x32xf32>
    %709 = arith.mulf %702, %708 : vector<2x32xf32>
    %710 = vector.extract_strided_slice %693 {offsets = [0, 0], sizes = [2, 96], strides = [1, 1]} : vector<2x128xf32> to vector<2x96xf32>
    %711 = arith.negf %710 : vector<2x96xf32>
    %712 = math.exp %711 : vector<2x96xf32>
    %cst_289 = arith.constant 1.000000e+00 : f32
    %713 = vector.broadcast %cst_289 : f32 to vector<2x96xf32>
    %714 = arith.addf %713, %712 : vector<2x96xf32>
    %715 = arith.divf %713, %714 : vector<2x96xf32>
    %716 = vector.extract_strided_slice %715 {offsets = [0, 0], sizes = [2, 32], strides = [1, 1]} : vector<2x96xf32> to vector<2x32xf32>
    %717 = vector.extract_strided_slice %715 {offsets = [0, 32], sizes = [2, 32], strides = [1, 1]} : vector<2x96xf32> to vector<2x32xf32>
    %718 = vector.extract_strided_slice %715 {offsets = [0, 64], sizes = [2, 32], strides = [1, 1]} : vector<2x96xf32> to vector<2x32xf32>
    %719 = vector.extract_strided_slice %693 {offsets = [0, 96], sizes = [2, 32], strides = [1, 1]} : vector<2x128xf32> to vector<2x32xf32>
    %720 = math.tanh %719 : vector<2x32xf32>
    %721 = arith.mulf %717, %678 : vector<2x32xf32>
    %722 = arith.mulf %716, %720 : vector<2x32xf32>
    %723 = arith.addf %721, %722 : vector<2x32xf32>
    %724 = math.tanh %723 : vector<2x32xf32>
    %725 = arith.mulf %718, %724 : vector<2x32xf32>
    %c2_i32_290 = arith.constant 2 : i32
    %c7_i32_291 = arith.constant 7 : i32
    %726 = arith.subi %c7_i32_291, %c2_i32_290 : i32
    %727 = tpu.concatenate %709, %725 in 1 : vector<2x32xf32>, vector<2x32xf32> -> vector<2x64xf32>
    %cst_292 = arith.constant dense<0.000000e+00> : vector<2x256xf32>
    %728 = tpu.matmul %727, %545, %cst_292 {dimension_numbers = #tpu.dot_dimension_numbers<[1], [0], [0], [1], [0, 0, 1, 1], [], []>} : vector<2x64xf32>, vector<64x256xf32>, vector<2x256xf32> -> vector<2x256xf32>
    %729 = arith.index_cast %c2_i32_290 : i32 to index
    %c0_293 = arith.constant 0 : index
    %c0_294 = arith.constant 0 : index
    %730 = vector.load %arg13[%729, %c0_293, %c0_294] : memref<8x2x256xf32, #tpu.memory_space<vmem>>, vector<1x2x128xf32>
    %731 = vector.shape_cast %730 : vector<1x2x128xf32> to vector<2x128xf32>
    %732 = vector.extract_strided_slice %728 {offsets = [0, 0], sizes = [2, 128], strides = [1, 1]} : vector<2x256xf32> to vector<2x128xf32>
    %733 = arith.addf %731, %732 : vector<2x128xf32>
    %734 = arith.index_cast %726 : i32 to index
    %c0_295 = arith.constant 0 : index
    %c128_296 = arith.constant 128 : index
    %735 = vector.load %arg13[%734, %c0_295, %c128_296] : memref<8x2x256xf32, #tpu.memory_space<vmem>>, vector<1x2x128xf32>
    %736 = vector.shape_cast %735 : vector<1x2x128xf32> to vector<2x128xf32>
    %737 = vector.extract_strided_slice %728 {offsets = [0, 128], sizes = [2, 128], strides = [1, 1]} : vector<2x256xf32> to vector<2x128xf32>
    %738 = arith.addf %736, %737 : vector<2x128xf32>
    %739 = vector.extract_strided_slice %733 {offsets = [0, 0], sizes = [2, 96], strides = [1, 1]} : vector<2x128xf32> to vector<2x96xf32>
    %740 = arith.negf %739 : vector<2x96xf32>
    %741 = math.exp %740 : vector<2x96xf32>
    %cst_297 = arith.constant 1.000000e+00 : f32
    %742 = vector.broadcast %cst_297 : f32 to vector<2x96xf32>
    %743 = arith.addf %742, %741 : vector<2x96xf32>
    %744 = arith.divf %742, %743 : vector<2x96xf32>
    %745 = vector.extract_strided_slice %744 {offsets = [0, 0], sizes = [2, 32], strides = [1, 1]} : vector<2x96xf32> to vector<2x32xf32>
    %746 = vector.extract_strided_slice %744 {offsets = [0, 32], sizes = [2, 32], strides = [1, 1]} : vector<2x96xf32> to vector<2x32xf32>
    %747 = vector.extract_strided_slice %744 {offsets = [0, 64], sizes = [2, 32], strides = [1, 1]} : vector<2x96xf32> to vector<2x32xf32>
    %748 = vector.extract_strided_slice %733 {offsets = [0, 96], sizes = [2, 32], strides = [1, 1]} : vector<2x128xf32> to vector<2x32xf32>
    %749 = math.tanh %748 : vector<2x32xf32>
    %750 = arith.mulf %746, %707 : vector<2x32xf32>
    %751 = arith.mulf %745, %749 : vector<2x32xf32>
    %752 = arith.addf %750, %751 : vector<2x32xf32>
    %753 = math.tanh %752 : vector<2x32xf32>
    %754 = arith.mulf %747, %753 : vector<2x32xf32>
    %755 = vector.extract_strided_slice %738 {offsets = [0, 0], sizes = [2, 96], strides = [1, 1]} : vector<2x128xf32> to vector<2x96xf32>
    %756 = arith.negf %755 : vector<2x96xf32>
    %757 = math.exp %756 : vector<2x96xf32>
    %cst_298 = arith.constant 1.000000e+00 : f32
    %758 = vector.broadcast %cst_298 : f32 to vector<2x96xf32>
    %759 = arith.addf %758, %757 : vector<2x96xf32>
    %760 = arith.divf %758, %759 : vector<2x96xf32>
    %761 = vector.extract_strided_slice %760 {offsets = [0, 0], sizes = [2, 32], strides = [1, 1]} : vector<2x96xf32> to vector<2x32xf32>
    %762 = vector.extract_strided_slice %760 {offsets = [0, 32], sizes = [2, 32], strides = [1, 1]} : vector<2x96xf32> to vector<2x32xf32>
    %763 = vector.extract_strided_slice %760 {offsets = [0, 64], sizes = [2, 32], strides = [1, 1]} : vector<2x96xf32> to vector<2x32xf32>
    %764 = vector.extract_strided_slice %738 {offsets = [0, 96], sizes = [2, 32], strides = [1, 1]} : vector<2x128xf32> to vector<2x32xf32>
    %765 = math.tanh %764 : vector<2x32xf32>
    %766 = arith.mulf %762, %723 : vector<2x32xf32>
    %767 = arith.mulf %761, %765 : vector<2x32xf32>
    %768 = arith.addf %766, %767 : vector<2x32xf32>
    %769 = math.tanh %768 : vector<2x32xf32>
    %770 = arith.mulf %763, %769 : vector<2x32xf32>
    %c3_i32_299 = arith.constant 3 : i32
    %c7_i32_300 = arith.constant 7 : i32
    %771 = arith.subi %c7_i32_300, %c3_i32_299 : i32
    %772 = tpu.concatenate %754, %770 in 1 : vector<2x32xf32>, vector<2x32xf32> -> vector<2x64xf32>
    %cst_301 = arith.constant dense<0.000000e+00> : vector<2x256xf32>
    %773 = tpu.matmul %772, %545, %cst_301 {dimension_numbers = #tpu.dot_dimension_numbers<[1], [0], [0], [1], [0, 0, 1, 1], [], []>} : vector<2x64xf32>, vector<64x256xf32>, vector<2x256xf32> -> vector<2x256xf32>
    %774 = arith.index_cast %c3_i32_299 : i32 to index
    %c0_302 = arith.constant 0 : index
    %c0_303 = arith.constant 0 : index
    %775 = vector.load %arg13[%774, %c0_302, %c0_303] : memref<8x2x256xf32, #tpu.memory_space<vmem>>, vector<1x2x128xf32>
    %776 = vector.shape_cast %775 : vector<1x2x128xf32> to vector<2x128xf32>
    %777 = vector.extract_strided_slice %773 {offsets = [0, 0], sizes = [2, 128], strides = [1, 1]} : vector<2x256xf32> to vector<2x128xf32>
    %778 = arith.addf %776, %777 : vector<2x128xf32>
    %779 = arith.index_cast %771 : i32 to index
    %c0_304 = arith.constant 0 : index
    %c128_305 = arith.constant 128 : index
    %780 = vector.load %arg13[%779, %c0_304, %c128_305] : memref<8x2x256xf32, #tpu.memory_space<vmem>>, vector<1x2x128xf32>
    %781 = vector.shape_cast %780 : vector<1x2x128xf32> to vector<2x128xf32>
    %782 = vector.extract_strided_slice %773 {offsets = [0, 128], sizes = [2, 128], strides = [1, 1]} : vector<2x256xf32> to vector<2x128xf32>
    %783 = arith.addf %781, %782 : vector<2x128xf32>
    %784 = vector.extract_strided_slice %778 {offsets = [0, 0], sizes = [2, 96], strides = [1, 1]} : vector<2x128xf32> to vector<2x96xf32>
    %785 = arith.negf %784 : vector<2x96xf32>
    %786 = math.exp %785 : vector<2x96xf32>
    %cst_306 = arith.constant 1.000000e+00 : f32
    %787 = vector.broadcast %cst_306 : f32 to vector<2x96xf32>
    %788 = arith.addf %787, %786 : vector<2x96xf32>
    %789 = arith.divf %787, %788 : vector<2x96xf32>
    %790 = vector.extract_strided_slice %789 {offsets = [0, 0], sizes = [2, 32], strides = [1, 1]} : vector<2x96xf32> to vector<2x32xf32>
    %791 = vector.extract_strided_slice %789 {offsets = [0, 32], sizes = [2, 32], strides = [1, 1]} : vector<2x96xf32> to vector<2x32xf32>
    %792 = vector.extract_strided_slice %789 {offsets = [0, 64], sizes = [2, 32], strides = [1, 1]} : vector<2x96xf32> to vector<2x32xf32>
    %793 = vector.extract_strided_slice %778 {offsets = [0, 96], sizes = [2, 32], strides = [1, 1]} : vector<2x128xf32> to vector<2x32xf32>
    %794 = math.tanh %793 : vector<2x32xf32>
    %795 = arith.mulf %791, %752 : vector<2x32xf32>
    %796 = arith.mulf %790, %794 : vector<2x32xf32>
    %797 = arith.addf %795, %796 : vector<2x32xf32>
    %798 = math.tanh %797 : vector<2x32xf32>
    %799 = arith.mulf %792, %798 : vector<2x32xf32>
    %800 = vector.extract_strided_slice %783 {offsets = [0, 0], sizes = [2, 96], strides = [1, 1]} : vector<2x128xf32> to vector<2x96xf32>
    %801 = arith.negf %800 : vector<2x96xf32>
    %802 = math.exp %801 : vector<2x96xf32>
    %cst_307 = arith.constant 1.000000e+00 : f32
    %803 = vector.broadcast %cst_307 : f32 to vector<2x96xf32>
    %804 = arith.addf %803, %802 : vector<2x96xf32>
    %805 = arith.divf %803, %804 : vector<2x96xf32>
    %806 = vector.extract_strided_slice %805 {offsets = [0, 0], sizes = [2, 32], strides = [1, 1]} : vector<2x96xf32> to vector<2x32xf32>
    %807 = vector.extract_strided_slice %805 {offsets = [0, 32], sizes = [2, 32], strides = [1, 1]} : vector<2x96xf32> to vector<2x32xf32>
    %808 = vector.extract_strided_slice %805 {offsets = [0, 64], sizes = [2, 32], strides = [1, 1]} : vector<2x96xf32> to vector<2x32xf32>
    %809 = vector.extract_strided_slice %783 {offsets = [0, 96], sizes = [2, 32], strides = [1, 1]} : vector<2x128xf32> to vector<2x32xf32>
    %810 = math.tanh %809 : vector<2x32xf32>
    %811 = arith.mulf %807, %768 : vector<2x32xf32>
    %812 = arith.mulf %806, %810 : vector<2x32xf32>
    %813 = arith.addf %811, %812 : vector<2x32xf32>
    %814 = math.tanh %813 : vector<2x32xf32>
    %815 = arith.mulf %808, %814 : vector<2x32xf32>
    %c4_i32_308 = arith.constant 4 : i32
    %c7_i32_309 = arith.constant 7 : i32
    %816 = arith.subi %c7_i32_309, %c4_i32_308 : i32
    %817 = tpu.concatenate %799, %815 in 1 : vector<2x32xf32>, vector<2x32xf32> -> vector<2x64xf32>
    %cst_310 = arith.constant dense<0.000000e+00> : vector<2x256xf32>
    %818 = tpu.matmul %817, %545, %cst_310 {dimension_numbers = #tpu.dot_dimension_numbers<[1], [0], [0], [1], [0, 0, 1, 1], [], []>} : vector<2x64xf32>, vector<64x256xf32>, vector<2x256xf32> -> vector<2x256xf32>
    %819 = arith.index_cast %c4_i32_308 : i32 to index
    %c0_311 = arith.constant 0 : index
    %c0_312 = arith.constant 0 : index
    %820 = vector.load %arg13[%819, %c0_311, %c0_312] : memref<8x2x256xf32, #tpu.memory_space<vmem>>, vector<1x2x128xf32>
    %821 = vector.shape_cast %820 : vector<1x2x128xf32> to vector<2x128xf32>
    %822 = vector.extract_strided_slice %818 {offsets = [0, 0], sizes = [2, 128], strides = [1, 1]} : vector<2x256xf32> to vector<2x128xf32>
    %823 = arith.addf %821, %822 : vector<2x128xf32>
    %824 = arith.index_cast %816 : i32 to index
    %c0_313 = arith.constant 0 : index
    %c128_314 = arith.constant 128 : index
    %825 = vector.load %arg13[%824, %c0_313, %c128_314] : memref<8x2x256xf32, #tpu.memory_space<vmem>>, vector<1x2x128xf32>
    %826 = vector.shape_cast %825 : vector<1x2x128xf32> to vector<2x128xf32>
    %827 = vector.extract_strided_slice %818 {offsets = [0, 128], sizes = [2, 128], strides = [1, 1]} : vector<2x256xf32> to vector<2x128xf32>
    %828 = arith.addf %826, %827 : vector<2x128xf32>
    %829 = vector.extract_strided_slice %823 {offsets = [0, 0], sizes = [2, 96], strides = [1, 1]} : vector<2x128xf32> to vector<2x96xf32>
    %830 = arith.negf %829 : vector<2x96xf32>
    %831 = math.exp %830 : vector<2x96xf32>
    %cst_315 = arith.constant 1.000000e+00 : f32
    %832 = vector.broadcast %cst_315 : f32 to vector<2x96xf32>
    %833 = arith.addf %832, %831 : vector<2x96xf32>
    %834 = arith.divf %832, %833 : vector<2x96xf32>
    %835 = vector.extract_strided_slice %834 {offsets = [0, 0], sizes = [2, 32], strides = [1, 1]} : vector<2x96xf32> to vector<2x32xf32>
    %836 = vector.extract_strided_slice %834 {offsets = [0, 32], sizes = [2, 32], strides = [1, 1]} : vector<2x96xf32> to vector<2x32xf32>
    %837 = vector.extract_strided_slice %834 {offsets = [0, 64], sizes = [2, 32], strides = [1, 1]} : vector<2x96xf32> to vector<2x32xf32>
    %838 = vector.extract_strided_slice %823 {offsets = [0, 96], sizes = [2, 32], strides = [1, 1]} : vector<2x128xf32> to vector<2x32xf32>
    %839 = math.tanh %838 : vector<2x32xf32>
    %840 = arith.mulf %836, %797 : vector<2x32xf32>
    %841 = arith.mulf %835, %839 : vector<2x32xf32>
    %842 = arith.addf %840, %841 : vector<2x32xf32>
    %843 = math.tanh %842 : vector<2x32xf32>
    %844 = arith.mulf %837, %843 : vector<2x32xf32>
    %845 = vector.extract_strided_slice %828 {offsets = [0, 0], sizes = [2, 96], strides = [1, 1]} : vector<2x128xf32> to vector<2x96xf32>
    %846 = arith.negf %845 : vector<2x96xf32>
    %847 = math.exp %846 : vector<2x96xf32>
    %cst_316 = arith.constant 1.000000e+00 : f32
    %848 = vector.broadcast %cst_316 : f32 to vector<2x96xf32>
    %849 = arith.addf %848, %847 : vector<2x96xf32>
    %850 = arith.divf %848, %849 : vector<2x96xf32>
    %851 = vector.extract_strided_slice %850 {offsets = [0, 0], sizes = [2, 32], strides = [1, 1]} : vector<2x96xf32> to vector<2x32xf32>
    %852 = vector.extract_strided_slice %850 {offsets = [0, 32], sizes = [2, 32], strides = [1, 1]} : vector<2x96xf32> to vector<2x32xf32>
    %853 = vector.extract_strided_slice %850 {offsets = [0, 64], sizes = [2, 32], strides = [1, 1]} : vector<2x96xf32> to vector<2x32xf32>
    %854 = vector.extract_strided_slice %828 {offsets = [0, 96], sizes = [2, 32], strides = [1, 1]} : vector<2x128xf32> to vector<2x32xf32>
    %855 = math.tanh %854 : vector<2x32xf32>
    %856 = arith.mulf %852, %813 : vector<2x32xf32>
    %857 = arith.mulf %851, %855 : vector<2x32xf32>
    %858 = arith.addf %856, %857 : vector<2x32xf32>
    %859 = math.tanh %858 : vector<2x32xf32>
    %860 = arith.mulf %853, %859 : vector<2x32xf32>
    %c5_i32_317 = arith.constant 5 : i32
    %c7_i32_318 = arith.constant 7 : i32
    %861 = arith.subi %c7_i32_318, %c5_i32_317 : i32
    %862 = tpu.concatenate %844, %860 in 1 : vector<2x32xf32>, vector<2x32xf32> -> vector<2x64xf32>
    %cst_319 = arith.constant dense<0.000000e+00> : vector<2x256xf32>
    %863 = tpu.matmul %862, %545, %cst_319 {dimension_numbers = #tpu.dot_dimension_numbers<[1], [0], [0], [1], [0, 0, 1, 1], [], []>} : vector<2x64xf32>, vector<64x256xf32>, vector<2x256xf32> -> vector<2x256xf32>
    %864 = arith.index_cast %c5_i32_317 : i32 to index
    %c0_320 = arith.constant 0 : index
    %c0_321 = arith.constant 0 : index
    %865 = vector.load %arg13[%864, %c0_320, %c0_321] : memref<8x2x256xf32, #tpu.memory_space<vmem>>, vector<1x2x128xf32>
    %866 = vector.shape_cast %865 : vector<1x2x128xf32> to vector<2x128xf32>
    %867 = vector.extract_strided_slice %863 {offsets = [0, 0], sizes = [2, 128], strides = [1, 1]} : vector<2x256xf32> to vector<2x128xf32>
    %868 = arith.addf %866, %867 : vector<2x128xf32>
    %869 = arith.index_cast %861 : i32 to index
    %c0_322 = arith.constant 0 : index
    %c128_323 = arith.constant 128 : index
    %870 = vector.load %arg13[%869, %c0_322, %c128_323] : memref<8x2x256xf32, #tpu.memory_space<vmem>>, vector<1x2x128xf32>
    %871 = vector.shape_cast %870 : vector<1x2x128xf32> to vector<2x128xf32>
    %872 = vector.extract_strided_slice %863 {offsets = [0, 128], sizes = [2, 128], strides = [1, 1]} : vector<2x256xf32> to vector<2x128xf32>
    %873 = arith.addf %871, %872 : vector<2x128xf32>
    %874 = vector.extract_strided_slice %868 {offsets = [0, 0], sizes = [2, 96], strides = [1, 1]} : vector<2x128xf32> to vector<2x96xf32>
    %875 = arith.negf %874 : vector<2x96xf32>
    %876 = math.exp %875 : vector<2x96xf32>
    %cst_324 = arith.constant 1.000000e+00 : f32
    %877 = vector.broadcast %cst_324 : f32 to vector<2x96xf32>
    %878 = arith.addf %877, %876 : vector<2x96xf32>
    %879 = arith.divf %877, %878 : vector<2x96xf32>
    %880 = vector.extract_strided_slice %879 {offsets = [0, 0], sizes = [2, 32], strides = [1, 1]} : vector<2x96xf32> to vector<2x32xf32>
    %881 = vector.extract_strided_slice %879 {offsets = [0, 32], sizes = [2, 32], strides = [1, 1]} : vector<2x96xf32> to vector<2x32xf32>
    %882 = vector.extract_strided_slice %879 {offsets = [0, 64], sizes = [2, 32], strides = [1, 1]} : vector<2x96xf32> to vector<2x32xf32>
    %883 = vector.extract_strided_slice %868 {offsets = [0, 96], sizes = [2, 32], strides = [1, 1]} : vector<2x128xf32> to vector<2x32xf32>
    %884 = math.tanh %883 : vector<2x32xf32>
    %885 = arith.mulf %881, %842 : vector<2x32xf32>
    %886 = arith.mulf %880, %884 : vector<2x32xf32>
    %887 = arith.addf %885, %886 : vector<2x32xf32>
    %888 = math.tanh %887 : vector<2x32xf32>
    %889 = arith.mulf %882, %888 : vector<2x32xf32>
    %890 = vector.extract_strided_slice %873 {offsets = [0, 0], sizes = [2, 96], strides = [1, 1]} : vector<2x128xf32> to vector<2x96xf32>
    %891 = arith.negf %890 : vector<2x96xf32>
    %892 = math.exp %891 : vector<2x96xf32>
    %cst_325 = arith.constant 1.000000e+00 : f32
    %893 = vector.broadcast %cst_325 : f32 to vector<2x96xf32>
    %894 = arith.addf %893, %892 : vector<2x96xf32>
    %895 = arith.divf %893, %894 : vector<2x96xf32>
    %896 = vector.extract_strided_slice %895 {offsets = [0, 0], sizes = [2, 32], strides = [1, 1]} : vector<2x96xf32> to vector<2x32xf32>
    %897 = vector.extract_strided_slice %895 {offsets = [0, 32], sizes = [2, 32], strides = [1, 1]} : vector<2x96xf32> to vector<2x32xf32>
    %898 = vector.extract_strided_slice %895 {offsets = [0, 64], sizes = [2, 32], strides = [1, 1]} : vector<2x96xf32> to vector<2x32xf32>
    %899 = vector.extract_strided_slice %873 {offsets = [0, 96], sizes = [2, 32], strides = [1, 1]} : vector<2x128xf32> to vector<2x32xf32>
    %900 = math.tanh %899 : vector<2x32xf32>
    %901 = arith.mulf %897, %858 : vector<2x32xf32>
    %902 = arith.mulf %896, %900 : vector<2x32xf32>
    %903 = arith.addf %901, %902 : vector<2x32xf32>
    %904 = math.tanh %903 : vector<2x32xf32>
    %905 = arith.mulf %898, %904 : vector<2x32xf32>
    %c6_i32_326 = arith.constant 6 : i32
    %c7_i32_327 = arith.constant 7 : i32
    %906 = arith.subi %c7_i32_327, %c6_i32_326 : i32
    %907 = tpu.concatenate %889, %905 in 1 : vector<2x32xf32>, vector<2x32xf32> -> vector<2x64xf32>
    %cst_328 = arith.constant dense<0.000000e+00> : vector<2x256xf32>
    %908 = tpu.matmul %907, %545, %cst_328 {dimension_numbers = #tpu.dot_dimension_numbers<[1], [0], [0], [1], [0, 0, 1, 1], [], []>} : vector<2x64xf32>, vector<64x256xf32>, vector<2x256xf32> -> vector<2x256xf32>
    %909 = arith.index_cast %c6_i32_326 : i32 to index
    %c0_329 = arith.constant 0 : index
    %c0_330 = arith.constant 0 : index
    %910 = vector.load %arg13[%909, %c0_329, %c0_330] : memref<8x2x256xf32, #tpu.memory_space<vmem>>, vector<1x2x128xf32>
    %911 = vector.shape_cast %910 : vector<1x2x128xf32> to vector<2x128xf32>
    %912 = vector.extract_strided_slice %908 {offsets = [0, 0], sizes = [2, 128], strides = [1, 1]} : vector<2x256xf32> to vector<2x128xf32>
    %913 = arith.addf %911, %912 : vector<2x128xf32>
    %914 = arith.index_cast %906 : i32 to index
    %c0_331 = arith.constant 0 : index
    %c128_332 = arith.constant 128 : index
    %915 = vector.load %arg13[%914, %c0_331, %c128_332] : memref<8x2x256xf32, #tpu.memory_space<vmem>>, vector<1x2x128xf32>
    %916 = vector.shape_cast %915 : vector<1x2x128xf32> to vector<2x128xf32>
    %917 = vector.extract_strided_slice %908 {offsets = [0, 128], sizes = [2, 128], strides = [1, 1]} : vector<2x256xf32> to vector<2x128xf32>
    %918 = arith.addf %916, %917 : vector<2x128xf32>
    %919 = vector.extract_strided_slice %913 {offsets = [0, 0], sizes = [2, 96], strides = [1, 1]} : vector<2x128xf32> to vector<2x96xf32>
    %920 = arith.negf %919 : vector<2x96xf32>
    %921 = math.exp %920 : vector<2x96xf32>
    %cst_333 = arith.constant 1.000000e+00 : f32
    %922 = vector.broadcast %cst_333 : f32 to vector<2x96xf32>
    %923 = arith.addf %922, %921 : vector<2x96xf32>
    %924 = arith.divf %922, %923 : vector<2x96xf32>
    %925 = vector.extract_strided_slice %924 {offsets = [0, 0], sizes = [2, 32], strides = [1, 1]} : vector<2x96xf32> to vector<2x32xf32>
    %926 = vector.extract_strided_slice %924 {offsets = [0, 32], sizes = [2, 32], strides = [1, 1]} : vector<2x96xf32> to vector<2x32xf32>
    %927 = vector.extract_strided_slice %924 {offsets = [0, 64], sizes = [2, 32], strides = [1, 1]} : vector<2x96xf32> to vector<2x32xf32>
    %928 = vector.extract_strided_slice %913 {offsets = [0, 96], sizes = [2, 32], strides = [1, 1]} : vector<2x128xf32> to vector<2x32xf32>
    %929 = math.tanh %928 : vector<2x32xf32>
    %930 = arith.mulf %926, %887 : vector<2x32xf32>
    %931 = arith.mulf %925, %929 : vector<2x32xf32>
    %932 = arith.addf %930, %931 : vector<2x32xf32>
    %933 = math.tanh %932 : vector<2x32xf32>
    %934 = arith.mulf %927, %933 : vector<2x32xf32>
    %935 = vector.extract_strided_slice %918 {offsets = [0, 0], sizes = [2, 96], strides = [1, 1]} : vector<2x128xf32> to vector<2x96xf32>
    %936 = arith.negf %935 : vector<2x96xf32>
    %937 = math.exp %936 : vector<2x96xf32>
    %cst_334 = arith.constant 1.000000e+00 : f32
    %938 = vector.broadcast %cst_334 : f32 to vector<2x96xf32>
    %939 = arith.addf %938, %937 : vector<2x96xf32>
    %940 = arith.divf %938, %939 : vector<2x96xf32>
    %941 = vector.extract_strided_slice %940 {offsets = [0, 0], sizes = [2, 32], strides = [1, 1]} : vector<2x96xf32> to vector<2x32xf32>
    %942 = vector.extract_strided_slice %940 {offsets = [0, 32], sizes = [2, 32], strides = [1, 1]} : vector<2x96xf32> to vector<2x32xf32>
    %943 = vector.extract_strided_slice %940 {offsets = [0, 64], sizes = [2, 32], strides = [1, 1]} : vector<2x96xf32> to vector<2x32xf32>
    %944 = vector.extract_strided_slice %918 {offsets = [0, 96], sizes = [2, 32], strides = [1, 1]} : vector<2x128xf32> to vector<2x32xf32>
    %945 = math.tanh %944 : vector<2x32xf32>
    %946 = arith.mulf %942, %903 : vector<2x32xf32>
    %947 = arith.mulf %941, %945 : vector<2x32xf32>
    %948 = arith.addf %946, %947 : vector<2x32xf32>
    %949 = math.tanh %948 : vector<2x32xf32>
    %950 = arith.mulf %943, %949 : vector<2x32xf32>
    %c7_i32_335 = arith.constant 7 : i32
    %c7_i32_336 = arith.constant 7 : i32
    %951 = arith.subi %c7_i32_336, %c7_i32_335 : i32
    %952 = tpu.concatenate %934, %950 in 1 : vector<2x32xf32>, vector<2x32xf32> -> vector<2x64xf32>
    %cst_337 = arith.constant dense<0.000000e+00> : vector<2x256xf32>
    %953 = tpu.matmul %952, %545, %cst_337 {dimension_numbers = #tpu.dot_dimension_numbers<[1], [0], [0], [1], [0, 0, 1, 1], [], []>} : vector<2x64xf32>, vector<64x256xf32>, vector<2x256xf32> -> vector<2x256xf32>
    %954 = arith.index_cast %c7_i32_335 : i32 to index
    %c0_338 = arith.constant 0 : index
    %c0_339 = arith.constant 0 : index
    %955 = vector.load %arg13[%954, %c0_338, %c0_339] : memref<8x2x256xf32, #tpu.memory_space<vmem>>, vector<1x2x128xf32>
    %956 = vector.shape_cast %955 : vector<1x2x128xf32> to vector<2x128xf32>
    %957 = vector.extract_strided_slice %953 {offsets = [0, 0], sizes = [2, 128], strides = [1, 1]} : vector<2x256xf32> to vector<2x128xf32>
    %958 = arith.addf %956, %957 : vector<2x128xf32>
    %959 = arith.index_cast %951 : i32 to index
    %c0_340 = arith.constant 0 : index
    %c128_341 = arith.constant 128 : index
    %960 = vector.load %arg13[%959, %c0_340, %c128_341] : memref<8x2x256xf32, #tpu.memory_space<vmem>>, vector<1x2x128xf32>
    %961 = vector.shape_cast %960 : vector<1x2x128xf32> to vector<2x128xf32>
    %962 = vector.extract_strided_slice %953 {offsets = [0, 128], sizes = [2, 128], strides = [1, 1]} : vector<2x256xf32> to vector<2x128xf32>
    %963 = arith.addf %961, %962 : vector<2x128xf32>
    %964 = vector.extract_strided_slice %958 {offsets = [0, 0], sizes = [2, 96], strides = [1, 1]} : vector<2x128xf32> to vector<2x96xf32>
    %965 = arith.negf %964 : vector<2x96xf32>
    %966 = math.exp %965 : vector<2x96xf32>
    %cst_342 = arith.constant 1.000000e+00 : f32
    %967 = vector.broadcast %cst_342 : f32 to vector<2x96xf32>
    %968 = arith.addf %967, %966 : vector<2x96xf32>
    %969 = arith.divf %967, %968 : vector<2x96xf32>
    %970 = vector.extract_strided_slice %969 {offsets = [0, 0], sizes = [2, 32], strides = [1, 1]} : vector<2x96xf32> to vector<2x32xf32>
    %971 = vector.extract_strided_slice %969 {offsets = [0, 32], sizes = [2, 32], strides = [1, 1]} : vector<2x96xf32> to vector<2x32xf32>
    %972 = vector.extract_strided_slice %969 {offsets = [0, 64], sizes = [2, 32], strides = [1, 1]} : vector<2x96xf32> to vector<2x32xf32>
    %973 = vector.extract_strided_slice %958 {offsets = [0, 96], sizes = [2, 32], strides = [1, 1]} : vector<2x128xf32> to vector<2x32xf32>
    %974 = math.tanh %973 : vector<2x32xf32>
    %975 = arith.mulf %971, %932 : vector<2x32xf32>
    %976 = arith.mulf %970, %974 : vector<2x32xf32>
    %977 = arith.addf %975, %976 : vector<2x32xf32>
    %978 = math.tanh %977 : vector<2x32xf32>
    %979 = arith.mulf %972, %978 : vector<2x32xf32>
    %980 = vector.extract_strided_slice %963 {offsets = [0, 0], sizes = [2, 96], strides = [1, 1]} : vector<2x128xf32> to vector<2x96xf32>
    %981 = arith.negf %980 : vector<2x96xf32>
    %982 = math.exp %981 : vector<2x96xf32>
    %cst_343 = arith.constant 1.000000e+00 : f32
    %983 = vector.broadcast %cst_343 : f32 to vector<2x96xf32>
    %984 = arith.addf %983, %982 : vector<2x96xf32>
    %985 = arith.divf %983, %984 : vector<2x96xf32>
    %986 = vector.extract_strided_slice %985 {offsets = [0, 0], sizes = [2, 32], strides = [1, 1]} : vector<2x96xf32> to vector<2x32xf32>
    %987 = vector.extract_strided_slice %985 {offsets = [0, 32], sizes = [2, 32], strides = [1, 1]} : vector<2x96xf32> to vector<2x32xf32>
    %988 = vector.extract_strided_slice %985 {offsets = [0, 64], sizes = [2, 32], strides = [1, 1]} : vector<2x96xf32> to vector<2x32xf32>
    %989 = vector.extract_strided_slice %963 {offsets = [0, 96], sizes = [2, 32], strides = [1, 1]} : vector<2x128xf32> to vector<2x32xf32>
    %990 = math.tanh %989 : vector<2x32xf32>
    %991 = arith.mulf %987, %948 : vector<2x32xf32>
    %992 = arith.mulf %986, %990 : vector<2x32xf32>
    %993 = arith.addf %991, %992 : vector<2x32xf32>
    %994 = math.tanh %993 : vector<2x32xf32>
    %995 = arith.mulf %988, %994 : vector<2x32xf32>
    %c8_i32_344 = arith.constant 8 : i32
    %c2_345 = arith.constant 2 : index
    %c0_346 = arith.constant 0 : index
    %c0_347 = arith.constant 0 : index
    %996 = vector.load %arg9[%c2_345, %c0_346, %c0_347] : memref<4x2x32xf32, #tpu.memory_space<vmem>>, vector<1x2x32xf32>
    %997 = vector.shape_cast %996 : vector<1x2x32xf32> to vector<2x32xf32>
    %998 = vector.shape_cast %979 : vector<2x32xf32> to vector<1x2x32xf32>
    tpu.vector_store %arg9[%c2_345, %c0_346, %c0_347], %998 {strides = array<i32>} : memref<4x2x32xf32, #tpu.memory_space<vmem>>, vector<1x2x32xf32>,
    %c3_348 = arith.constant 3 : index
    %c0_349 = arith.constant 0 : index
    %c0_350 = arith.constant 0 : index
    %999 = vector.load %arg9[%c3_348, %c0_349, %c0_350] : memref<4x2x32xf32, #tpu.memory_space<vmem>>, vector<1x2x32xf32>
    %1000 = vector.shape_cast %999 : vector<1x2x32xf32> to vector<2x32xf32>
    %1001 = vector.shape_cast %995 : vector<2x32xf32> to vector<1x2x32xf32>
    tpu.vector_store %arg9[%c3_348, %c0_349, %c0_350], %1001 {strides = array<i32>} : memref<4x2x32xf32, #tpu.memory_space<vmem>>, vector<1x2x32xf32>,
    %c2_351 = arith.constant 2 : index
    %c0_352 = arith.constant 0 : index
    %c0_353 = arith.constant 0 : index
    %1002 = vector.load %arg10[%c2_351, %c0_352, %c0_353] : memref<4x2x32xf32, #tpu.memory_space<vmem>>, vector<1x2x32xf32>
    %1003 = vector.shape_cast %1002 : vector<1x2x32xf32> to vector<2x32xf32>
    %1004 = vector.shape_cast %977 : vector<2x32xf32> to vector<1x2x32xf32>
    tpu.vector_store %arg10[%c2_351, %c0_352, %c0_353], %1004 {strides = array<i32>} : memref<4x2x32xf32, #tpu.memory_space<vmem>>, vector<1x2x32xf32>,
    %c3_354 = arith.constant 3 : index
    %c0_355 = arith.constant 0 : index
    %c0_356 = arith.constant 0 : index
    %1005 = vector.load %arg10[%c3_354, %c0_355, %c0_356] : memref<4x2x32xf32, #tpu.memory_space<vmem>>, vector<1x2x32xf32>
    %1006 = vector.shape_cast %1005 : vector<1x2x32xf32> to vector<2x32xf32>
    %1007 = vector.shape_cast %993 : vector<2x32xf32> to vector<1x2x32xf32>
    tpu.vector_store %arg10[%c3_354, %c0_355, %c0_356], %1007 {strides = array<i32>} : memref<4x2x32xf32, #tpu.memory_space<vmem>>, vector<1x2x32xf32>,
    return
  }
  func.func @transform_0(%arg0: i32, %arg1: memref<8x2xi32, #tpu.memory_space<smem>>) -> (i32, i32) {
    %c0_i32 = arith.constant 0 : i32
    %c0_i32_0 = arith.constant 0 : i32
    %c0_i32_1 = arith.constant 0 : i32
    return %c0_i32, %c0_i32_0 : i32, i32
  }
  func.func @transform_1(%arg0: i32, %arg1: memref<8x2xi32, #tpu.memory_space<smem>>) -> (i32, i32) {
    %c0_i32 = arith.constant 0 : i32
    %c0_i32_0 = arith.constant 0 : i32
    %c0_i32_1 = arith.constant 0 : i32
    return %c0_i32, %c0_i32_0 : i32, i32
  }
  func.func @transform_2(%arg0: i32, %arg1: memref<8x2xi32, #tpu.memory_space<smem>>) -> (i32, i32) {
    %c0_i32 = arith.constant 0 : i32
    %c0_i32_0 = arith.constant 0 : i32
    %c0_i32_1 = arith.constant 0 : i32
    return %c0_i32, %c0_i32_0 : i32, i32
  }
  func.func @transform_3(%arg0: i32, %arg1: memref<8x2xi32, #tpu.memory_space<smem>>) -> (i32, i32) {
    %c0_i32 = arith.constant 0 : i32
    %c0_i32_0 = arith.constant 0 : i32
    %c0_i32_1 = arith.constant 0 : i32
    return %c0_i32, %c0_i32_0 : i32, i32
  }
  func.func @transform_4(%arg0: i32, %arg1: memref<8x2xi32, #tpu.memory_space<smem>>) -> (i32, i32) {
    %c0_i32 = arith.constant 0 : i32
    %c0_i32_0 = arith.constant 0 : i32
    %c0_i32_1 = arith.constant 0 : i32
    return %c0_i32, %c0_i32_0 : i32, i32
  }
  func.func @transform_5(%arg0: i32, %arg1: memref<8x2xi32, #tpu.memory_space<smem>>) -> (i32, i32) {
    %c0_i32 = arith.constant 0 : i32
    %c0_i32_0 = arith.constant 0 : i32
    %c0_i32_1 = arith.constant 0 : i32
    return %c0_i32, %c0_i32_0 : i32, i32
  }
  func.func @transform_6(%arg0: i32, %arg1: memref<8x2xi32, #tpu.memory_space<smem>>) -> (i32, i32) {
    %c0_i32 = arith.constant 0 : i32
    %c0_i32_0 = arith.constant 0 : i32
    %c0_i32_1 = arith.constant 0 : i32
    return %c0_i32, %c0_i32_0 : i32, i32
  }
  func.func @transform_7(%arg0: i32, %arg1: memref<8x2xi32, #tpu.memory_space<smem>>) -> (i32, i32, i32) {
    %c0_i32 = arith.constant 0 : i32
    %c0_i32_0 = arith.constant 0 : i32
    %c0_i32_1 = arith.constant 0 : i32
    %c0_i32_2 = arith.constant 0 : i32
    return %c0_i32, %c0_i32_0, %c0_i32_1 : i32, i32, i32
  }
  func.func @transform_8(%arg0: i32, %arg1: memref<8x2xi32, #tpu.memory_space<smem>>) -> (i32, i32, i32) {
    %c0_i32 = arith.constant 0 : i32
    %c0_i32_0 = arith.constant 0 : i32
    %c0_i32_1 = arith.constant 0 : i32
    %c0_i32_2 = arith.constant 0 : i32
    return %c0_i32, %c0_i32_0, %c0_i32_1 : i32, i32, i32
  }
}

</mosaic_0001>

<bundles_post_ra>
// kernel: encoder_forward.1
= control target key start
LH: loop header
LB: loop body
LE: loop exit
PB: predicated region body
PF: predicated region fallthrough
CT: control target
= control target key end

     0   :  { %s5904_s0 = inlined_call_operand.vmem [shape: s32[8,2], index: 0, kind: input, shape index: {}]   ;;  %s5905_s1 = inlined_call_operand.vmem [shape: f32[50,32], index: 1, kind: input, shape index: {}]   ;;  %s5906_s2 = inlined_call_operand.vmem [shape: f32[32,256], index: 2, kind: input, shape index: {}]   ;;  %s5907_s3 = inlined_call_operand.hbm [shape: f32[64,256], index: 3, kind: input, shape index: {}]   ;;  %s5908_s4 = inlined_call_operand.vmem [shape: f32[1,256], index: 4, kind: input, shape index: {}]   ;;  %s5909_s5 = inlined_call_operand.hbm [shape: f32[64,256], index: 5, kind: input, shape index: {}]   ;;  %s5910_s6 = inlined_call_operand.hbm [shape: f32[64,256], index: 6, kind: input, shape index: {}]   ;;  %s5911_s7 = inlined_call_operand.vmem [shape: f32[1,256], index: 7, kind: input, shape index: {}]   ;;  %s5912_s8 = inlined_call_operand.hbm [shape: f32[4,2,32], index: 8, kind: output, shape index: {0}]   ;;  %s5913_s9 = inlined_call_operand.hbm [shape: f32[4,2,32], index: 9, kind: output, shape index: {1}]  }
   0x1   :  { %s15_s11 = sshll.u32 %s5904_s0, 4  ;;  %s16_s11 = int_to_ptr.vmem [resolvable:$true] %s15_s11 }
   0x2   :  { %s4582_s12 = scalar_lea.vmem %s16_s11, 128  ;;  %p4587_p1 = scmp.lt.s32.totalorder %s16_s11, %s16_s11 }
   0x3   :  { %p4583_p0 = scmp.ne.s32.totalorder %s16_s11, %s4582_s12  ;;  %p4588_p2 = scmp.lt.s32.totalorder %s4582_s12, %s4582_s12 }
   0x5   :  { %p4589_p3 = por %p4588_p2, %p4587_p1 }
   0x7   :  { %p4590_p4 = pnand %p4589_p3, %p4583_p0 }
   0x9   :  { %4593 = shalt.err (!%p4590_p4)  }
   0xa   :  { %s4704_s13 = smov [#allocation6]  }
   0xb   :  { %18 = dma.vmem_to_smem %s16_s11, 128, %s4704_s13, [#allocation5] }
   0xc   :  { %4694 = dma.done.wait [#allocation5], 128 }
   0xd   :  { %4695 = vsyncadd [#allocation5], 4294967168 }
   0xe   :  { %20 = sfence }
   0xf   :  { %21 = vsyncpa [#allocation8], 0 }
  0x10   :  { %22 = vsyncpa [#allocation11], 0 }
  0x11   :  { %23 = vsyncpa [#allocation9], 0 }
  0x12   :  { %24 = vsyncpa [#allocation15], 0  ;;  %s4705_s14 = smov [#allocation10]   ;;  %s4706_s0 = smov [#allocation7]  }
  0x13   :  { %s48_s15 = sshll.u32 %s4705_s14, 4  ;;  %s34_s16 = sshll.u32 %s4706_s0, 4  ;;  %s49_s15 = int_to_ptr.vmem [resolvable:$true] %s48_s15  ;;  %s35_s16 = int_to_ptr.vmem [resolvable:$true] %s34_s16 }
  0x14   :  { %s4602_s17 = scalar_lea.vmem %s49_s15, 2048  ;;  %p4607_p6 = scmp.lt.s32.totalorder %s49_s15, %s49_s15 }
  0x15   :  { %p4603_p5 = scmp.ne.s32.totalorder %s49_s15, %s4602_s17  ;;  %p4608_p7 = scmp.lt.s32.totalorder %s4602_s17, %s4602_s17 }
  0x17   :  { %p4609_p8 = por %p4608_p7, %p4607_p6 }
  0x19   :  { %p4610_p9 = pnand %p4609_p8, %p4603_p5 }
  0x1b   :  { %4613 = shalt.err (!%p4610_p9)
}
  0x1c   :  { %s4707_s18 = smov 256   ;;  %s4708_s19 = smov 16  }
  0x1d   :  { %54 = dma.hbm_to_vmem [thread:$0]  %s5909_s5, 2048, %s49_s15, [#allocation11], %s4707_s18, %s4707_s18, %s4708_s19  }
  0x1e   :  { %s4622_s22 = scalar_lea.vmem %s35_s16, 2048  ;;  %p4627_p11 = scmp.lt.s32.totalorder %s35_s16, %s35_s16 }
  0x1f   :  { %p4623_p10 = scmp.ne.s32.totalorder %s35_s16, %s4622_s22  ;;  %p4628_p12 = scmp.lt.s32.totalorder %s4622_s22, %s4622_s22 }
  0x21   :  { %p4629_p13 = por %p4628_p12, %p4627_p11 }
  0x23   :  { %p4630_p0 = pnand %p4629_p13, %p4623_p10 }
  0x25   :  { %4633 = shalt.err (!%p4630_p0)
}
  0x26   :  { %40 = dma.hbm_to_vmem [thread:$0]  %s5907_s3, 2048, %s35_s16, [#allocation8], %s4707_s18, %s4707_s18, %s4708_s19  }
  0x27   :  { %s4709_s25 = smov [#allocation12]  }
  0x28   :  { %s60_s26 = sshll.u32 %s4709_s25, 4  ;;  %s61_s26 = int_to_ptr.vmem [resolvable:$true] %s60_s26 }
  0x29   :  { %s4642_s27 = scalar_lea.vmem %s61_s26, 2048  ;;  %p4647_p2 = scmp.lt.s32.totalorder %s61_s26, %s61_s26 }
  0x2a   :  { %p4643_p1 = scmp.ne.s32.totalorder %s61_s26, %s4642_s27  ;;  %p4648_p3 = scmp.lt.s32.totalorder %s4642_s27, %s4642_s27 }
  0x2c   :  { %p4649_p4 = por %p4648_p3, %p4647_p2 }
  0x2e   :  { %p4650_p5 = pnand %p4649_p4, %p4643_p1 }
  0x30   :  { %4653 = shalt.err (!%p4650_p5)
}
  0x31   :  { %66 = dma.hbm_to_vmem [thread:$0]  %s5910_s6, 2048, %s61_s26, [#allocation11], %s4707_s18, %s4707_s18, %s4708_s19  }
  0x32   :  { %4696 = dma.done.wait [#allocation8], 2048  }
  0x33   :  { %4697 = vsyncadd [#allocation8], 4294965248 }
  0x34   :  { %4698 = dma.done.wait [#allocation11], 4096  }
  0x35   :  { %4699 = vsyncadd [#allocation11], 4294963200  ;;  %v4710_v0 = vmov 0.0   ;;  %s103_s3 = sld [smem:[#allocation6]]  ;;  %v4789_v1 = vld [vmem:[%s5906_s2 + $0x38] sm:$0xff]  ;;  %v4794_v2 = vld [vmem:[%s5906_s2 + $0x30] sm:$0xff]  ;;  %v115_v57 = vlaneseq }
  0x36   :  { %193 = vmatprep.mubr.f32.mxu0 %v4710_v0  ;;  %289 = vmatprep.mubr.f32.mxu1 %v4710_v0  ;;  %s4219_s29 = sld [smem:[#allocation6 + $0x1]]  ;;  %v4799_v3 = vld [vmem:[%s5906_s2 + $0x28] sm:$0xff]  ;;  %v4810_v4 = vld [vmem:[%s5906_s2 + $0x20] sm:$0xff]  ;;  %v4822_v5 = vld [vmem:[%s5906_s2 + $0x18] sm:$0xff]  ;;  %vm112_vm0 = vcmask 1040384   ;;  %vm125_vm1 = vcmask 261120  }
  0x37   :  { %s4782_s30 = sld [smem:[#allocation6 + $0x80]]  ;;  %153 = vmatprep.subr.mxu0 %v4789_v1  ;;  %249 = vmatprep.subr.mxu1 %v4789_v1  ;;  %v4833_v6 = vld [vmem:[%s5906_s2 + $0x10] sm:$0xff]  ;;  %v4843_v9 = vld [vmem:[%s5906_s2 + $0x8] sm:$0xff]  ;;  %v4852_v12 = vld [vmem:[%s5906_s2] sm:$0xff]  ;;  %v5081_v58 = vshrl.u32 %v115_v57, 7  ;;  %vm1029_vm2 = vcmask 254976  }
  0x38   :  { %s4223_s10 = sld [smem:[#allocation6 + $0x81]]  ;;  %154 = vmatpush1.msra.mxu0 %v4794_v2  ;;  %250 = vmatpush1.msra.mxu1 %v4794_v2  ;;  %v4984_v38 = vld [vmem:[#allocation7 + $0x78] sm:$0xff]  ;;  %v4988_v40 = vld [vmem:[#allocation7 + $0x70] sm:$0xff]  ;;  %v4992_v42 = vld [vmem:[#allocation7 + $0x68] sm:$0xff]  ;;  %vm891_vm3 = vcmask 523264   ;;  %s4716_s16 = smov [#allocation14]  }
  0x39   :  { %s4784_s11 = sld [smem:[#allocation6 + $0x101]]  ;;  %155 = vmatprep.subr.mxu0 %v4799_v3  ;;  %251 = vmatprep.subr.mxu1 %v4799_v3  ;;  %v4998_v43 = vld [vmem:[#allocation7 + $0x60] sm:$0xff]  ;;  %v5003_v45 = vld [vmem:[#allocation7 + $0x58] sm:$0xff]  ;;  %v5007_v46 = vld [vmem:[#allocation7 + $0x50] sm:$0xff]  ;;  %v117_v59 = vsub.s32 0, %v5081_v58  ;;  %v121_v61 = vsub.s32 1, %v5081_v58 }
  0x3a   :  { %s4804_s19 = sld [smem:[#allocation6 + $0x100]]  ;;  %156 = vmatpush1.msra.mxu0 %v4810_v4  ;;  %252 = vmatpush1.msra.mxu1 %v4810_v4  ;;  %v5011_v47 = vld [vmem:[#allocation7 + $0x48] sm:$0xff]  ;;  %v5014_v48 = vld [vmem:[#allocation7 + $0x40] sm:$0xff]  ;;  %v5018_v49 = vld [vmem:[#allocation7 + $0x38] sm:$0xff] }
  0x3b   :  { %s104_s18 = scalar_lea.vmem %s5905_s1, %s103_s3  ;;  %s4816_s25 = sld [smem:[#allocation6 + $0x181]]  ;;  %157 = vmatprep.subr.mxu0 %v4822_v5  ;;  %253 = vmatprep.subr.mxu1 %v4822_v5  ;;  %v5022_v50 = vld [vmem:[#allocation7 + $0x30] sm:$0xff]  ;;  %v5026_v51 = vld [vmem:[#allocation7 + $0x28] sm:$0xff]  ;;  %v5030_v52 = vld [vmem:[#allocation7 + $0x20] sm:$0xff] }
  0x3c   :  { %s107_s24 = scalar_lea.vmem %s5905_s1, %s4219_s29  ;;  %v105_v7 = vld [vmem:[%s104_s18] sm:$0x1]  ;;  %s4846_s0 = sld [smem:[#allocation6 + $0x180]]  ;;  %158 = vmatpush1.msra.mxu0 %v4833_v6  ;;  %254 = vmatpush1.msra.mxu1 %v4833_v6  ;;  %v5034_v53 = vld [vmem:[#allocation7 + $0x18] sm:$0xff]  ;;  %v5038_v54 = vld [vmem:[#allocation7 + $0x10] sm:$0xff] }
  0x3d   :  { %s213_s3 = scalar_lea.vmem %s5905_s1, %s4782_s30  ;;  %v108_v8 = vld [vmem:[%s107_s24] sm:$0x1]  ;;  %s4859_s21 = sld [smem:[#allocation6 + $0x201]]  ;;  %159 = vmatprep.subr.mxu0 %v4843_v9  ;;  %255 = vmatprep.subr.mxu1 %v4843_v9  ;;  %v5042_v55 = vld [vmem:[#allocation7 + $0x8] sm:$0xff] }
  0x3e   :  { %s216_s14 = scalar_lea.vmem %s5905_s1, %s4223_s10  ;;  %v110_v10 = vrot.slane %v108_v8, 7  ;;  %v214_v13 = vld [vmem:[%s213_s3] sm:$0x1]  ;;  %160 = vmatpush1.msra.mxu0 %v4852_v12  ;;  %256 = vmatpush1.msra.mxu1 %v4852_v12  ;;  %s4879_s27 = sld [smem:[#allocation6 + $0x200]] }
  0x3f   :  { %v217_v11 = vld [vmem:[%s216_s14] sm:$0x1]  ;;  %s313_s20 = scalar_lea.vmem %s5905_s1, %s4784_s11  ;;  %346 = vmatprep.subr.mxu0 %v4789_v1  ;;  %443 = vmatprep.subr.mxu1 %v4789_v1  ;;  %s4902_s29 = sld [smem:[#allocation6 + $0x280]] }
  0x40   :  { %v219_v14 = vrot.slane %v217_v11, 7  ;;  %v113_v15 = vsel %vm112_vm0, %v105_v7, %v110_v10  ;;  %v314_v16 = vld [vmem:[%s313_s20] sm:$0x1]  ;;  %s310_s22 = scalar_lea.vmem %s5905_s1, %s4804_s19  ;;  %s4885_s19 = sld [smem:[#allocation6 + $0x281]] }
  0x41   :  { %4220 = vmatmul.mubr.msk.f32.vlgmr.msra.gmra.mxu0 %vm125_vm1, %v113_v15  ;;  %s410_s26 = scalar_lea.vmem %s5905_s1, %s4816_s25  ;;  %v316_v18 = vrot.slane %v314_v16, 7  ;;  %v311_v19 = vld [vmem:[%s310_s22] sm:$0x1]  ;;  %s4906_s6 = sld [smem:[#allocation6 + $0x301]] }
  0x42   :  { %v221_v17 = vsel %vm112_vm0, %v214_v13, %v219_v14  ;;  %347 = vmatpush1.msra.mxu0 %v4794_v2  ;;  %v411_v20 = vld [vmem:[%s410_s26] sm:$0x1]  ;;  %s407_s28 = scalar_lea.vmem %s5905_s1, %s4846_s0  ;;  %386 = vmatprep.mubr.f32.mxu0 %v4710_v0  ;;  %s4925_s10 = sld [smem:[#allocation6 + $0x300]] }
  0x43   :  { %348 = vmatprep.subr.mxu0 %v4799_v3  ;;  %4224 = vmatmul.mubr.msk.f32.vlgmr.msra.gmra.mxu1 %vm125_vm1, %v221_v17  ;;  %s507_s13 = scalar_lea.vmem %s5905_s1, %s4859_s21  ;;  %v318_v21 = vsel %vm112_vm0, %v311_v19, %v316_v18  ;;  %v413_v22 = vrot.slane %v411_v20, 7  ;;  %v408_v23 = vld [vmem:[%s407_s28] sm:$0x1]  ;;  %s4929_s18 = sld [smem:[#allocation6 + $0x381]] }
  0x44   :  { %349 = vmatpush1.msra.mxu0 %v4810_v4  ;;  %444 = vmatpush1.msra.mxu1 %v4794_v2  ;;  %v508_v24 = vld [vmem:[%s507_s13] sm:$0x1]  ;;  %s504_s15 = scalar_lea.vmem %s5905_s1, %s4879_s27  ;;  %s4948_s24 = sld [smem:[#allocation6 + $0x380]] }
  0x45   :  { %350 = vmatprep.subr.mxu0 %v4822_v5  ;;  %445 = vmatprep.subr.mxu1 %v4799_v3  ;;  %v415_v25 = vsel %vm112_vm0, %v408_v23, %v413_v22  ;;  %v510_v26 = vrot.slane %v508_v24, 7  ;;  %v505_v27 = vld [vmem:[%s504_s15] sm:$0x1]  ;;  %s601_s2 = scalar_lea.vmem %s5905_s1, %s4902_s29  ;;  %s4714_s14 = smov 96  }
  0x46   :  { %351 = vmatpush1.msra.mxu0 %v4833_v6  ;;  %446 = vmatpush1.msra.mxu1 %v4810_v4  ;;  %s604_s17 = scalar_lea.vmem %s5905_s1, %s4885_s19  ;;  %v602_v31 = vld [vmem:[%s601_s2] sm:$0x1] }
  0x47   :  { %352 = vmatprep.subr.mxu0 %v4843_v9  ;;  %447 = vmatprep.subr.mxu1 %v4822_v5  ;;  %v605_v28 = vld [vmem:[%s604_s17] sm:$0x1]  ;;  %v512_v29 = vsel %vm112_vm0, %v505_v27, %v510_v26  ;;  %s701_s23 = scalar_lea.vmem %s5905_s1, %s4906_s6  ;;  %s4713_s6 = smov 64  }
  0x48   :  { %353 = vmatpush1.msra.mxu0 %v4852_v12  ;;  %448 = vmatpush1.msra.mxu1 %v4833_v6  ;;  %v607_v30 = vrot.slane %v605_v28, 7  ;;  %v702_v32 = vld [vmem:[%s701_s23] sm:$0x1]  ;;  %s698_s19 = scalar_lea.vmem %s5905_s1, %s4925_s10  ;;  %s4186_s17 = sshll.u32 %s4716_s16, 4  ;;  %s4187_s17 = int_to_ptr.vmem [resolvable:$true] %s4186_s17 }
  0x49   :  { %4228 = vmatmul.mubr.msk.f32.vlgmr.msra.gmra.mxu0 %vm125_vm1, %v318_v21  ;;  %540 = vmatprep.subr.mxu0 %v4789_v1  ;;  %s798_s28 = scalar_lea.vmem %s5905_s1, %s4929_s18  ;;  %v704_v34 = vrot.slane %v702_v32, 7  ;;  %v699_v35 = vld [vmem:[%s698_s19] sm:$0x1] }
  0x4a   :  { %541 = vmatpush1.msra.mxu0 %v4794_v2  ;;  %449 = vmatprep.subr.mxu1 %v4843_v9  ;;  %v609_v33 = vsel %vm112_vm0, %v602_v31, %v607_v30  ;;  %v799_v36 = vld [vmem:[%s798_s28] sm:$0x1]  ;;  %s795_s13 = scalar_lea.vmem %s5905_s1, %s4948_s24 }
  0x4b   :  { %542 = vmatprep.subr.mxu0 %v4799_v3  ;;  %450 = vmatpush1.msra.mxu1 %v4852_v12  ;;  %v706_v37 = vsel %vm112_vm0, %v699_v35, %v704_v34  ;;  %v801_v39 = vrot.slane %v799_v36, 7  ;;  %v796_v41 = vld [vmem:[%s795_s13] sm:$0x1] }
  0x4c   :  { %543 = vmatpush1.msra.mxu0 %v4810_v4  ;;  %483 = vmatprep.mubr.f32.mxu1 %v4710_v0  ;;  %v5046_v56 = vld [vmem:[#allocation7] sm:$0xff] }
  0x4d   :  { %544 = vmatprep.subr.mxu0 %v4822_v5  ;;  %637 = vmatprep.subr.mxu1 %v4789_v1  ;;  %v803_v44 = vsel %vm112_vm0, %v796_v41, %v801_v39  ;;  %v102_v60 = vld [vmem:[%s5908_s4] sm:$0x3]  ;;  %s4711_s4 = smov 32  }
  0x4e   :  { %4232 = vmatmul.mubr.msk.f32.vlgmr.msra.gmra.mxu1 %vm125_vm1, %v415_v25  ;;  %545 = vmatpush1.msra.mxu0 %v4833_v6  ;;  %v118_v62 = vrot.slane %v102_v60, %v117_v59  ;;  %v122_v63 = vrot.slane %v102_v60, %v121_v61 }
  0x4f   :  { %638 = vmatpush1.msra.mxu1 %v4794_v2  ;;  %546 = vmatprep.subr.mxu0 %v4843_v9 }
  0x50   :  { %639 = vmatprep.subr.mxu1 %v4799_v3  ;;  %547 = vmatpush1.msra.mxu0 %v4852_v12 }
  0x51   :  { %580 = vmatprep.mubr.f32.mxu0 %v4710_v0  ;;  %640 = vmatpush1.msra.mxu1 %v4810_v4 }
  0x52   :  { %4236 = vmatmul.mubr.msk.f32.vlgmr.msra.gmra.mxu0 %vm125_vm1, %v512_v29  ;;  %641 = vmatprep.subr.mxu1 %v4822_v5 }
  0x53   :  { %734 = vmatprep.subr.mxu0 %v4789_v1  ;;  %642 = vmatpush1.msra.mxu1 %v4833_v6 }
  0x54   :  { %735 = vmatpush1.msra.mxu0 %v4794_v2  ;;  %643 = vmatprep.subr.mxu1 %v4843_v9 }
  0x55   :  { %736 = vmatprep.subr.mxu0 %v4799_v3  ;;  %644 = vmatpush1.msra.mxu1 %v4852_v12 }
  0x56   :  { %737 = vmatpush1.msra.mxu0 %v4810_v4  ;;  %677 = vmatprep.mubr.f32.mxu1 %v4710_v0 }
  0x57   :  { %738 = vmatprep.subr.mxu0 %v4822_v5  ;;  %831 = vmatprep.subr.mxu1 %v4789_v1 }
  0x58   :  { %4240 = vmatmul.mubr.msk.f32.vlgmr.msra.gmra.mxu1 %vm125_vm1, %v609_v33  ;;  %739 = vmatpush1.msra.mxu0 %v4833_v6 }
  0x59   :  { %832 = vmatpush1.msra.mxu1 %v4794_v2  ;;  %740 = vmatprep.subr.mxu0 %v4843_v9 }
  0x5a   :  { %833 = vmatprep.subr.mxu1 %v4799_v3  ;;  %741 = vmatpush1.msra.mxu0 %v4852_v12 }
  0x5b   :  { %774 = vmatprep.mubr.f32.mxu0 %v4710_v0  ;;  %834 = vmatpush1.msra.mxu1 %v4810_v4 }
  0x5c   :  { %4244 = vmatmul.mubr.msk.f32.vlgmr.msra.gmra.mxu0 %vm125_vm1, %v706_v37  ;;  %835 = vmatprep.subr.mxu1 %v4822_v5 }
  0x5d   :  { %911 = vmatprep.subr.mxu0 %v4984_v38  ;;  %836 = vmatpush1.msra.mxu1 %v4833_v6 }
  0x5e   :  { %912 = vmatpush1.msra.mxu0 %v4988_v40  ;;  %837 = vmatprep.subr.mxu1 %v4843_v9 }
  0x5f   :  { %913 = vmatprep.subr.mxu0 %v4992_v42  ;;  %838 = vmatpush1.msra.mxu1 %v4852_v12 }
  0x60   :  { %871 = vmatprep.mubr.f32.mxu1 %v4710_v0  ;;  %914 = vmatpush1.msra.mxu0 %v4998_v43 }
  0x61   :  { %4248 = vmatmul.mubr.msk.f32.vlgmr.msra.gmra.mxu1 %vm125_vm1, %v803_v44  ;;  %915 = vmatprep.subr.mxu0 %v5003_v45 }
  0x62   :  { %959 = vmatprep.mubr.f32.mxu0 %v4710_v0  ;;  %916 = vmatpush1.msra.mxu0 %v5007_v46 }
  0x63   :  { %1067 = vmatprep.subr.mxu1 %v4984_v38  ;;  %917 = vmatprep.subr.mxu0 %v5011_v47 }
  0x64   :  { %1068 = vmatpush1.msra.mxu1 %v4988_v40  ;;  %918 = vmatpush1.msra.mxu0 %v5014_v48 }
  0x65   :  { %1069 = vmatprep.subr.mxu1 %v4992_v42  ;;  %919 = vmatprep.subr.mxu0 %v5018_v49 }
  0x66   :  { %1070 = vmatpush1.msra.mxu1 %v4998_v43  ;;  %920 = vmatpush1.msra.mxu0 %v5022_v50 }
  0x67   :  { %1071 = vmatprep.subr.mxu1 %v5003_v45  ;;  %921 = vmatprep.subr.mxu0 %v5026_v51 }
  0x68   :  { %1072 = vmatpush1.msra.mxu1 %v5007_v46  ;;  %922 = vmatpush1.msra.mxu0 %v5030_v52 }
  0x69   :  { %1073 = vmatprep.subr.mxu1 %v5011_v47  ;;  %923 = vmatprep.subr.mxu0 %v5034_v53 }
  0x6a   :  { %1074 = vmatpush1.msra.mxu1 %v5014_v48  ;;  %924 = vmatpush1.msra.mxu0 %v5038_v54 }
  0x6b   :  { %1075 = vmatprep.subr.mxu1 %v5018_v49  ;;  %925 = vmatprep.subr.mxu0 %v5042_v55 }
  0x6c   :  { %1076 = vmatpush1.msra.mxu1 %v5022_v50  ;;  %926 = vmatpush1.msra.mxu0 %v5046_v56 }
  0x6d   :  { %1077 = vmatprep.subr.mxu1 %v5026_v51  ;;  %960 = vmatmul.mubr.f32.vlgmr.msra.gmra.mxu0 %v4710_v0 }
  0x6e   :  { %1078 = vmatpush1.msra.mxu1 %v5030_v52  ;;  %1115 = vmatprep.mubr.f32.mxu1 %v4710_v0 }
  0x6f   :  { %1079 = vmatprep.subr.mxu1 %v5034_v53  ;;  %1223 = vmatprep.subr.mxu0 %v4984_v38 }
  0x70   :  { %1080 = vmatpush1.msra.mxu1 %v5038_v54  ;;  %1224 = vmatpush1.msra.mxu0 %v4988_v40 }
  0x71   :  { %1081 = vmatprep.subr.mxu1 %v5042_v55  ;;  %1225 = vmatprep.subr.mxu0 %v4992_v42 }
  0x72   :  { %1082 = vmatpush1.msra.mxu1 %v5046_v56  ;;  %1226 = vmatpush1.msra.mxu0 %v4998_v43 }
  0x73   :  { %1271 = vmatprep.mubr.f32.mxu0 %v4710_v0  ;;  %1227 = vmatprep.subr.mxu0 %v5003_v45 }
  0x74   :  { %1379 = vmatprep.subr.mxu1 %v4984_v38  ;;  %1228 = vmatpush1.msra.mxu0 %v5007_v46 }
  0x75   :  { %1229 = vmatprep.subr.mxu0 %v5011_v47 }
  0x76   :  { %1230 = vmatpush1.msra.mxu0 %v5014_v48 }
  0x77   :  { %1231 = vmatprep.subr.mxu0 %v5018_v49 }
  0x78   :  { %1232 = vmatpush1.msra.mxu0 %v5022_v50 }
  0x79   :  { %1233 = vmatprep.subr.mxu0 %v5026_v51 }
  0x7a   :  { %1234 = vmatpush1.msra.mxu0 %v5030_v52 }
  0x7b   :  { %1235 = vmatprep.subr.mxu0 %v5034_v53 }
  0x7c   :  { %1236 = vmatpush1.msra.mxu0 %v5038_v54 }
  0x7d   :  { %1237 = vmatprep.subr.mxu0 %v5042_v55 }
  0x7e   :  { %1238 = vmatpush1.msra.mxu0 %v5046_v56 }
  0x7f   :  { %1535 = vmatprep.subr.mxu0 %v4984_v38 }
 0x101   :  { %v195_v1 = vpop.f32.mrf.mxu0 }
 0x102   :  { %v196_v2 = vadd.f32 %v195_v1, %v118_v62 }
 0x103   :  { %v197_v3 = vpop.f32.mrf.mxu0  ;;  %v291_v4 = vpop.f32.mrf.mxu1 }
 0x104   :  { %v198_v5 = vadd.f32 %v197_v3, %v122_v63  ;;  %v292_v6 = vadd.f32 %v291_v4, %v118_v62 }
 0x105   :  { %v293_v7 = vpop.f32.mrf.mxu1 }
 0x106   :  { %v202_v8 = vcombine.low %v196_v2, %v198_v5  ;;  %v294_v9 = vadd.f32 %v293_v7, %v122_v63 }
 0x108   :  { %4221 = vst.sshfl [vmem:[#allocation4] sm:$0x33 pattern:$0x76325410] %v202_v8  ;;  %v298_v10 = vcombine.low %v292_v6, %v294_v9 }
 0x109   :  { %v388_v11 = vpop.f32.mrf.mxu0 }
 0x10a   :  { %4225 = vst.sshfl [vmem:[#allocation4 + $0x4] sm:$0x33 pattern:$0x76325410] %v298_v10  ;;  %v389_v12 = vadd.f32 %v388_v11, %v118_v62 }
 0x10b   :  { %v390_v13 = vpop.f32.mrf.mxu0 }
 0x10c   :  { %v391_v14 = vadd.f32 %v390_v13, %v122_v63 }
 0x10e   :  { %v395_v15 = vcombine.low %v389_v12, %v391_v14  ;;  %v485_v16 = vpop.f32.mrf.mxu1 }
 0x10f   :  { %v486_v17 = vadd.f32 %v485_v16, %v118_v62  ;;  %v966_v60 = vld [vmem:[#allocation4] sm:$0x3] }
 0x110   :  { %4229 = vst.sshfl [vmem:[#allocation4 + $0x8] sm:$0x33 pattern:$0x76325410] %v395_v15  ;;  %v487_v18 = vpop.f32.mrf.mxu1 }
 0x111   :  { %v488_v19 = vadd.f32 %v487_v18, %v122_v63 }
 0x112   :  { %v582_v20 = vpop.f32.mrf.mxu0 }
 0x113   :  { %v492_v21 = vcombine.low %v486_v17, %v488_v19  ;;  %v583_v22 = vadd.f32 %v582_v20, %v118_v62 }
 0x114   :  { %v584_v23 = vpop.f32.mrf.mxu0 }
 0x115   :  { %4233 = vst.sshfl [vmem:[#allocation4 + $0xc] sm:$0x33 pattern:$0x76325410] %v492_v21  ;;  %v585_v24 = vadd.f32 %v584_v23, %v122_v63 }
 0x117   :  { %v589_v25 = vcombine.low %v583_v22, %v585_v24 }
 0x118   :  { %v679_v26 = vpop.f32.mrf.mxu1 }
 0x119   :  { %4237 = vst.sshfl [vmem:[#allocation4 + $0x10] sm:$0x33 pattern:$0x76325410] %v589_v25  ;;  %v680_v27 = vadd.f32 %v679_v26, %v118_v62  ;;  %v4712_v25 = vmov 1983009808  }
 0x11a   :  { %v681_v28 = vpop.f32.mrf.mxu1  ;;  %v1020_v26 = vunpack.c.l.s4 %v4712_v25 }
 0x11b   :  { %v682_v29 = vadd.f32 %v681_v28, %v122_v63 }
 0x11c   :  { %v776_v30 = vpop.f32.mrf.mxu0 }
 0x11d   :  { %v686_v31 = vcombine.low %v680_v27, %v682_v29  ;;  %v777_v32 = vadd.f32 %v776_v30, %v118_v62  ;;  %v1021_v27 = vunpack.c.0.s8 %v1020_v26 }
 0x11e   :  { %v778_v33 = vpop.f32.mrf.mxu0 }
 0x11f   :  { %4241 = vst.sshfl [vmem:[#allocation4 + $0x14] sm:$0x33 pattern:$0x76325410] %v686_v31  ;;  %v779_v34 = vadd.f32 %v778_v33, %v122_v63  ;;  %v5105_v28 = vsub.s32 %v1021_v27, %v5081_v58 }
 0x121   :  { %v783_v35 = vcombine.low %v777_v32, %v779_v34  ;;  %v873_v36 = vpop.f32.mrf.mxu1 }
 0x122   :  { %v874_v37 = vadd.f32 %v873_v36, %v118_v62 }
 0x123   :  { %4245 = vst.sshfl [vmem:[#allocation4 + $0x18] sm:$0x33 pattern:$0x76325410] %v783_v35  ;;  %v875_v39 = vpop.f32.mrf.mxu1 }
 0x124   :  { %v876_v41 = vadd.f32 %v875_v39, %v122_v63 }
 0x126   :  { %v880_v44 = vcombine.low %v874_v37, %v876_v41  ;;  %v1122_v41 = vld [vmem:[#allocation4 + $0x4] sm:$0x3] }
 0x128   :  { %4249 = vst.sshfl [vmem:[#allocation4 + $0x1c] sm:$0x33 pattern:$0x76325410] %v880_v44 }
 0x12d   :  { %v961_v57 = vpop.f32.mrf.mxu0 }
 0x12e   :  { %v967_v1 = vadd.f32 %v966_v60, %v961_v57  ;;  %v1124_v60 = vld [vmem:[#allocation4 + $0x1a] sm:$0x3] }
 0x12f   :  { %v968_v2 = vld [vmem:[#allocation4 + $0x1e] sm:$0x3]  ;;  %v963_v3 = vpop.f32.mrf.mxu0 }
 0x130   :  { %4326 = vtanh.f32 %v967_v1  ;;  %v969_v4 = vadd.f32 %v968_v2, %v963_v3  ;;  %v4250_v62 = vmul.f32 -1.442695, %v967_v1 }
 0x132   :  { %4328 = vtanh.f32 %v969_v4  ;;  %v4251_v63 = vmul.f32 -1.442695, %v969_v4 }
 0x133   :  { %4330 = vpow2.f32 %v4250_v62 }
 0x134   :  { %4332 = vpow2.f32 %v4251_v63 }
 0x13d   :  { %v4327_v5 = vpop.eup %4326 }
 0x13e   :  { %979 = vrot.lane.b32.xlu0 %v4327_v5, %s4711_s4 }
 0x13f   :  { %v4329_v6 = vpop.eup %4328 }
 0x140   :  { %v4331_v7 = vpop.eup %4330 }
 0x141   :  { %v973_v8 = vadd.f32 1.0, %v4331_v7  ;;  %v4333_v9 = vpop.eup %4332 }
 0x142   :  { %1003 = vrot.lane.b32.xlu0 %v4329_v6, %s4711_s4  ;;  %v997_v10 = vadd.f32 1.0, %v4333_v9 }
 0x143   :  { %4334 = vrcp.f32 %v973_v8 }
 0x144   :  { %4336 = vrcp.f32 %v997_v10 }
 0x150   :  { %v4335_v11 = vpop.eup %4334 }
 0x151   :  { %v4337_v14 = vpop.eup %4336  ;;  %v977_v17 = vmul.f32 0.0, %v4335_v11 }
 0x152   :  { %v1001_v20 = vmul.f32 0.0, %v4337_v14 }
 0x1b0   :  { %v980_v12 = vpop.permute.xlu0 %979 }
 0x1b1   :  { %v982_v13 = vmul.f32 %v4335_v11, %v980_v12 }
 0x1b3   :  { %984 = vrot.lane.b32.xlu1 %v982_v13, %s4711_s4 }
 0x1b4   :  { %v1004_v15 = vpop.permute.xlu0 %1003 }
 0x1b5   :  { %v1006_v16 = vmul.f32 %v4337_v14, %v1004_v15 }
 0x1b7   :  { %1008 = vrot.lane.b32.xlu1 %v1006_v16, %s4711_s4 }
 0x225   :  { %v985_v18 = vpop.permute.xlu1 %984 }
 0x226   :  { %v5096_v19 = vadd.f32 %v985_v18, %v977_v17 }
 0x228   :  { %4338 = vtanh.f32 %v5096_v19 }
 0x229   :  { %v1009_v21 = vpop.permute.xlu1 %1008 }
 0x22a   :  { %v5099_v22 = vadd.f32 %v1009_v21, %v1001_v20 }
 0x22c   :  { %4340 = vtanh.f32 %v5099_v22 }
 0x235   :  { %v4339_v23 = vpop.eup %4338 }
 0x236   :  { %990 = vrot.lane.b32.xlu0 %v4339_v23, %s4711_s4 }
 0x239   :  { %v4341_v24 = vpop.eup %4340 }
 0x23a   :  { %1014 = vrot.lane.b32.xlu1 %v4341_v24, %s4711_s4 }
 0x2a8   :  { %v991_v29 = vpop.permute.xlu0 %990 }
 0x2a9   :  { %v993_v30 = vmul.f32 %v4335_v11, %v991_v29 }
 0x2ab   :  { %v1025_v31 = vrot.slane %v993_v30, %v5105_v28 }
 0x2ac   :  { %v1015_v32 = vpop.permute.xlu1 %1014 }
 0x2ad   :  { %v1017_v33 = vmul.f32 %v4337_v14, %v1015_v32  ;;  %1026 = vrot.lane.b32.xlu0 %v1025_v31, %s4713_s6 }
 0x2af   :  { %v5110_v34 = vrot.slane %v1017_v33, %v5105_v28  ;;  %v1278_v33 = vld [vmem:[#allocation4 + $0x8] sm:$0x3] }
 0x2b1   :  { %1044 = vrot.lane.b32.xlu1 %v5110_v34, %s4714_s14 }
 0x31f   :  { %v1027_v35 = vpop.permute.xlu0 %1026 }
 0x320   :  { %1030 = vst.msk [vmem:[#allocation2] sm:$0x3] %vm1029_vm2, %v1027_v35 }
 0x323   :  { %v1045_v36 = vpop.permute.xlu1 %1044 }
 0x324   :  { %v1047_v37 = vsel %vm125_vm1, %v1027_v35, %v1045_v36 }
 0x325   :  { %4252 = vmatmul.mubr.msk.f32.vlgmr.msra.gmra.mxu1 %vm891_vm3, %v1047_v37  ;;  %v1280_v37 = vld [vmem:[#allocation4 + $0x16] sm:$0x3] }
 0x326   :  { %1380 = vmatpush1.msra.mxu1 %v4988_v40  ;;  %1427 = vmatprep.mubr.f32.mxu1 %v4710_v0 }
 0x327   :  { %1381 = vmatprep.subr.mxu1 %v4992_v42 }
 0x328   :  { %1382 = vmatpush1.msra.mxu1 %v4998_v43 }
 0x329   :  { %1383 = vmatprep.subr.mxu1 %v5003_v45 }
 0x32a   :  { %1384 = vmatpush1.msra.mxu1 %v5007_v46 }
 0x32b   :  { %1385 = vmatprep.subr.mxu1 %v5011_v47 }
 0x32c   :  { %1386 = vmatpush1.msra.mxu1 %v5014_v48 }
 0x32d   :  { %1387 = vmatprep.subr.mxu1 %v5018_v49 }
 0x32e   :  { %1388 = vmatpush1.msra.mxu1 %v5022_v50 }
 0x32f   :  { %1389 = vmatprep.subr.mxu1 %v5026_v51 }
 0x330   :  { %1390 = vmatpush1.msra.mxu1 %v5030_v52 }
 0x331   :  { %1391 = vmatprep.subr.mxu1 %v5034_v53 }
 0x332   :  { %1392 = vmatpush1.msra.mxu1 %v5038_v54 }
 0x333   :  { %1393 = vmatprep.subr.mxu1 %v5042_v55 }
 0x334   :  { %1394 = vmatpush1.msra.mxu1 %v5046_v56 }
 0x335   :  { %1691 = vmatprep.subr.mxu1 %v4984_v38 }
 0x3e5   :  { %v1117_v39 = vpop.f32.mrf.mxu1 }
 0x3e6   :  { %v1123_v44 = vadd.f32 %v1122_v41, %v1117_v39 }
 0x3e7   :  { %v1119_v57 = vpop.f32.mrf.mxu1 }
 0x3e8   :  { %4342 = vtanh.f32 %v1123_v44  ;;  %v1125_v1 = vadd.f32 %v1124_v60, %v1119_v57  ;;  %v4253_v4 = vmul.f32 -1.442695, %v1123_v44 }
 0x3ea   :  { %4344 = vtanh.f32 %v1125_v1  ;;  %v4254_v5 = vmul.f32 -1.442695, %v1125_v1 }
 0x3eb   :  { %4346 = vpow2.f32 %v4253_v4 }
 0x3ec   :  { %4348 = vpow2.f32 %v4254_v5 }
 0x3f5   :  { %v4343_v2 = vpop.eup %4342 }
 0x3f6   :  { %1135 = vrot.lane.b32.xlu0 %v4343_v2, %s4711_s4 }
 0x3f7   :  { %v4345_v3 = vpop.eup %4344 }
 0x3f8   :  { %1159 = vrot.lane.b32.xlu1 %v4345_v3, %s4711_s4  ;;  %v4347_v6 = vpop.eup %4346 }
 0x3f9   :  { %v4349_v62 = vpop.eup %4348  ;;  %v1129_v63 = vadd.f32 1.0, %v4347_v6 }
 0x3fa   :  { %v1153_v7 = vadd.f32 1.0, %v4349_v62 }
 0x3fb   :  { %4350 = vrcp.f32 %v1129_v63 }
 0x3fc   :  { %4352 = vrcp.f32 %v1153_v7 }
 0x408   :  { %v4351_v8 = vpop.eup %4350 }
 0x409   :  { %v4353_v11 = vpop.eup %4352  ;;  %v1133_v14 = vmul.f32 %v4351_v8, %v5096_v19 }
 0x40a   :  { %v1157_v17 = vmul.f32 %v4353_v11, %v5099_v22 }
 0x468   :  { %v1136_v9 = vpop.permute.xlu0 %1135 }
 0x469   :  { %v1138_v10 = vmul.f32 %v4351_v8, %v1136_v9 }
 0x46a   :  { %v1160_v12 = vpop.permute.xlu1 %1159 }
 0x46b   :  { %1140 = vrot.lane.b32.xlu0 %v1138_v10, %s4711_s4  ;;  %v1162_v13 = vmul.f32 %v4353_v11, %v1160_v12 }
 0x46d   :  { %1164 = vrot.lane.b32.xlu1 %v1162_v13, %s4711_s4 }
 0x4dd   :  { %v1141_v15 = vpop.permute.xlu0 %1140 }
 0x4de   :  { %v5139_v16 = vadd.f32 %v1141_v15, %v1133_v14 }
 0x4df   :  { %v1165_v18 = vpop.permute.xlu1 %1164 }
 0x4e0   :  { %4354 = vtanh.f32 %v5139_v16  ;;  %v5143_v20 = vadd.f32 %v1165_v18, %v1157_v17 }
 0x4e2   :  { %4356 = vtanh.f32 %v5143_v20 }
 0x4ed   :  { %v4355_v21 = vpop.eup %4354 }
 0x4ee   :  { %1146 = vrot.lane.b32.xlu0 %v4355_v21, %s4711_s4 }
 0x4ef   :  { %v4357_v23 = vpop.eup %4356 }
 0x4f0   :  { %1170 = vrot.lane.b32.xlu1 %v4357_v23, %s4711_s4 }
 0x560   :  { %v1147_v24 = vpop.permute.xlu0 %1146 }
 0x561   :  { %v1149_v19 = vmul.f32 %v4351_v8, %v1147_v24 }
 0x562   :  { %v1171_v26 = vpop.permute.xlu1 %1170 }
 0x563   :  { %v1181_v25 = vrot.slane %v1149_v19, %v5105_v28  ;;  %v1173_v27 = vmul.f32 %v4353_v11, %v1171_v26 }
 0x565   :  { %1182 = vrot.lane.b32.xlu0 %v1181_v25, %s4713_s6  ;;  %v5151_v22 = vrot.slane %v1173_v27, %v5105_v28 }
 0x567   :  { %1200 = vrot.lane.b32.xlu1 %v5151_v22, %s4714_s14 }
 0x5d7   :  { %v1183_v29 = vpop.permute.xlu0 %1182 }
 0x5d8   :  { %1186 = vst.msk [vmem:[#allocation2 + $0x2] sm:$0x3] %vm1029_vm2, %v1183_v29 }
 0x5d9   :  { %v1201_v30 = vpop.permute.xlu1 %1200 }
 0x5da   :  { %v1203_v31 = vsel %vm125_vm1, %v1183_v29, %v1201_v30  ;;  %v1434_v29 = vld [vmem:[#allocation4 + $0xc] sm:$0x3] }
 0x5db   :  { %4255 = vmatmul.mubr.msk.f32.vlgmr.msra.gmra.mxu0 %vm891_vm3, %v1203_v31 }
 0x5dc   :  { %1536 = vmatpush1.msra.mxu0 %v4988_v40  ;;  %1583 = vmatprep.mubr.f32.mxu0 %v4710_v0 }
 0x5dd   :  { %1537 = vmatprep.subr.mxu0 %v4992_v42 }
 0x5de   :  { %1538 = vmatpush1.msra.mxu0 %v4998_v43 }
 0x5df   :  { %1539 = vmatprep.subr.mxu0 %v5003_v45 }
 0x5e0   :  { %1540 = vmatpush1.msra.mxu0 %v5007_v46 }
 0x5e1   :  { %1541 = vmatprep.subr.mxu0 %v5011_v47 }
 0x5e2   :  { %1542 = vmatpush1.msra.mxu0 %v5014_v48 }
 0x5e3   :  { %1543 = vmatprep.subr.mxu0 %v5018_v49 }
 0x5e4   :  { %1544 = vmatpush1.msra.mxu0 %v5022_v50 }
 0x5e5   :  { %1545 = vmatprep.subr.mxu0 %v5026_v51 }
 0x5e6   :  { %1546 = vmatpush1.msra.mxu0 %v5030_v52 }
 0x5e7   :  { %1547 = vmatprep.subr.mxu0 %v5034_v53 }
 0x5e8   :  { %1548 = vmatpush1.msra.mxu0 %v5038_v54 }
 0x5e9   :  { %1549 = vmatprep.subr.mxu0 %v5042_v55 }
 0x5ea   :  { %1550 = vmatpush1.msra.mxu0 %v5046_v56 }
 0x5eb   :  { %1847 = vmatprep.subr.mxu0 %v4984_v38 }
 0x69b   :  { %v1273_v32 = vpop.f32.mrf.mxu0 }
 0x69c   :  { %v1279_v35 = vadd.f32 %v1278_v33, %v1273_v32  ;;  %v1436_v32 = vld [vmem:[#allocation4 + $0x12] sm:$0x3] }
 0x69d   :  { %v1275_v36 = vpop.f32.mrf.mxu0 }
 0x69e   :  { %4358 = vtanh.f32 %v1279_v35  ;;  %v1281_v39 = vadd.f32 %v1280_v37, %v1275_v36  ;;  %v4256_v57 = vmul.f32 -1.442695, %v1279_v35 }
 0x6a0   :  { %4360 = vtanh.f32 %v1281_v39  ;;  %v4257_v60 = vmul.f32 -1.442695, %v1281_v39 }
 0x6a1   :  { %4362 = vpow2.f32 %v4256_v57 }
 0x6a2   :  { %4364 = vpow2.f32 %v4257_v60 }
 0x6ab   :  { %v4359_v41 = vpop.eup %4358 }
 0x6ac   :  { %1291 = vrot.lane.b32.xlu0 %v4359_v41, %s4711_s4 }
 0x6ad   :  { %v4361_v44 = vpop.eup %4360 }
 0x6ae   :  { %1315 = vrot.lane.b32.xlu1 %v4361_v44, %s4711_s4  ;;  %v4363_v1 = vpop.eup %4362 }
 0x6af   :  { %v4365_v2 = vpop.eup %4364  ;;  %v1285_v3 = vadd.f32 1.0, %v4363_v1 }
 0x6b0   :  { %v1309_v4 = vadd.f32 1.0, %v4365_v2 }
 0x6b1   :  { %4366 = vrcp.f32 %v1285_v3 }
 0x6b2   :  { %4368 = vrcp.f32 %v1309_v4 }
 0x6be   :  { %v4367_v5 = vpop.eup %4366 }
 0x6bf   :  { %v4369_v63 = vpop.eup %4368  ;;  %v1289_v9 = vmul.f32 %v4367_v5, %v5139_v16 }
 0x6c0   :  { %v1313_v12 = vmul.f32 %v4369_v63, %v5143_v20 }
 0x71e   :  { %v1292_v6 = vpop.permute.xlu0 %1291 }
 0x71f   :  { %v1294_v62 = vmul.f32 %v4367_v5, %v1292_v6 }
 0x720   :  { %v1316_v7 = vpop.permute.xlu1 %1315 }
 0x721   :  { %1296 = vrot.lane.b32.xlu0 %v1294_v62, %s4711_s4  ;;  %v1318_v8 = vmul.f32 %v4369_v63, %v1316_v7 }
 0x723   :  { %1320 = vrot.lane.b32.xlu1 %v1318_v8, %s4711_s4 }
 0x793   :  { %v1297_v10 = vpop.permute.xlu0 %1296 }
 0x794   :  { %v5180_v11 = vadd.f32 %v1297_v10, %v1289_v9 }
 0x795   :  { %v1321_v13 = vpop.permute.xlu1 %1320 }
 0x796   :  { %4370 = vtanh.f32 %v5180_v11  ;;  %v5184_v14 = vadd.f32 %v1321_v13, %v1313_v12 }
 0x798   :  { %4372 = vtanh.f32 %v5184_v14 }
 0x7a3   :  { %v4371_v15 = vpop.eup %4370 }
 0x7a4   :  { %1302 = vrot.lane.b32.xlu0 %v4371_v15, %s4711_s4 }
 0x7a5   :  { %v4373_v17 = vpop.eup %4372 }
 0x7a6   :  { %1326 = vrot.lane.b32.xlu1 %v4373_v17, %s4711_s4 }
 0x816   :  { %v1303_v18 = vpop.permute.xlu0 %1302 }
 0x817   :  { %v1305_v16 = vmul.f32 %v4367_v5, %v1303_v18 }
 0x818   :  { %v1327_v23 = vpop.permute.xlu1 %1326 }
 0x819   :  { %v1337_v21 = vrot.slane %v1305_v16, %v5105_v28  ;;  %v1329_v24 = vmul.f32 %v4369_v63, %v1327_v23 }
 0x81b   :  { %1338 = vrot.lane.b32.xlu0 %v1337_v21, %s4713_s6  ;;  %v5192_v20 = vrot.slane %v1329_v24, %v5105_v28 }
 0x81d   :  { %1356 = vrot.lane.b32.xlu1 %v5192_v20, %s4714_s14 }
 0x88d   :  { %v1339_v19 = vpop.permute.xlu0 %1338 }
 0x88e   :  { %1342 = vst.msk [vmem:[#allocation2 + $0x4] sm:$0x3] %vm1029_vm2, %v1339_v19 }
 0x88f   :  { %v1357_v25 = vpop.permute.xlu1 %1356 }
 0x890   :  { %v1359_v26 = vsel %vm125_vm1, %v1339_v19, %v1357_v25  ;;  %v1590_v19 = vld [vmem:[#allocation4 + $0x10] sm:$0x3] }
 0x891   :  { %4258 = vmatmul.mubr.msk.f32.vlgmr.msra.gmra.mxu1 %vm891_vm3, %v1359_v26 }
 0x892   :  { %1692 = vmatpush1.msra.mxu1 %v4988_v40  ;;  %1739 = vmatprep.mubr.f32.mxu1 %v4710_v0 }
 0x893   :  { %1693 = vmatprep.subr.mxu1 %v4992_v42 }
 0x894   :  { %1694 = vmatpush1.msra.mxu1 %v4998_v43 }
 0x895   :  { %1695 = vmatprep.subr.mxu1 %v5003_v45 }
 0x896   :  { %1696 = vmatpush1.msra.mxu1 %v5007_v46 }
 0x897   :  { %1697 = vmatprep.subr.mxu1 %v5011_v47 }
 0x898   :  { %1698 = vmatpush1.msra.mxu1 %v5014_v48 }
 0x899   :  { %1699 = vmatprep.subr.mxu1 %v5018_v49 }
 0x89a   :  { %1700 = vmatpush1.msra.mxu1 %v5022_v50 }
 0x89b   :  { %1701 = vmatprep.subr.mxu1 %v5026_v51 }
 0x89c   :  { %1702 = vmatpush1.msra.mxu1 %v5030_v52 }
 0x89d   :  { %1703 = vmatprep.subr.mxu1 %v5034_v53 }
 0x89e   :  { %1704 = vmatpush1.msra.mxu1 %v5038_v54 }
 0x89f   :  { %1705 = vmatprep.subr.mxu1 %v5042_v55 }
 0x8a0   :  { %1706 = vmatpush1.msra.mxu1 %v5046_v56 }
 0x8a1   :  { %2003 = vmatprep.subr.mxu1 %v4984_v38 }
 0x951   :  { %v1429_v27 = vpop.f32.mrf.mxu1 }
 0x952   :  { %v1435_v30 = vadd.f32 %v1434_v29, %v1429_v27  ;;  %v1592_v27 = vld [vmem:[#allocation4 + $0xe] sm:$0x3] }
 0x953   :  { %v1431_v31 = vpop.f32.mrf.mxu1 }
 0x954   :  { %4374 = vtanh.f32 %v1435_v30  ;;  %v1437_v33 = vadd.f32 %v1436_v32, %v1431_v31  ;;  %v4259_v37 = vmul.f32 -1.442695, %v1435_v30 }
 0x956   :  { %4376 = vtanh.f32 %v1437_v33  ;;  %v4260_v39 = vmul.f32 -1.442695, %v1437_v33 }
 0x957   :  { %4378 = vpow2.f32 %v4259_v37 }
 0x958   :  { %4380 = vpow2.f32 %v4260_v39 }
 0x961   :  { %v4375_v35 = vpop.eup %4374 }
 0x962   :  { %1447 = vrot.lane.b32.xlu0 %v4375_v35, %s4711_s4 }
 0x963   :  { %v4377_v36 = vpop.eup %4376 }
 0x964   :  { %1471 = vrot.lane.b32.xlu1 %v4377_v36, %s4711_s4  ;;  %v4379_v41 = vpop.eup %4378 }
 0x965   :  { %v4381_v38 = vpop.eup %4380  ;;  %v1441_v44 = vadd.f32 1.0, %v4379_v41 }
 0x966   :  { %v1465_v57 = vadd.f32 1.0, %v4381_v38 }
 0x967   :  { %4382 = vrcp.f32 %v1441_v44 }
 0x968   :  { %4384 = vrcp.f32 %v1465_v57 }
 0x974   :  { %v4383_v60 = vpop.eup %4382 }
 0x975   :  { %v4385_v3 = vpop.eup %4384  ;;  %v1445_v6 = vmul.f32 %v4383_v60, %v5180_v11 }
 0x976   :  { %v1469_v7 = vmul.f32 %v4385_v3, %v5184_v14 }
 0x9d4   :  { %v1448_v1 = vpop.permute.xlu0 %1447 }
 0x9d5   :  { %v1450_v2 = vmul.f32 %v4383_v60, %v1448_v1 }
 0x9d6   :  { %v1472_v4 = vpop.permute.xlu1 %1471 }
 0x9d7   :  { %1452 = vrot.lane.b32.xlu0 %v1450_v2, %s4711_s4  ;;  %v1474_v5 = vmul.f32 %v4385_v3, %v1472_v4 }
 0x9d9   :  { %1476 = vrot.lane.b32.xlu1 %v1474_v5, %s4711_s4 }
 0xa49   :  { %v1453_v62 = vpop.permute.xlu0 %1452 }
 0xa4a   :  { %v5221_v63 = vadd.f32 %v1453_v62, %v1445_v6 }
 0xa4b   :  { %v1477_v8 = vpop.permute.xlu1 %1476 }
 0xa4c   :  { %4386 = vtanh.f32 %v5221_v63  ;;  %v5225_v9 = vadd.f32 %v1477_v8, %v1469_v7 }
 0xa4e   :  { %4388 = vtanh.f32 %v5225_v9 }
 0xa59   :  { %v4387_v10 = vpop.eup %4386 }
 0xa5a   :  { %1458 = vrot.lane.b32.xlu0 %v4387_v10, %s4711_s4 }
 0xa5b   :  { %v4389_v12 = vpop.eup %4388 }
 0xa5c   :  { %1482 = vrot.lane.b32.xlu1 %v4389_v12, %s4711_s4 }
 0xacc   :  { %v1459_v13 = vpop.permute.xlu0 %1458 }
 0xacd   :  { %v1461_v11 = vmul.f32 %v4383_v60, %v1459_v13 }
 0xace   :  { %v1483_v17 = vpop.permute.xlu1 %1482 }
 0xacf   :  { %v1493_v15 = vrot.slane %v1461_v11, %v5105_v28  ;;  %v1485_v18 = vmul.f32 %v4385_v3, %v1483_v17 }
 0xad1   :  { %1494 = vrot.lane.b32.xlu0 %v1493_v15, %s4713_s6  ;;  %v5233_v14 = vrot.slane %v1485_v18, %v5105_v28 }
 0xad3   :  { %1512 = vrot.lane.b32.xlu1 %v5233_v14, %s4714_s14 }
 0xb43   :  { %v1495_v16 = vpop.permute.xlu0 %1494 }
 0xb44   :  { %1498 = vst.msk [vmem:[#allocation2 + $0x6] sm:$0x3] %vm1029_vm2, %v1495_v16 }
 0xb45   :  { %v1513_v21 = vpop.permute.xlu1 %1512 }
 0xb46   :  { %v1515_v23 = vsel %vm125_vm1, %v1495_v16, %v1513_v21 }
 0xb47   :  { %4261 = vmatmul.mubr.msk.f32.vlgmr.msra.gmra.mxu0 %vm891_vm3, %v1515_v23 }
 0xb48   :  { %1848 = vmatpush1.msra.mxu0 %v4988_v40  ;;  %1895 = vmatprep.mubr.f32.mxu0 %v4710_v0 }
 0xb49   :  { %1849 = vmatprep.subr.mxu0 %v4992_v42 }
 0xb4a   :  { %1850 = vmatpush1.msra.mxu0 %v4998_v43 }
 0xb4b   :  { %1851 = vmatprep.subr.mxu0 %v5003_v45 }
 0xb4c   :  { %1852 = vmatpush1.msra.mxu0 %v5007_v46 }
 0xb4d   :  { %1853 = vmatprep.subr.mxu0 %v5011_v47 }
 0xb4e   :  { %1854 = vmatpush1.msra.mxu0 %v5014_v48 }
 0xb4f   :  { %1855 = vmatprep.subr.mxu0 %v5018_v49 }
 0xb50   :  { %1856 = vmatpush1.msra.mxu0 %v5022_v50 }
 0xb51   :  { %1857 = vmatprep.subr.mxu0 %v5026_v51 }
 0xb52   :  { %1858 = vmatpush1.msra.mxu0 %v5030_v52 }
 0xb53   :  { %1859 = vmatprep.subr.mxu0 %v5034_v53 }
 0xb54   :  { %1860 = vmatpush1.msra.mxu0 %v5038_v54 }
 0xb55   :  { %1861 = vmatprep.subr.mxu0 %v5042_v55 }
 0xb56   :  { %1862 = vmatpush1.msra.mxu0 %v5046_v56 }
 0xc07   :  { %v1585_v24 = vpop.f32.mrf.mxu0 }
 0xc08   :  { %v1591_v25 = vadd.f32 %v1590_v19, %v1585_v24 }
 0xc09   :  { %v1587_v26 = vpop.f32.mrf.mxu0 }
 0xc0a   :  { %4390 = vtanh.f32 %v1591_v25  ;;  %v1593_v29 = vadd.f32 %v1592_v27, %v1587_v26  ;;  %v4262_v32 = vmul.f32 -1.442695, %v1591_v25 }
 0xc0c   :  { %4392 = vtanh.f32 %v1593_v29  ;;  %v4263_v33 = vmul.f32 -1.442695, %v1593_v29 }
 0xc0d   :  { %4394 = vpow2.f32 %v4262_v32 }
 0xc0e   :  { %4396 = vpow2.f32 %v4263_v33 }
 0xc17   :  { %v4391_v30 = vpop.eup %4390 }
 0xc18   :  { %1603 = vrot.lane.b32.xlu0 %v4391_v30, %s4711_s4 }
 0xc19   :  { %v4393_v31 = vpop.eup %4392 }
 0xc1a   :  { %1627 = vrot.lane.b32.xlu1 %v4393_v31, %s4711_s4  ;;  %v4395_v35 = vpop.eup %4394 }
 0xc1b   :  { %v4397_v36 = vpop.eup %4396  ;;  %v1597_v37 = vadd.f32 1.0, %v4395_v35 }
 0xc1c   :  { %v1621_v39 = vadd.f32 1.0, %v4397_v36 }
 0xc1d   :  { %4398 = vrcp.f32 %v1597_v37 }
 0xc1e   :  { %4400 = vrcp.f32 %v1621_v39 }
 0xc2a   :  { %v4399_v41 = vpop.eup %4398 }
 0xc2b   :  { %v4401_v57 = vpop.eup %4400  ;;  %v1601_v2 = vmul.f32 %v4399_v41, %v5221_v63 }
 0xc2c   :  { %v1625_v5 = vmul.f32 %v4401_v57, %v5225_v9 }
 0xc8a   :  { %v1604_v38 = vpop.permute.xlu0 %1603 }
 0xc8b   :  { %v1606_v44 = vmul.f32 %v4399_v41, %v1604_v38 }
 0xc8c   :  { %v1628_v60 = vpop.permute.xlu1 %1627 }
 0xc8d   :  { %1608 = vrot.lane.b32.xlu0 %v1606_v44, %s4711_s4  ;;  %v1630_v1 = vmul.f32 %v4401_v57, %v1628_v60 }
 0xc8f   :  { %1632 = vrot.lane.b32.xlu1 %v1630_v1, %s4711_s4 }
 0xcff   :  { %v1609_v3 = vpop.permute.xlu0 %1608 }
 0xd00   :  { %v5261_v4 = vadd.f32 %v1609_v3, %v1601_v2  ;;  %v1902_v2 = vld [vmem:[#allocation4 + $0x18] sm:$0x3] }
 0xd01   :  { %v1633_v6 = vpop.permute.xlu1 %1632 }
 0xd02   :  { %4402 = vtanh.f32 %v5261_v4  ;;  %v5265_v62 = vadd.f32 %v1633_v6, %v1625_v5  ;;  %v1904_v5 = vld [vmem:[#allocation4 + $0x6] sm:$0x3] }
 0xd04   :  { %4404 = vtanh.f32 %v5265_v62 }
 0xd0f   :  { %v4403_v7 = vpop.eup %4402 }
 0xd10   :  { %1614 = vrot.lane.b32.xlu0 %v4403_v7, %s4711_s4 }
 0xd11   :  { %v4405_v8 = vpop.eup %4404 }
 0xd12   :  { %1638 = vrot.lane.b32.xlu1 %v4405_v8, %s4711_s4 }
 0xd82   :  { %v1615_v10 = vpop.permute.xlu0 %1614 }
 0xd83   :  { %v1617_v63 = vmul.f32 %v4399_v41, %v1615_v10 }
 0xd84   :  { %v1639_v13 = vpop.permute.xlu1 %1638 }
 0xd85   :  { %v1649_v12 = vrot.slane %v1617_v63, %v5105_v28  ;;  %v1641_v11 = vmul.f32 %v4401_v57, %v1639_v13 }
 0xd87   :  { %1650 = vrot.lane.b32.xlu0 %v1649_v12, %s4713_s6  ;;  %v5273_v9 = vrot.slane %v1641_v11, %v5105_v28 }
 0xd89   :  { %1668 = vrot.lane.b32.xlu1 %v5273_v9, %s4714_s14 }
 0xdf9   :  { %v1651_v15 = vpop.permute.xlu0 %1650 }
 0xdfa   :  { %1654 = vst.msk [vmem:[#allocation2 + $0x8] sm:$0x3] %vm1029_vm2, %v1651_v15 }
 0xdfb   :  { %v1669_v17 = vpop.permute.xlu1 %1668 }
 0xdfc   :  { %v1671_v18 = vsel %vm125_vm1, %v1651_v15, %v1669_v17 }
 0xdfd   :  { %4264 = vmatmul.mubr.msk.f32.vlgmr.msra.gmra.mxu1 %vm891_vm3, %v1671_v18 }
 0xdfe   :  { %2004 = vmatpush1.msra.mxu1 %v4988_v40  ;;  %2051 = vmatprep.mubr.f32.mxu1 %v4710_v0 }
 0xdff   :  { %2005 = vmatprep.subr.mxu1 %v4992_v42  ;;  %v1746_v42 = vld [vmem:[#allocation4 + $0x14] sm:$0x3] }
 0xe00   :  { %2006 = vmatpush1.msra.mxu1 %v4998_v43 }
 0xe01   :  { %2007 = vmatprep.subr.mxu1 %v5003_v45 }
 0xe02   :  { %2008 = vmatpush1.msra.mxu1 %v5007_v46  ;;  %v1748_v46 = vld [vmem:[#allocation4 + $0xa] sm:$0x3] }
 0xe03   :  { %2009 = vmatprep.subr.mxu1 %v5011_v47 }
 0xe04   :  { %2010 = vmatpush1.msra.mxu1 %v5014_v48 }
 0xe05   :  { %2011 = vmatprep.subr.mxu1 %v5018_v49 }
 0xe06   :  { %2012 = vmatpush1.msra.mxu1 %v5022_v50 }
 0xe07   :  { %2013 = vmatprep.subr.mxu1 %v5026_v51 }
 0xe08   :  { %2014 = vmatpush1.msra.mxu1 %v5030_v52 }
 0xe09   :  { %2015 = vmatprep.subr.mxu1 %v5034_v53 }
 0xe0a   :  { %2016 = vmatpush1.msra.mxu1 %v5038_v54 }
 0xe0b   :  { %2017 = vmatprep.subr.mxu1 %v5042_v55 }
 0xe0c   :  { %2018 = vmatpush1.msra.mxu1 %v5046_v56 }
 0xebd   :  { %v1741_v40 = vpop.f32.mrf.mxu1 }
 0xebe   :  { %v1747_v43 = vadd.f32 %v1746_v42, %v1741_v40 }
 0xebf   :  { %v1743_v45 = vpop.f32.mrf.mxu1 }
 0xec0   :  { %4406 = vtanh.f32 %v1747_v43  ;;  %v1749_v47 = vadd.f32 %v1748_v46, %v1743_v45  ;;  %v4265_v50 = vmul.f32 -1.442695, %v1747_v43 }
 0xec2   :  { %4408 = vtanh.f32 %v1749_v47  ;;  %v4266_v51 = vmul.f32 -1.442695, %v1749_v47 }
 0xec3   :  { %4410 = vpow2.f32 %v4265_v50 }
 0xec4   :  { %4412 = vpow2.f32 %v4266_v51 }
 0xecd   :  { %v4407_v48 = vpop.eup %4406 }
 0xece   :  { %1759 = vrot.lane.b32.xlu0 %v4407_v48, %s4711_s4 }
 0xecf   :  { %v4409_v49 = vpop.eup %4408 }
 0xed0   :  { %1783 = vrot.lane.b32.xlu1 %v4409_v49, %s4711_s4  ;;  %v4411_v52 = vpop.eup %4410 }
 0xed1   :  { %v4413_v53 = vpop.eup %4412  ;;  %v1753_v54 = vadd.f32 1.0, %v4411_v52 }
 0xed2   :  { %v1777_v55 = vadd.f32 1.0, %v4413_v53 }
 0xed3   :  { %4414 = vrcp.f32 %v1753_v54 }
 0xed4   :  { %4416 = vrcp.f32 %v1777_v55 }
 0xee0   :  { %v4415_v56 = vpop.eup %4414 }
 0xee1   :  { %v4417_v23 = vpop.eup %4416  ;;  %v1757_v25 = vmul.f32 %v4415_v56, %v5261_v4 }
 0xee2   :  { %v1781_v29 = vmul.f32 %v4417_v23, %v5265_v62 }
 0xf40   :  { %v1760_v16 = vpop.permute.xlu0 %1759 }
 0xf41   :  { %v1762_v21 = vmul.f32 %v4415_v56, %v1760_v16 }
 0xf42   :  { %v1784_v24 = vpop.permute.xlu1 %1783 }
 0xf43   :  { %1764 = vrot.lane.b32.xlu0 %v1762_v21, %s4711_s4  ;;  %v1786_v19 = vmul.f32 %v4417_v23, %v1784_v24 }
 0xf45   :  { %1788 = vrot.lane.b32.xlu1 %v1786_v19, %s4711_s4 }
 0xfb5   :  { %v1765_v26 = vpop.permute.xlu0 %1764 }
 0xfb6   :  { %v1767_v27 = vadd.f32 %v1765_v26, %v1757_v25 }
 0xfb7   :  { %v1789_v30 = vpop.permute.xlu1 %1788 }
 0xfb8   :  { %4418 = vtanh.f32 %v1767_v27  ;;  %v1791_v31 = vadd.f32 %v1789_v30, %v1781_v29  ;;  %v2058_v30 = vld [vmem:[#allocation4 + $0x1c] sm:$0x3] }
 0xfba   :  { %4420 = vtanh.f32 %v1791_v31 }
 0xfc5   :  { %v4419_v32 = vpop.eup %4418 }
 0xfc6   :  { %1770 = vrot.lane.b32.xlu0 %v4419_v32, %s4711_s4 }
 0xfc7   :  { %v4421_v33 = vpop.eup %4420 }
 0xfc8   :  { %1794 = vrot.lane.b32.xlu1 %v4421_v33, %s4711_s4 }
0x1038   :  { %v1771_v35 = vpop.permute.xlu0 %1770 }
0x1039   :  { %v1773_v36 = vmul.f32 %v4415_v56, %v1771_v35 }
0x103a   :  { %v1795_v39 = vpop.permute.xlu1 %1794 }
0x103b   :  { %v1805_v37 = vrot.slane %v1773_v36, %v5105_v28  ;;  %v1797_v41 = vmul.f32 %v4417_v23, %v1795_v39 }
0x103d   :  { %1806 = vrot.lane.b32.xlu0 %v1805_v37, %s4713_s6  ;;  %v5307_v38 = vrot.slane %v1797_v41, %v5105_v28 }
0x103f   :  { %1824 = vrot.lane.b32.xlu1 %v5307_v38, %s4714_s14 }
0x10af   :  { %v1807_v44 = vpop.permute.xlu0 %1806 }
0x10b0   :  { %1810 = vst.msk [vmem:[#allocation2 + $0xa] sm:$0x3] %vm1029_vm2, %v1807_v44 }
0x10b1   :  { %v1825_v57 = vpop.permute.xlu1 %1824 }
0x10b2   :  { %v1827_v60 = vsel %vm125_vm1, %v1807_v44, %v1825_v57 }
0x10b3   :  { %4267 = vmatmul.mubr.msk.f32.vlgmr.msra.gmra.mxu0 %vm891_vm3, %v1827_v60 }
0x10b4   :  { %2281 = vmatprep.mubr.f32.mxu0 %v4710_v0 }
0x1173   :  { %v1897_v1 = vpop.f32.mrf.mxu0 }
0x1174   :  { %v1903_v3 = vadd.f32 %v1902_v2, %v1897_v1 }
0x1175   :  { %v1899_v4 = vpop.f32.mrf.mxu0 }
0x1176   :  { %4422 = vtanh.f32 %v1903_v3  ;;  %v1905_v6 = vadd.f32 %v1904_v5, %v1899_v4  ;;  %v4268_v8 = vmul.f32 -1.442695, %v1903_v3 }
0x1178   :  { %4424 = vtanh.f32 %v1905_v6  ;;  %v4269_v10 = vmul.f32 -1.442695, %v1905_v6 }
0x1179   :  { %4426 = vpow2.f32 %v4268_v8 }
0x117a   :  { %4428 = vpow2.f32 %v4269_v10 }
0x1183   :  { %v4423_v62 = vpop.eup %4422 }
0x1184   :  { %1915 = vrot.lane.b32.xlu0 %v4423_v62, %s4711_s4 }
0x1185   :  { %v4425_v7 = vpop.eup %4424 }
0x1186   :  { %1939 = vrot.lane.b32.xlu1 %v4425_v7, %s4711_s4  ;;  %v4427_v63 = vpop.eup %4426 }
0x1187   :  { %v4429_v12 = vpop.eup %4428  ;;  %v1909_v13 = vadd.f32 1.0, %v4427_v63 }
0x1188   :  { %v1933_v11 = vadd.f32 1.0, %v4429_v12  ;;  %v5357_v12 = vld [vmem:[#allocation10 + $0x70] sm:$0xff] }
0x1189   :  { %4430 = vrcp.f32 %v1909_v13  ;;  %v5359_v13 = vld [vmem:[#allocation10 + $0x68] sm:$0xff] }
0x118a   :  { %4432 = vrcp.f32 %v1933_v11  ;;  %v5361_v11 = vld [vmem:[#allocation10 + $0x60] sm:$0xff] }
0x1196   :  { %v4431_v15 = vpop.eup %4430 }
0x1197   :  { %v4433_v40 = vpop.eup %4432  ;;  %v1913_v45 = vmul.f32 %v4431_v15, %v1767_v27  ;;  %v2060_v27 = vld [vmem:[#allocation4 + $0x2] sm:$0x3] }
0x1198   :  { %v1937_v48 = vmul.f32 %v4433_v40, %v1791_v31 }
0x11f6   :  { %v1916_v17 = vpop.permute.xlu0 %1915 }
0x11f7   :  { %v1918_v18 = vmul.f32 %v4431_v15, %v1916_v17 }
0x11f8   :  { %v1940_v42 = vpop.permute.xlu1 %1939 }
0x11f9   :  { %1920 = vrot.lane.b32.xlu0 %v1918_v18, %s4711_s4  ;;  %v1942_v43 = vmul.f32 %v4433_v40, %v1940_v42  ;;  %v5373_v18 = vld [vmem:[#allocation10 + $0x58] sm:$0xff]  ;;  %v5377_v42 = vld [vmem:[#allocation10 + $0x50] sm:$0xff] }
0x11fb   :  { %1944 = vrot.lane.b32.xlu1 %v1942_v43, %s4711_s4  ;;  %v5379_v43 = vld [vmem:[#allocation10 + $0x48] sm:$0xff] }
0x126b   :  { %v1921_v46 = vpop.permute.xlu0 %1920 }
0x126c   :  { %v5319_v47 = vadd.f32 %v1921_v46, %v1913_v45  ;;  %v5381_v45 = vld [vmem:[#allocation10 + $0x40] sm:$0xff] }
0x126d   :  { %v1945_v49 = vpop.permute.xlu1 %1944 }
0x126e   :  { %4434 = vtanh.f32 %v5319_v47  ;;  %v1947_v50 = vadd.f32 %v1945_v49, %v1937_v48  ;;  %v5391_v48 = vld [vmem:[#allocation10 + $0x38] sm:$0xff]  ;;  %v5395_v49 = vld [vmem:[#allocation10 + $0x30] sm:$0xff] }
0x1270   :  { %4436 = vtanh.f32 %v1947_v50 }
0x127b   :  { %v4435_v51 = vpop.eup %4434 }
0x127c   :  { %1926 = vrot.lane.b32.xlu0 %v4435_v51, %s4711_s4  ;;  %v5403_v51 = vld [vmem:[#allocation10 + $0x20] sm:$0xff] }
0x127d   :  { %v4437_v52 = vpop.eup %4436 }
0x127e   :  { %1950 = vrot.lane.b32.xlu1 %v4437_v52, %s4711_s4  ;;  %v5407_v52 = vld [vmem:[#allocation10 + $0x18] sm:$0xff] }
0x12ee   :  { %v1927_v53 = vpop.permute.xlu0 %1926 }
0x12ef   :  { %v1929_v54 = vmul.f32 %v4431_v15, %v1927_v53  ;;  %v5411_v53 = vld [vmem:[#allocation10 + $0x10] sm:$0xff] }
0x12f0   :  { %v1951_v56 = vpop.permute.xlu1 %1950 }
0x12f1   :  { %v1961_v55 = vrot.slane %v1929_v54, %v5105_v28  ;;  %v1953_v16 = vmul.f32 %v4433_v40, %v1951_v56  ;;  %v5413_v54 = vld [vmem:[#allocation10 + $0x8] sm:$0xff] }
0x12f3   :  { %1962 = vrot.lane.b32.xlu0 %v1961_v55, %s4713_s6  ;;  %v1974_v21 = vrot.slane %v1953_v16, %v5105_v28  ;;  %v5415_v55 = vld [vmem:[#allocation10] sm:$0xff] }
0x12f5   :  { %1980 = vrot.lane.b32.xlu1 %v1974_v21, %s4714_s14 }
0x1365   :  { %v1963_v23 = vpop.permute.xlu0 %1962 }
0x1366   :  { %1966 = vst.msk [vmem:[#allocation2 + $0xc] sm:$0x3] %vm1029_vm2, %v1963_v23 }
0x1367   :  { %v1981_v24 = vpop.permute.xlu1 %1980 }
0x1368   :  { %v1983_v19 = vsel %vm125_vm1, %v1963_v23, %v1981_v24 }
0x1369   :  { %4270 = vmatmul.mubr.msk.f32.vlgmr.msra.gmra.mxu1 %vm891_vm3, %v1983_v19 }
0x136a   :  { %2374 = vmatprep.mubr.f32.mxu1 %v4710_v0 }
0x1429   :  { %v2053_v25 = vpop.f32.mrf.mxu1 }
0x142a   :  { %v2059_v31 = vadd.f32 %v2058_v30, %v2053_v25 }
0x142b   :  { %v2055_v26 = vpop.f32.mrf.mxu1 }
0x142c   :  { %v2061_v29 = vadd.f32 %v2060_v27, %v2055_v26  ;;  %v4271_v36 = vmul.f32 -1.442695, %v2059_v31 }
0x142e   :  { %4438 = vtanh.f32 %v2061_v29  ;;  %v4272_v35 = vmul.f32 -1.442695, %v2061_v29 }
0x142f   :  { %4440 = vtanh.f32 %v2059_v31 }
0x1430   :  { %4442 = vpow2.f32 %v4272_v35 }
0x1431   :  { %4444 = vpow2.f32 %v4271_v36 }
0x143b   :  { %v4439_v32 = vpop.eup %4438 }
0x143c   :  { %2095 = vrot.lane.b32.xlu0 %v4439_v32, %s4711_s4  ;;  %v4441_v33 = vpop.eup %4440  ;;  %v2300_v32 = vld [vmem:[#allocation2 + $0x2] sm:$0x3] }
0x143d   :  { %v4443_v37 = vpop.eup %4442 }
0x143e   :  { %v2089_v39 = vadd.f32 1.0, %v4443_v37  ;;  %v4445_v41 = vpop.eup %4444 }
0x143f   :  { %v2065_v44 = vadd.f32 1.0, %v4445_v41 }
0x1440   :  { %2071 = vrot.lane.b32.xlu0 %v4441_v33, %s4711_s4  ;;  %4446 = vrcp.f32 %v2089_v39  ;;  %v2486_v39 = vld [vmem:[#allocation2 + $0x6] sm:$0x3] }
0x1441   :  { %4448 = vrcp.f32 %v2065_v44 }
0x144d   :  { %v4447_v57 = vpop.eup %4446 }
0x144e   :  { %v5335_v2 = vpop.eup %4448  ;;  %v2093_v5 = vmul.f32 %v4447_v57, %v1947_v50  ;;  %v5400_v50 = vld [vmem:[#allocation10 + $0x28] sm:$0xff] }
0x144f   :  { %v2069_v15 = vmul.f32 %v5335_v2, %v5319_v47 }
0x14ae   :  { %v2096_v60 = vpop.permute.xlu0 %2095 }
0x14af   :  { %v2098_v1 = vmul.f32 %v4447_v57, %v2096_v60 }
0x14b1   :  { %2100 = vrot.lane.b32.xlu1 %v2098_v1, %s4711_s4  ;;  %v5506_v1 = vld [vmem:[#allocation12 + $0x78] sm:$0xff] }
0x14b2   :  { %v2072_v3 = vpop.permute.xlu0 %2071 }
0x14b3   :  { %v2074_v4 = vmul.f32 %v5335_v2, %v2072_v3  ;;  %v2196_v3 = vld [vmem:[#allocation2] sm:$0x3] }
0x14b5   :  { %2076 = vrot.lane.b32.xlu0 %v2074_v4, %s4711_s4 }
0x14b9   :  { %1975 = vrot.lane.b32.xlu0 %v1974_v21, %s4713_s6 }
0x14bd   :  { %1663 = vrot.lane.b32.xlu0 %v5273_v9, %s4713_s6 }
0x14c1   :  { %1351 = vrot.lane.b32.xlu0 %v5192_v20, %s4713_s6  ;;  %v5354_v20 = vld [vmem:[#allocation10 + $0x78] sm:$0xff] }
0x14c2   :  { %2326 = vmatprep.subr.mxu1 %v5354_v20  ;;  %2233 = vmatprep.subr.mxu0 %v5354_v20 }
0x14c3   :  { %2327 = vmatpush1.msra.mxu1 %v5357_v12  ;;  %2234 = vmatpush1.msra.mxu0 %v5357_v12 }
0x14c4   :  { %2328 = vmatprep.subr.mxu1 %v5359_v13  ;;  %2235 = vmatprep.subr.mxu0 %v5359_v13 }
0x14c5   :  { %1195 = vrot.lane.b32.xlu0 %v5151_v22, %s4713_s6  ;;  %2329 = vmatpush1.msra.mxu1 %v5361_v11 }
0x14c6   :  { %2236 = vmatpush1.msra.mxu0 %v5361_v11  ;;  %2330 = vmatprep.subr.mxu1 %v5373_v18 }
0x14c7   :  { %2237 = vmatprep.subr.mxu0 %v5373_v18  ;;  %2331 = vmatpush1.msra.mxu1 %v5377_v42 }
0x14c8   :  { %2238 = vmatpush1.msra.mxu0 %v5377_v42  ;;  %2332 = vmatprep.subr.mxu1 %v5379_v43 }
0x14c9   :  { %2239 = vmatprep.subr.mxu0 %v5379_v43  ;;  %2333 = vmatpush1.msra.mxu1 %v5381_v45 }
0x14ca   :  { %2240 = vmatpush1.msra.mxu0 %v5381_v45  ;;  %2334 = vmatprep.subr.mxu1 %v5391_v48 }
0x14cb   :  { %2241 = vmatprep.subr.mxu0 %v5391_v48  ;;  %2335 = vmatpush1.msra.mxu1 %v5395_v49 }
0x14cc   :  { %2336 = vmatprep.subr.mxu1 %v5400_v50  ;;  %2242 = vmatpush1.msra.mxu0 %v5395_v49 }
0x14cd   :  { %2337 = vmatpush1.msra.mxu1 %v5403_v51  ;;  %2243 = vmatprep.subr.mxu0 %v5400_v50 }
0x14ce   :  { %2338 = vmatprep.subr.mxu1 %v5407_v52  ;;  %2244 = vmatpush1.msra.mxu0 %v5403_v51 }
0x14cf   :  { %2339 = vmatpush1.msra.mxu1 %v5411_v53  ;;  %2245 = vmatprep.subr.mxu0 %v5407_v52 }
0x14d0   :  { %2340 = vmatprep.subr.mxu1 %v5413_v54  ;;  %2246 = vmatpush1.msra.mxu0 %v5411_v53 }
0x14d1   :  { %2341 = vmatpush1.msra.mxu1 %v5415_v55  ;;  %2247 = vmatprep.subr.mxu0 %v5413_v54 }
0x14d2   :  { %2512 = vmatprep.subr.mxu1 %v5354_v20  ;;  %2248 = vmatpush1.msra.mxu0 %v5415_v55 }
0x14d3   :  { %2419 = vmatprep.subr.mxu0 %v5354_v20 }
0x1523   :  { %v2101_v6 = vpop.permute.xlu1 %2100 }
0x1524   :  { %v5346_v62 = vadd.f32 %v2101_v6, %v2093_v5 }
0x1526   :  { %4450 = vtanh.f32 %v5346_v62 }
0x1527   :  { %v2077_v7 = vpop.permute.xlu0 %2076 }
0x1528   :  { %v5370_v17 = vadd.f32 %v2077_v7, %v2069_v15  ;;  %v5539_v15 = vld [vmem:[#allocation12 + $0x70] sm:$0xff] }
0x152a   :  { %4452 = vtanh.f32 %v5370_v17 }
0x152b   :  { %v1976_v8 = vpop.permute.xlu0 %1975 }
0x152c   :  { %1979 = vst.msk [vmem:[#allocation3 + $0x2] sm:$0x3] %vm1029_vm2, %v1976_v8  ;;  %v2393_v8 = vld [vmem:[#allocation2 + $0x4] sm:$0x3] }
0x152f   :  { %v1664_v10 = vpop.permute.xlu0 %1663 }
0x1530   :  { %1667 = vst.msk [vmem:[#allocation3 + $0x6] sm:$0x3] %vm1029_vm2, %v1664_v10 }
0x1533   :  { %v4451_v9 = vpop.eup %4450  ;;  %v1352_v63 = vpop.permute.xlu0 %1351  ;;  %v2301_v56 = vld [vmem:[#allocation3 + $0x2] sm:$0x3] }
0x1534   :  { %1355 = vst.msk [vmem:[#allocation3 + $0xa] sm:$0x3] %vm1029_vm2, %v1352_v63  ;;  %2106 = vrot.lane.b32.xlu1 %v4451_v9, %s4711_s4 }
0x1537   :  { %v1196_v22 = vpop.permute.xlu0 %1195  ;;  %v2487_v16 = vld [vmem:[#allocation3 + $0x6] sm:$0x3] }
0x1538   :  { %1199 = vst.msk [vmem:[#allocation3 + $0xc] sm:$0x3] %vm1029_vm2, %v1196_v22 }
0x153b   :  { %v2673_v21 = vld [vmem:[#allocation3 + $0xa] sm:$0x3] }
0x15a6   :  { %v2107_v40 = vpop.permute.xlu1 %2106 }
0x15a7   :  { %v2109_v46 = vmul.f32 %v4447_v57, %v2107_v40  ;;  %v2672_v57 = vld [vmem:[#allocation2 + $0xa] sm:$0x3] }
0x15a8   :  { %v5542_v40 = vld [vmem:[#allocation12 + $0x68] sm:$0xff] }
0x15a9   :  { %v2130_v47 = vrot.slane %v2109_v46, %v5105_v28  ;;  %v5546_v46 = vld [vmem:[#allocation12 + $0x60] sm:$0xff] }
0x15ab   :  { %2131 = vrot.lane.b32.xlu1 %v2130_v47, %s4713_s6  ;;  %v5550_v47 = vld [vmem:[#allocation12 + $0x58] sm:$0xff] }
0x15af   :  { %1819 = vrot.lane.b32.xlu1 %v5307_v38, %s4713_s6  ;;  %v4453_v38 = vpop.eup %4452 }
0x15b3   :  { %1507 = vrot.lane.b32.xlu1 %v5233_v14, %s4713_s6  ;;  %v2766_v14 = vld [vmem:[#allocation3 + $0xc] sm:$0x3] }
0x15b7   :  { %2082 = vrot.lane.b32.xlu1 %v4453_v38, %s4711_s4  ;;  %v5554_v38 = vld [vmem:[#allocation12 + $0x50] sm:$0xff] }
0x15bb   :  { %1039 = vrot.lane.b32.xlu1 %v5110_v34, %s4713_s6 }
0x15bf   :  { %2303 = vrot.lane.b32.xlu1 %v2301_v56, %s4711_s4  ;;  %v5558_v56 = vld [vmem:[#allocation12 + $0x48] sm:$0xff] }
0x15c3   :  { %2489 = vrot.lane.b32.xlu1 %v2487_v16, %s4711_s4  ;;  %v5562_v16 = vld [vmem:[#allocation12 + $0x40] sm:$0xff] }
0x15c7   :  { %2675 = vrot.lane.b32.xlu1 %v2673_v21, %s4711_s4  ;;  %v5566_v21 = vld [vmem:[#allocation12 + $0x38] sm:$0xff] }
0x15cb   :  { %2768 = vrot.lane.b32.xlu1 %v2766_v14, %s4711_s4  ;;  %v5570_v14 = vld [vmem:[#allocation12 + $0x30] sm:$0xff] }
0x161d   :  { %v2132_v23 = vpop.permute.xlu1 %2131 }
0x161e   :  { %2134 = vst.msk [vmem:[#allocation3] sm:$0x3] %vm1029_vm2, %v2132_v23  ;;  %2137 = vst.msk [vmem:[#allocation13 + $0x2] sm:$0x3] %vm1029_vm2, %v2132_v23  ;;  %v5574_v23 = vld [vmem:[#allocation12 + $0x28] sm:$0xff] }
0x1621   :  { %v1820_v24 = vpop.permute.xlu1 %1819 }
0x1622   :  { %1823 = vst.msk [vmem:[#allocation3 + $0x4] sm:$0x3] %vm1029_vm2, %v1820_v24  ;;  %v2579_v24 = vld [vmem:[#allocation2 + $0x8] sm:$0x3] }
0x1625   :  { %v1508_v34 = vpop.permute.xlu1 %1507  ;;  %v2197_v19 = vld [vmem:[#allocation3] sm:$0x3] }
0x1626   :  { %1511 = vst.msk [vmem:[#allocation3 + $0x8] sm:$0x3] %vm1029_vm2, %v1508_v34  ;;  %2199 = vrot.lane.b32.xlu0 %v2197_v19, %s4711_s4  ;;  %v5578_v34 = vld [vmem:[#allocation12 + $0x20] sm:$0xff] }
0x1629   :  { %v2083_v25 = vpop.permute.xlu1 %2082  ;;  %v2394_v26 = vld [vmem:[#allocation3 + $0x4] sm:$0x3] }
0x162a   :  { %2396 = vrot.lane.b32.xlu0 %v2394_v26, %s4711_s4  ;;  %v2085_v27 = vmul.f32 %v5335_v2, %v2083_v25  ;;  %v5588_v25 = vld [vmem:[#allocation12 + $0x18] sm:$0xff]  ;;  %v5591_v26 = vld [vmem:[#allocation12 + $0x10] sm:$0xff] }
0x162c   :  { %v2117_v31 = vrot.slane %v2085_v27, %v5105_v28  ;;  %v5595_v27 = vld [vmem:[#allocation12 + $0x8] sm:$0xff] }
0x162d   :  { %v1040_v29 = vpop.permute.xlu1 %1039  ;;  %v2580_v30 = vld [vmem:[#allocation3 + $0x8] sm:$0x3] }
0x162e   :  { %1043 = vst.msk [vmem:[#allocation3 + $0xe] sm:$0x3] %vm1029_vm2, %v1040_v29  ;;  %2582 = vrot.lane.b32.xlu0 %v2580_v30, %s4711_s4 }
0x1631   :  { %v2304_v33 = vpop.permute.xlu1 %2303 }
0x1632   :  { %v2306_v35 = vsel %vm125_vm1, %v2300_v32, %v2304_v33  ;;  %2118 = vrot.lane.b32.xlu0 %v2117_v31, %s4713_s6 }
0x1633   :  { %4275 = vmatmul.mubr.msk.f32.vlgmr.msra.gmra.mxu1 %vm891_vm3, %v2306_v35 }
0x1634   :  { %2513 = vmatpush1.msra.mxu1 %v5357_v12  ;;  %2560 = vmatprep.mubr.f32.mxu1 %v4710_v0 }
0x1635   :  { %2514 = vmatprep.subr.mxu1 %v5359_v13  ;;  %v2859_v36 = vld [vmem:[#allocation3 + $0xe] sm:$0x3]  ;;  %v2490_v37 = vpop.permute.xlu1 %2489 }
0x1636   :  { %2515 = vmatpush1.msra.mxu1 %v5361_v11  ;;  %2861 = vrot.lane.b32.xlu0 %v2859_v36, %s4711_s4  ;;  %v2492_v41 = vsel %vm125_vm1, %v2486_v39, %v2490_v37 }
0x1637   :  { %2516 = vmatprep.subr.mxu1 %v5373_v18 }
0x1638   :  { %2517 = vmatpush1.msra.mxu1 %v5377_v42 }
0x1639   :  { %2518 = vmatprep.subr.mxu1 %v5379_v43  ;;  %v2676_v44 = vpop.permute.xlu1 %2675 }
0x163a   :  { %2519 = vmatpush1.msra.mxu1 %v5381_v45  ;;  %v2678_v60 = vsel %vm125_vm1, %v2672_v57, %v2676_v44 }
0x163b   :  { %2520 = vmatprep.subr.mxu1 %v5391_v48 }
0x163c   :  { %2521 = vmatpush1.msra.mxu1 %v5395_v49 }
0x163d   :  { %2522 = vmatprep.subr.mxu1 %v5400_v50 }
0x163e   :  { %2523 = vmatpush1.msra.mxu1 %v5403_v51 }
0x163f   :  { %2524 = vmatprep.subr.mxu1 %v5407_v52 }
0x1640   :  { %2525 = vmatpush1.msra.mxu1 %v5411_v53 }
0x1641   :  { %2526 = vmatprep.subr.mxu1 %v5413_v54 }
0x1642   :  { %2527 = vmatpush1.msra.mxu1 %v5415_v55 }
0x1643   :  { %4279 = vmatmul.mubr.msk.f32.vlgmr.msra.gmra.mxu1 %vm891_vm3, %v2492_v41  ;;  %2698 = vmatprep.subr.mxu1 %v5354_v20 }
0x1644   :  { %2699 = vmatpush1.msra.mxu1 %v5357_v12  ;;  %2746 = vmatprep.mubr.f32.mxu1 %v4710_v0 }
0x1645   :  { %2700 = vmatprep.subr.mxu1 %v5359_v13 }
0x1646   :  { %2701 = vmatpush1.msra.mxu1 %v5361_v11 }
0x1647   :  { %2702 = vmatprep.subr.mxu1 %v5373_v18 }
0x1648   :  { %2703 = vmatpush1.msra.mxu1 %v5377_v42 }
0x1649   :  { %2704 = vmatprep.subr.mxu1 %v5379_v43 }
0x164a   :  { %2705 = vmatpush1.msra.mxu1 %v5381_v45 }
0x164b   :  { %2706 = vmatprep.subr.mxu1 %v5391_v48 }
0x164c   :  { %2707 = vmatpush1.msra.mxu1 %v5395_v49 }
0x164d   :  { %2708 = vmatprep.subr.mxu1 %v5400_v50 }
0x164e   :  { %2709 = vmatpush1.msra.mxu1 %v5403_v51 }
0x164f   :  { %2710 = vmatprep.subr.mxu1 %v5407_v52 }
0x1650   :  { %2711 = vmatpush1.msra.mxu1 %v5411_v53 }
0x1651   :  { %2712 = vmatprep.subr.mxu1 %v5413_v54 }
0x1652   :  { %2713 = vmatpush1.msra.mxu1 %v5415_v55 }
0x1653   :  { %4283 = vmatmul.mubr.msk.f32.vlgmr.msra.gmra.mxu1 %vm891_vm3, %v2678_v60  ;;  %2884 = vmatprep.subr.mxu1 %v5354_v20 }
0x1654   :  { %2885 = vmatpush1.msra.mxu1 %v5357_v12  ;;  %2932 = vmatprep.mubr.f32.mxu1 %v4710_v0 }
0x1655   :  { %2886 = vmatprep.subr.mxu1 %v5359_v13 }
0x1656   :  { %2887 = vmatpush1.msra.mxu1 %v5361_v11 }
0x1657   :  { %2888 = vmatprep.subr.mxu1 %v5373_v18 }
0x1658   :  { %2889 = vmatpush1.msra.mxu1 %v5377_v42 }
0x1659   :  { %2890 = vmatprep.subr.mxu1 %v5379_v43 }
0x165a   :  { %2891 = vmatpush1.msra.mxu1 %v5381_v45 }
0x165b   :  { %2892 = vmatprep.subr.mxu1 %v5391_v48 }
0x165c   :  { %2893 = vmatpush1.msra.mxu1 %v5395_v49 }
0x165d   :  { %2894 = vmatprep.subr.mxu1 %v5400_v50 }
0x165e   :  { %2895 = vmatpush1.msra.mxu1 %v5403_v51 }
0x165f   :  { %2896 = vmatprep.subr.mxu1 %v5407_v52 }
0x1660   :  { %2897 = vmatpush1.msra.mxu1 %v5411_v53 }
0x1661   :  { %2898 = vmatprep.subr.mxu1 %v5413_v54 }
0x1662   :  { %2899 = vmatpush1.msra.mxu1 %v5415_v55 }
0x1663   :  { %3116 = vmatprep.subr.mxu1 %v5506_v1 }
0x1698   :  { %v2200_v2 = vpop.permute.xlu0 %2199 }
0x1699   :  { %v2202_v4 = vsel %vm125_vm1, %v2196_v3, %v2200_v2 }
0x169a   :  { %4273 = vmatmul.mubr.msk.f32.vlgmr.msra.gmra.mxu0 %vm891_vm3, %v2202_v4 }
0x169b   :  { %2420 = vmatpush1.msra.mxu0 %v5357_v12  ;;  %2467 = vmatprep.mubr.f32.mxu0 %v4710_v0 }
0x169c   :  { %2421 = vmatprep.subr.mxu0 %v5359_v13  ;;  %v2397_v5 = vpop.permute.xlu0 %2396 }
0x169d   :  { %2422 = vmatpush1.msra.mxu0 %v5361_v11  ;;  %v2399_v10 = vsel %vm125_vm1, %v2393_v8, %v2397_v5 }
0x169e   :  { %2423 = vmatprep.subr.mxu0 %v5373_v18 }
0x169f   :  { %2424 = vmatpush1.msra.mxu0 %v5377_v42 }
0x16a0   :  { %2425 = vmatprep.subr.mxu0 %v5379_v43  ;;  %v2583_v6 = vpop.permute.xlu0 %2582 }
0x16a1   :  { %2426 = vmatpush1.msra.mxu0 %v5381_v45  ;;  %v2585_v19 = vsel %vm125_vm1, %v2579_v24, %v2583_v6 }
0x16a2   :  { %2427 = vmatprep.subr.mxu0 %v5391_v48 }
0x16a3   :  { %2428 = vmatpush1.msra.mxu0 %v5395_v49 }
0x16a4   :  { %2429 = vmatprep.subr.mxu0 %v5400_v50  ;;  %v2119_v7 = vpop.permute.xlu0 %2118 }
0x16a5   :  { %2122 = vst.msk [vmem:[#allocation2 + $0xe] sm:$0x3] %vm1029_vm2, %v2119_v7  ;;  %2135 = vst.msk [vmem:[#allocation13] sm:$0x3] %vm1029_vm2, %v2119_v7  ;;  %2430 = vmatpush1.msra.mxu0 %v5403_v51 }
0x16a6   :  { %2431 = vmatprep.subr.mxu0 %v5407_v52 }
0x16a7   :  { %2432 = vmatpush1.msra.mxu0 %v5411_v53 }
0x16a8   :  { %2433 = vmatprep.subr.mxu0 %v5413_v54  ;;  %v2862_v63 = vpop.permute.xlu0 %2861 }
0x16a9   :  { %2434 = vmatpush1.msra.mxu0 %v5415_v55 }
0x16aa   :  { %4277 = vmatmul.mubr.msk.f32.vlgmr.msra.gmra.mxu0 %vm891_vm3, %v2399_v10  ;;  %2605 = vmatprep.subr.mxu0 %v5354_v20 }
0x16ab   :  { %2606 = vmatpush1.msra.mxu0 %v5357_v12  ;;  %2653 = vmatprep.mubr.f32.mxu0 %v4710_v0 }
0x16ac   :  { %v2858_v9 = vld [vmem:[#allocation2 + $0xe] sm:$0x3]  ;;  %2607 = vmatprep.subr.mxu0 %v5359_v13 }
0x16ad   :  { %v2864_v22 = vsel %vm125_vm1, %v2858_v9, %v2862_v63  ;;  %2608 = vmatpush1.msra.mxu0 %v5361_v11 }
0x16ae   :  { %2609 = vmatprep.subr.mxu0 %v5373_v18  ;;  %4287 = vmatmul.mubr.msk.f32.vlgmr.msra.gmra.mxu1 %vm891_vm3, %v2864_v22 }
0x16af   :  { %2610 = vmatpush1.msra.mxu0 %v5377_v42  ;;  %3117 = vmatpush1.msra.mxu1 %v5539_v15 }
0x16b0   :  { %2611 = vmatprep.subr.mxu0 %v5379_v43  ;;  %3118 = vmatprep.subr.mxu1 %v5542_v40 }
0x16b1   :  { %2612 = vmatpush1.msra.mxu0 %v5381_v45  ;;  %3119 = vmatpush1.msra.mxu1 %v5546_v46 }
0x16b2   :  { %2613 = vmatprep.subr.mxu0 %v5391_v48  ;;  %3120 = vmatprep.subr.mxu1 %v5550_v47 }
0x16b3   :  { %2614 = vmatpush1.msra.mxu0 %v5395_v49  ;;  %3121 = vmatpush1.msra.mxu1 %v5554_v38 }
0x16b4   :  { %2615 = vmatprep.subr.mxu0 %v5400_v50  ;;  %3122 = vmatprep.subr.mxu1 %v5558_v56 }
0x16b5   :  { %2616 = vmatpush1.msra.mxu0 %v5403_v51  ;;  %3123 = vmatpush1.msra.mxu1 %v5562_v16 }
0x16b6   :  { %2617 = vmatprep.subr.mxu0 %v5407_v52  ;;  %3124 = vmatprep.subr.mxu1 %v5566_v21 }
0x16b7   :  { %2618 = vmatpush1.msra.mxu0 %v5411_v53  ;;  %3125 = vmatpush1.msra.mxu1 %v5570_v14 }
0x16b8   :  { %2619 = vmatprep.subr.mxu0 %v5413_v54  ;;  %3126 = vmatprep.subr.mxu1 %v5574_v23 }
0x16b9   :  { %2620 = vmatpush1.msra.mxu0 %v5415_v55  ;;  %3127 = vmatpush1.msra.mxu1 %v5578_v34 }
0x16ba   :  { %4281 = vmatmul.mubr.msk.f32.vlgmr.msra.gmra.mxu0 %vm891_vm3, %v2585_v19  ;;  %2791 = vmatprep.subr.mxu0 %v5354_v20  ;;  %v5599_v20 = vld [vmem:[#allocation12] sm:$0xff] }
0x16bb   :  { %2792 = vmatpush1.msra.mxu0 %v5357_v12  ;;  %2839 = vmatprep.mubr.f32.mxu0 %v4710_v0  ;;  %v2769_v12 = vpop.permute.xlu1 %2768 }
0x16bc   :  { %2793 = vmatprep.subr.mxu0 %v5359_v13  ;;  %3128 = vmatprep.subr.mxu1 %v5588_v25  ;;  %v2765_v13 = vld [vmem:[#allocation2 + $0xc] sm:$0x3] }
0x16bd   :  { %2794 = vmatpush1.msra.mxu0 %v5361_v11  ;;  %3129 = vmatpush1.msra.mxu1 %v5591_v26  ;;  %v2771_v11 = vsel %vm125_vm1, %v2765_v13, %v2769_v12 }
0x16be   :  { %2795 = vmatprep.subr.mxu0 %v5373_v18  ;;  %3130 = vmatprep.subr.mxu1 %v5595_v27  ;;  %v2195_v18 = vld [vmem:[%s5911_s7] sm:$0x3]  ;;  %s4715_s7 = smov [#allocation13]  }
0x16bf   :  { %2796 = vmatpush1.msra.mxu0 %v5377_v42  ;;  %3131 = vmatpush1.msra.mxu1 %v5599_v20  ;;  %v2207_v42 = vrot.slane %v2195_v18, %v117_v59  ;;  %s4174_s0 = sshll.u32 %s4715_s7, 4  ;;  %s4175_s0 = int_to_ptr.vmem [resolvable:$true] %s4174_s0 }
0x16c0   :  { %2797 = vmatprep.subr.mxu0 %v5379_v43  ;;  %3164 = vmatprep.mubr.f32.mxu1 %v4710_v0  ;;  %v2211_v43 = vrot.slane %v2195_v18, %v121_v61  ;;  %s4654_s10 = scalar_lea.vmem %s4175_s0, 128  ;;  %p4659_p7 = scmp.lt.s32.totalorder %s4175_s0, %s4175_s0 }
0x16c1   :  { %2798 = vmatpush1.msra.mxu0 %v5381_v45  ;;  %3414 = vmatprep.subr.mxu1 %v5506_v1  ;;  %p4655_p6 = scmp.ne.s32.totalorder %s4175_s0, %s4654_s10  ;;  %p4660_p8 = scmp.lt.s32.totalorder %s4654_s10, %s4654_s10 }
0x16c2   :  { %2799 = vmatprep.subr.mxu0 %v5391_v48 }
0x16c3   :  { %2800 = vmatpush1.msra.mxu0 %v5395_v49  ;;  %p4661_p9 = por %p4660_p8, %p4659_p7 }
0x16c4   :  { %2801 = vmatprep.subr.mxu0 %v5400_v50 }
0x16c5   :  { %2802 = vmatpush1.msra.mxu0 %v5403_v51  ;;  %p4662_p10 = pnand %p4661_p9, %p4655_p6 }
0x16c6   :  { %2803 = vmatprep.subr.mxu0 %v5407_v52 }
0x16c7   :  { %2804 = vmatpush1.msra.mxu0 %v5411_v53 }
0x16c8   :  { %2805 = vmatprep.subr.mxu0 %v5413_v54 }
0x16c9   :  { %2806 = vmatpush1.msra.mxu0 %v5415_v55 }
0x16ca   :  { %4285 = vmatmul.mubr.msk.f32.vlgmr.msra.gmra.mxu0 %vm891_vm3, %v2771_v11  ;;  %2967 = vmatprep.subr.mxu0 %v5506_v1 }
0x16cb   :  { %2968 = vmatpush1.msra.mxu0 %v5539_v15  ;;  %3015 = vmatprep.mubr.f32.mxu0 %v4710_v0 }
0x16cc   :  { %2969 = vmatprep.subr.mxu0 %v5542_v40 }
0x16cd   :  { %2970 = vmatpush1.msra.mxu0 %v5546_v46 }
0x16ce   :  { %2971 = vmatprep.subr.mxu0 %v5550_v47 }
0x16cf   :  { %2972 = vmatpush1.msra.mxu0 %v5554_v38 }
0x16d0   :  { %2973 = vmatprep.subr.mxu0 %v5558_v56 }
0x16d1   :  { %2974 = vmatpush1.msra.mxu0 %v5562_v16 }
0x16d2   :  { %2975 = vmatprep.subr.mxu0 %v5566_v21 }
0x16d3   :  { %2976 = vmatpush1.msra.mxu0 %v5570_v14 }
0x16d4   :  { %2977 = vmatprep.subr.mxu0 %v5574_v23 }
0x16d5   :  { %2978 = vmatpush1.msra.mxu0 %v5578_v34 }
0x16d6   :  { %2979 = vmatprep.subr.mxu0 %v5588_v25 }
0x16d7   :  { %2980 = vmatpush1.msra.mxu0 %v5591_v26 }
0x16d8   :  { %2981 = vmatprep.subr.mxu0 %v5595_v27 }
0x16d9   :  { %2982 = vmatpush1.msra.mxu0 %v5599_v20 }
0x16da   :  { %3016 = vmatmul.mubr.f32.vlgmr.msra.gmra.mxu0 %v4710_v0  ;;  %3265 = vmatprep.subr.mxu0 %v5506_v1 }
0x16db   :  { %3266 = vmatpush1.msra.mxu0 %v5539_v15  ;;  %3313 = vmatprep.mubr.f32.mxu0 %v4710_v0 }
0x16dc   :  { %3267 = vmatprep.subr.mxu0 %v5542_v40 }
0x16dd   :  { %3268 = vmatpush1.msra.mxu0 %v5546_v46 }
0x16de   :  { %3269 = vmatprep.subr.mxu0 %v5550_v47 }
0x16df   :  { %3270 = vmatpush1.msra.mxu0 %v5554_v38 }
0x16e0   :  { %3271 = vmatprep.subr.mxu0 %v5558_v56 }
0x16e1   :  { %3272 = vmatpush1.msra.mxu0 %v5562_v16 }
0x16e2   :  { %3273 = vmatprep.subr.mxu0 %v5566_v21 }
0x16e3   :  { %3274 = vmatpush1.msra.mxu0 %v5570_v14 }
0x16e4   :  { %3275 = vmatprep.subr.mxu0 %v5574_v23 }
0x16e5   :  { %3276 = vmatpush1.msra.mxu0 %v5578_v34 }
0x16e6   :  { %3277 = vmatprep.subr.mxu0 %v5588_v25 }
0x16e7   :  { %3278 = vmatpush1.msra.mxu0 %v5591_v26 }
0x16e8   :  { %3279 = vmatprep.subr.mxu0 %v5595_v27 }
0x16e9   :  { %3280 = vmatpush1.msra.mxu0 %v5599_v20 }
0x16ea   :  { %3563 = vmatprep.subr.mxu0 %v5506_v1 }
0x16f3   :  { %v2376_v45 = vpop.f32.mrf.mxu1 }
0x16f4   :  { %v2377_v49 = vadd.f32 %v2376_v45, %v2207_v42 }
0x16f5   :  { %v2378_v48 = vpop.f32.mrf.mxu1 }
0x16f6   :  { %v2379_v50 = vadd.f32 %v2378_v48, %v2211_v43 }
0x16f8   :  { %v2383_v51 = vcombine.low %v2377_v49, %v2379_v50 }
0x16fa   :  { %4276 = vst.sshfl [vmem:[#allocation4 + $0x4] sm:$0x33 pattern:$0x76325410] %v2383_v51 }
0x1703   :  { %v2562_v52 = vpop.f32.mrf.mxu1 }
0x1704   :  { %v2563_v54 = vadd.f32 %v2562_v52, %v2207_v42 }
0x1705   :  { %v2564_v53 = vpop.f32.mrf.mxu1 }
0x1706   :  { %v2565_v55 = vadd.f32 %v2564_v53, %v2211_v43 }
0x1708   :  { %v2569_v29 = vcombine.low %v2563_v54, %v2565_v55 }
0x170a   :  { %4280 = vst.sshfl [vmem:[#allocation4 + $0xc] sm:$0x33 pattern:$0x76325410] %v2569_v29 }
0x1713   :  { %v2748_v30 = vpop.f32.mrf.mxu1 }
0x1714   :  { %v2749_v32 = vadd.f32 %v2748_v30, %v2207_v42 }
0x1715   :  { %v2750_v31 = vpop.f32.mrf.mxu1 }
0x1716   :  { %v2751_v33 = vadd.f32 %v2750_v31, %v2211_v43 }
0x1718   :  { %v2755_v59 = vcombine.low %v2749_v32, %v2751_v33 }
0x171a   :  { %4284 = vst.sshfl [vmem:[#allocation4 + $0x14] sm:$0x33 pattern:$0x76325410] %v2755_v59 }
0x175a   :  { %v2283_v58 = vpop.f32.mrf.mxu0 }
0x175b   :  { %v2284_v35 = vadd.f32 %v2283_v58, %v2207_v42 }
0x175c   :  { %v2285_v61 = vpop.f32.mrf.mxu0 }
0x175d   :  { %v2286_v36 = vadd.f32 %v2285_v61, %v2211_v43 }
0x175f   :  { %v2290_v37 = vcombine.low %v2284_v35, %v2286_v36 }
0x1761   :  { %4274 = vst.sshfl [vmem:[#allocation4] sm:$0x33 pattern:$0x76325410] %v2290_v37 }
0x1768   :  { %v3022_v18 = vld [vmem:[#allocation4] sm:$0x3] }
0x176a   :  { %v2469_v39 = vpop.f32.mrf.mxu0 }
0x176b   :  { %v2470_v44 = vadd.f32 %v2469_v39, %v2207_v42 }
0x176c   :  { %v2471_v41 = vpop.f32.mrf.mxu0 }
0x176d   :  { %v2472_v57 = vadd.f32 %v2471_v41, %v2211_v43 }
0x176e   :  { %v2934_v60 = vpop.f32.mrf.mxu1 }
0x176f   :  { %v2476_v2 = vcombine.low %v2470_v44, %v2472_v57  ;;  %v2935_v4 = vadd.f32 %v2934_v60, %v2207_v42 }
0x1770   :  { %v2936_v3 = vpop.f32.mrf.mxu1 }
0x1771   :  { %4278 = vst.sshfl [vmem:[#allocation4 + $0x8] sm:$0x33 pattern:$0x76325410] %v2476_v2  ;;  %v2937_v5 = vadd.f32 %v2936_v3, %v2211_v43 }
0x1773   :  { %v2941_v6 = vcombine.low %v2935_v4, %v2937_v5 }
0x1775   :  { %4288 = vst.sshfl [vmem:[#allocation4 + $0x1c] sm:$0x33 pattern:$0x76325410] %v2941_v6 }
0x177a   :  { %v2655_v7 = vpop.f32.mrf.mxu0 }
0x177b   :  { %v2656_v10 = vadd.f32 %v2655_v7, %v2207_v42 }
0x177c   :  { %v2657_v8 = vpop.f32.mrf.mxu0  ;;  %v3024_v49 = vld [vmem:[#allocation4 + $0x1e] sm:$0x3] }
0x177d   :  { %v2658_v9 = vadd.f32 %v2657_v8, %v2211_v43 }
0x177f   :  { %v2662_v63 = vcombine.low %v2656_v10, %v2658_v9 }
0x1781   :  { %4282 = vst.sshfl [vmem:[#allocation4 + $0x10] sm:$0x33 pattern:$0x76325410] %v2662_v63  ;;  %v3171_v63 = vld [vmem:[#allocation4 + $0x4] sm:$0x3] }
0x178a   :  { %v2841_v22 = vpop.f32.mrf.mxu0 }
0x178b   :  { %v2842_v19 = vadd.f32 %v2841_v22, %v2207_v42 }
0x178c   :  { %v2843_v24 = vpop.f32.mrf.mxu0 }
0x178d   :  { %v2844_v12 = vadd.f32 %v2843_v24, %v2211_v43 }
0x178f   :  { %v2848_v13 = vcombine.low %v2842_v19, %v2844_v12 }
0x1791   :  { %4286 = vst.sshfl [vmem:[#allocation4 + $0x18] sm:$0x33 pattern:$0x76325410] %v2848_v13 }
0x1798   :  { %v3173_v19 = vld [vmem:[#allocation4 + $0x1a] sm:$0x3] }
0x179a   :  { %v3017_v11 = vpop.f32.mrf.mxu0 }
0x179b   :  { %v3023_v45 = vadd.f32 %v3022_v18, %v3017_v11 }
0x179c   :  { %v3019_v48 = vpop.f32.mrf.mxu0 }
0x179d   :  { %4454 = vtanh.f32 %v3023_v45  ;;  %v3025_v50 = vadd.f32 %v3024_v49, %v3019_v48  ;;  %v4289_v53 = vmul.f32 -1.442695, %v3023_v45 }
0x179f   :  { %4456 = vtanh.f32 %v3025_v50  ;;  %v4290_v54 = vmul.f32 -1.442695, %v3025_v50 }
0x17a0   :  { %4458 = vpow2.f32 %v4289_v53 }
0x17a1   :  { %4460 = vpow2.f32 %v4290_v54 }
0x17aa   :  { %v4455_v51 = vpop.eup %4454 }
0x17ab   :  { %3035 = vrot.lane.b32.xlu1 %v4455_v51, %s4711_s4 }
0x17ac   :  { %v4457_v52 = vpop.eup %4456 }
0x17ad   :  { %3059 = vrot.lane.b32.xlu0 %v4457_v52, %s4711_s4  ;;  %v4459_v42 = vpop.eup %4458 }
0x17ae   :  { %v4461_v43 = vpop.eup %4460  ;;  %v3029_v55 = vadd.f32 1.0, %v4459_v42 }
0x17af   :  { %v3053_v29 = vadd.f32 1.0, %v4461_v43 }
0x17b0   :  { %4462 = vrcp.f32 %v3029_v55 }
0x17b1   :  { %4464 = vrcp.f32 %v3053_v29 }
0x17bd   :  { %v4463_v30 = vpop.eup %4462 }
0x17be   :  { %v4465_v33 = vpop.eup %4464  ;;  %v3033_v61 = vmul.f32 0.0, %v4463_v30 }
0x17bf   :  { %v3057_v37 = vmul.f32 0.0, %v4465_v33 }
0x181d   :  { %v3036_v31 = vpop.permute.xlu1 %3035 }
0x181e   :  { %v3038_v32 = vmul.f32 %v4463_v30, %v3036_v31 }
0x181f   :  { %v3060_v59 = vpop.permute.xlu0 %3059 }
0x1820   :  { %3040 = vrot.lane.b32.xlu1 %v3038_v32, %s4711_s4  ;;  %v3062_v58 = vmul.f32 %v4465_v33, %v3060_v59 }
0x1822   :  { %3064 = vrot.lane.b32.xlu0 %v3062_v58, %s4711_s4 }
0x1892   :  { %v3041_v35 = vpop.permute.xlu1 %3040 }
0x1893   :  { %v5665_v36 = vadd.f32 %v3041_v35, %v3033_v61 }
0x1894   :  { %v3065_v39 = vpop.permute.xlu0 %3064 }
0x1895   :  { %4466 = vtanh.f32 %v5665_v36  ;;  %v5668_v41 = vadd.f32 %v3065_v39, %v3057_v37 }
0x1897   :  { %4468 = vtanh.f32 %v5668_v41 }
0x18a2   :  { %v4467_v44 = vpop.eup %4466 }
0x18a3   :  { %3046 = vrot.lane.b32.xlu1 %v4467_v44, %s4711_s4 }
0x18a4   :  { %v4469_v57 = vpop.eup %4468 }
0x18a5   :  { %3070 = vrot.lane.b32.xlu0 %v4469_v57, %s4711_s4 }
0x1915   :  { %v3047_v60 = vpop.permute.xlu1 %3046 }
0x1916   :  { %v3049_v2 = vmul.f32 %v4463_v30, %v3047_v60 }
0x1917   :  { %v3071_v4 = vpop.permute.xlu0 %3070 }
0x1918   :  { %v3081_v3 = vrot.slane %v3049_v2, %v5105_v28  ;;  %v3073_v5 = vmul.f32 %v4465_v33, %v3071_v4  ;;  %v3320_v4 = vld [vmem:[#allocation4 + $0x8] sm:$0x3] }
0x191a   :  { %3082 = vrot.lane.b32.xlu1 %v3081_v3, %s4713_s6  ;;  %v3092_v6 = vrot.slane %v3073_v5, %v5105_v28 }
0x191c   :  { %3093 = vrot.lane.b32.xlu0 %v3092_v6, %s4714_s14 }
0x198c   :  { %v3083_v7 = vpop.permute.xlu1 %3082 }
0x198e   :  { %v3094_v8 = vpop.permute.xlu0 %3093 }
0x198f   :  { %v3096_v10 = vsel %vm125_vm1, %v3083_v7, %v3094_v8  ;;  %v3322_v7 = vld [vmem:[#allocation4 + $0x16] sm:$0x3] }
0x1990   :  { %4291 = vmatmul.mubr.msk.f32.vlgmr.msra.gmra.mxu1 %vm891_vm3, %v3096_v10 }
0x1991   :  { %3415 = vmatpush1.msra.mxu1 %v5539_v15  ;;  %3462 = vmatprep.mubr.f32.mxu1 %v4710_v0 }
0x1992   :  { %3416 = vmatprep.subr.mxu1 %v5542_v40 }
0x1993   :  { %3417 = vmatpush1.msra.mxu1 %v5546_v46 }
0x1994   :  { %3418 = vmatprep.subr.mxu1 %v5550_v47 }
0x1995   :  { %3419 = vmatpush1.msra.mxu1 %v5554_v38 }
0x1996   :  { %3420 = vmatprep.subr.mxu1 %v5558_v56 }
0x1997   :  { %3421 = vmatpush1.msra.mxu1 %v5562_v16 }
0x1998   :  { %3422 = vmatprep.subr.mxu1 %v5566_v21 }
0x1999   :  { %3423 = vmatpush1.msra.mxu1 %v5570_v14 }
0x199a   :  { %3424 = vmatprep.subr.mxu1 %v5574_v23 }
0x199b   :  { %3425 = vmatpush1.msra.mxu1 %v5578_v34 }
0x199c   :  { %3426 = vmatprep.subr.mxu1 %v5588_v25 }
0x199d   :  { %3427 = vmatpush1.msra.mxu1 %v5591_v26 }
0x199e   :  { %3428 = vmatprep.subr.mxu1 %v5595_v27 }
0x199f   :  { %3429 = vmatpush1.msra.mxu1 %v5599_v20 }
0x19a0   :  { %3712 = vmatprep.subr.mxu1 %v5506_v1 }
0x1a50   :  { %v3166_v9 = vpop.f32.mrf.mxu1 }
0x1a51   :  { %v3172_v22 = vadd.f32 %v3171_v63, %v3166_v9 }
0x1a52   :  { %v3168_v24 = vpop.f32.mrf.mxu1 }
0x1a53   :  { %4470 = vtanh.f32 %v3172_v22  ;;  %v3174_v12 = vadd.f32 %v3173_v19, %v3168_v24  ;;  %v4292_v18 = vmul.f32 -1.442695, %v3172_v22 }
0x1a55   :  { %4472 = vtanh.f32 %v3174_v12  ;;  %v4293_v45 = vmul.f32 -1.442695, %v3174_v12 }
0x1a56   :  { %4474 = vpow2.f32 %v4292_v18 }
0x1a57   :  { %4476 = vpow2.f32 %v4293_v45 }
0x1a60   :  { %v4471_v13 = vpop.eup %4470 }
0x1a61   :  { %3184 = vrot.lane.b32.xlu1 %v4471_v13, %s4711_s4 }
0x1a62   :  { %v4473_v11 = vpop.eup %4472 }
0x1a63   :  { %3208 = vrot.lane.b32.xlu0 %v4473_v11, %s4711_s4  ;;  %v4475_v48 = vpop.eup %4474 }
0x1a64   :  { %v4477_v49 = vpop.eup %4476  ;;  %v3178_v50 = vadd.f32 1.0, %v4475_v48 }
0x1a65   :  { %v3202_v51 = vadd.f32 1.0, %v4477_v49 }
0x1a66   :  { %4478 = vrcp.f32 %v3178_v50 }
0x1a67   :  { %4480 = vrcp.f32 %v3202_v51 }
0x1a73   :  { %v4479_v52 = vpop.eup %4478 }
0x1a74   :  { %v4481_v42 = vpop.eup %4480  ;;  %v3182_v29 = vmul.f32 %v4479_v52, %v5665_v36 }
0x1a75   :  { %v3206_v32 = vmul.f32 %v4481_v42, %v5668_v41 }
0x1ad3   :  { %v3185_v53 = vpop.permute.xlu1 %3184 }
0x1ad4   :  { %v3187_v54 = vmul.f32 %v4479_v52, %v3185_v53 }
0x1ad5   :  { %v3209_v43 = vpop.permute.xlu0 %3208 }
0x1ad6   :  { %3189 = vrot.lane.b32.xlu1 %v3187_v54, %s4711_s4  ;;  %v3211_v55 = vmul.f32 %v4481_v42, %v3209_v43 }
0x1ad8   :  { %3213 = vrot.lane.b32.xlu0 %v3211_v55, %s4711_s4 }
0x1b48   :  { %v3190_v30 = vpop.permute.xlu1 %3189 }
0x1b49   :  { %v5701_v31 = vadd.f32 %v3190_v30, %v3182_v29 }
0x1b4a   :  { %v3214_v33 = vpop.permute.xlu0 %3213 }
0x1b4b   :  { %4482 = vtanh.f32 %v5701_v31  ;;  %v5705_v59 = vadd.f32 %v3214_v33, %v3206_v32 }
0x1b4d   :  { %4484 = vtanh.f32 %v5705_v59 }
0x1b58   :  { %v4483_v58 = vpop.eup %4482 }
0x1b59   :  { %3195 = vrot.lane.b32.xlu1 %v4483_v58, %s4711_s4 }
0x1b5a   :  { %v4485_v61 = vpop.eup %4484 }
0x1b5b   :  { %3219 = vrot.lane.b32.xlu0 %v4485_v61, %s4711_s4 }
0x1bcb   :  { %v3196_v35 = vpop.permute.xlu1 %3195 }
0x1bcc   :  { %v3198_v36 = vmul.f32 %v4479_v52, %v3196_v35 }
0x1bcd   :  { %v3220_v39 = vpop.permute.xlu0 %3219 }
0x1bce   :  { %v3230_v37 = vrot.slane %v3198_v36, %v5105_v28  ;;  %v3222_v44 = vmul.f32 %v4481_v42, %v3220_v39  ;;  %v3469_v39 = vld [vmem:[#allocation4 + $0xc] sm:$0x3] }
0x1bd0   :  { %3231 = vrot.lane.b32.xlu1 %v3230_v37, %s4713_s6  ;;  %v3241_v41 = vrot.slane %v3222_v44, %v5105_v28 }
0x1bd2   :  { %3242 = vrot.lane.b32.xlu0 %v3241_v41, %s4714_s14 }
0x1c42   :  { %v3232_v57 = vpop.permute.xlu1 %3231 }
0x1c44   :  { %v3243_v60 = vpop.permute.xlu0 %3242 }
0x1c45   :  { %v3245_v2 = vsel %vm125_vm1, %v3232_v57, %v3243_v60  ;;  %v3471_v57 = vld [vmem:[#allocation4 + $0x12] sm:$0x3] }
0x1c46   :  { %4294 = vmatmul.mubr.msk.f32.vlgmr.msra.gmra.mxu0 %vm891_vm3, %v3245_v2 }
0x1c47   :  { %3564 = vmatpush1.msra.mxu0 %v5539_v15  ;;  %3611 = vmatprep.mubr.f32.mxu0 %v4710_v0 }
0x1c48   :  { %3565 = vmatprep.subr.mxu0 %v5542_v40 }
0x1c49   :  { %3566 = vmatpush1.msra.mxu0 %v5546_v46 }
0x1c4a   :  { %3567 = vmatprep.subr.mxu0 %v5550_v47 }
0x1c4b   :  { %3568 = vmatpush1.msra.mxu0 %v5554_v38 }
0x1c4c   :  { %3569 = vmatprep.subr.mxu0 %v5558_v56 }
0x1c4d   :  { %3570 = vmatpush1.msra.mxu0 %v5562_v16 }
0x1c4e   :  { %3571 = vmatprep.subr.mxu0 %v5566_v21 }
0x1c4f   :  { %3572 = vmatpush1.msra.mxu0 %v5570_v14 }
0x1c50   :  { %3573 = vmatprep.subr.mxu0 %v5574_v23 }
0x1c51   :  { %3574 = vmatpush1.msra.mxu0 %v5578_v34 }
0x1c52   :  { %3575 = vmatprep.subr.mxu0 %v5588_v25 }
0x1c53   :  { %3576 = vmatpush1.msra.mxu0 %v5591_v26 }
0x1c54   :  { %3577 = vmatprep.subr.mxu0 %v5595_v27 }
0x1c55   :  { %3578 = vmatpush1.msra.mxu0 %v5599_v20 }
0x1c56   :  { %3861 = vmatprep.subr.mxu0 %v5506_v1 }
0x1d06   :  { %v3315_v3 = vpop.f32.mrf.mxu0 }
0x1d07   :  { %v3321_v5 = vadd.f32 %v3320_v4, %v3315_v3 }
0x1d08   :  { %v3317_v6 = vpop.f32.mrf.mxu0 }
0x1d09   :  { %4486 = vtanh.f32 %v3321_v5  ;;  %v3323_v8 = vadd.f32 %v3322_v7, %v3317_v6  ;;  %v4295_v63 = vmul.f32 -1.442695, %v3321_v5 }
0x1d0b   :  { %4488 = vtanh.f32 %v3323_v8  ;;  %v4296_v22 = vmul.f32 -1.442695, %v3323_v8 }
0x1d0c   :  { %4490 = vpow2.f32 %v4295_v63 }
0x1d0d   :  { %4492 = vpow2.f32 %v4296_v22 }
0x1d16   :  { %v4487_v10 = vpop.eup %4486 }
0x1d17   :  { %3333 = vrot.lane.b32.xlu1 %v4487_v10, %s4711_s4 }
0x1d18   :  { %v4489_v9 = vpop.eup %4488 }
0x1d19   :  { %3357 = vrot.lane.b32.xlu0 %v4489_v9, %s4711_s4  ;;  %v4491_v24 = vpop.eup %4490 }
0x1d1a   :  { %v4493_v19 = vpop.eup %4492  ;;  %v3327_v12 = vadd.f32 1.0, %v4491_v24 }
0x1d1b   :  { %v3351_v13 = vadd.f32 1.0, %v4493_v19 }
0x1d1c   :  { %4494 = vrcp.f32 %v3327_v12 }
0x1d1d   :  { %4496 = vrcp.f32 %v3351_v13 }
0x1d29   :  { %v4495_v11 = vpop.eup %4494 }
0x1d2a   :  { %v4497_v48 = vpop.eup %4496  ;;  %v3331_v51 = vmul.f32 %v4495_v11, %v5701_v31 }
0x1d2b   :  { %v3355_v54 = vmul.f32 %v4497_v48, %v5705_v59 }
0x1d89   :  { %v3334_v18 = vpop.permute.xlu1 %3333 }
0x1d8a   :  { %v3336_v45 = vmul.f32 %v4495_v11, %v3334_v18 }
0x1d8b   :  { %v3358_v49 = vpop.permute.xlu0 %3357 }
0x1d8c   :  { %3338 = vrot.lane.b32.xlu1 %v3336_v45, %s4711_s4  ;;  %v3360_v50 = vmul.f32 %v4497_v48, %v3358_v49 }
0x1d8e   :  { %3362 = vrot.lane.b32.xlu0 %v3360_v50, %s4711_s4 }
0x1dfe   :  { %v3339_v52 = vpop.permute.xlu1 %3338 }
0x1dff   :  { %v5738_v53 = vadd.f32 %v3339_v52, %v3331_v51 }
0x1e00   :  { %v3363_v42 = vpop.permute.xlu0 %3362 }
0x1e01   :  { %4498 = vtanh.f32 %v5738_v53  ;;  %v5742_v43 = vadd.f32 %v3363_v42, %v3355_v54 }
0x1e03   :  { %4500 = vtanh.f32 %v5742_v43 }
0x1e0e   :  { %v4499_v55 = vpop.eup %4498 }
0x1e0f   :  { %3344 = vrot.lane.b32.xlu1 %v4499_v55, %s4711_s4 }
0x1e10   :  { %v4501_v29 = vpop.eup %4500 }
0x1e11   :  { %3368 = vrot.lane.b32.xlu0 %v4501_v29, %s4711_s4 }
0x1e81   :  { %v3345_v30 = vpop.permute.xlu1 %3344 }
0x1e82   :  { %v3347_v31 = vmul.f32 %v4495_v11, %v3345_v30 }
0x1e83   :  { %v3369_v33 = vpop.permute.xlu0 %3368 }
0x1e84   :  { %v3379_v32 = vrot.slane %v3347_v31, %v5105_v28  ;;  %v3371_v58 = vmul.f32 %v4497_v48, %v3369_v33 }
0x1e86   :  { %3380 = vrot.lane.b32.xlu1 %v3379_v32, %s4713_s6  ;;  %v3390_v59 = vrot.slane %v3371_v58, %v5105_v28  ;;  %v3618_v32 = vld [vmem:[#allocation4 + $0x10] sm:$0x3] }
0x1e88   :  { %3391 = vrot.lane.b32.xlu0 %v3390_v59, %s4714_s14  ;;  %v3620_v59 = vld [vmem:[#allocation4 + $0xe] sm:$0x3] }
0x1ef8   :  { %v3381_v61 = vpop.permute.xlu1 %3380 }
0x1efa   :  { %v3392_v35 = vpop.permute.xlu0 %3391 }
0x1efb   :  { %v3394_v36 = vsel %vm125_vm1, %v3381_v61, %v3392_v35 }
0x1efc   :  { %4297 = vmatmul.mubr.msk.f32.vlgmr.msra.gmra.mxu1 %vm891_vm3, %v3394_v36 }
0x1efd   :  { %3713 = vmatpush1.msra.mxu1 %v5539_v15  ;;  %3760 = vmatprep.mubr.f32.mxu1 %v4710_v0 }
0x1efe   :  { %3714 = vmatprep.subr.mxu1 %v5542_v40 }
0x1eff   :  { %3715 = vmatpush1.msra.mxu1 %v5546_v46 }
0x1f00   :  { %3716 = vmatprep.subr.mxu1 %v5550_v47 }
0x1f01   :  { %3717 = vmatpush1.msra.mxu1 %v5554_v38 }
0x1f02   :  { %3718 = vmatprep.subr.mxu1 %v5558_v56 }
0x1f03   :  { %3719 = vmatpush1.msra.mxu1 %v5562_v16 }
0x1f04   :  { %3720 = vmatprep.subr.mxu1 %v5566_v21 }
0x1f05   :  { %3721 = vmatpush1.msra.mxu1 %v5570_v14 }
0x1f06   :  { %3722 = vmatprep.subr.mxu1 %v5574_v23 }
0x1f07   :  { %3723 = vmatpush1.msra.mxu1 %v5578_v34 }
0x1f08   :  { %3724 = vmatprep.subr.mxu1 %v5588_v25 }
0x1f09   :  { %3725 = vmatpush1.msra.mxu1 %v5591_v26 }
0x1f0a   :  { %3726 = vmatprep.subr.mxu1 %v5595_v27 }
0x1f0b   :  { %3727 = vmatpush1.msra.mxu1 %v5599_v20 }
0x1f0c   :  { %4010 = vmatprep.subr.mxu1 %v5506_v1 }
0x1fbc   :  { %v3464_v37 = vpop.f32.mrf.mxu1 }
0x1fbd   :  { %v3470_v44 = vadd.f32 %v3469_v39, %v3464_v37 }
0x1fbe   :  { %v3466_v41 = vpop.f32.mrf.mxu1 }
0x1fbf   :  { %4502 = vtanh.f32 %v3470_v44  ;;  %v3472_v60 = vadd.f32 %v3471_v57, %v3466_v41  ;;  %v4298_v4 = vmul.f32 -1.442695, %v3470_v44 }
0x1fc1   :  { %4504 = vtanh.f32 %v3472_v60  ;;  %v4299_v5 = vmul.f32 -1.442695, %v3472_v60 }
0x1fc2   :  { %4506 = vpow2.f32 %v4298_v4 }
0x1fc3   :  { %4508 = vpow2.f32 %v4299_v5 }
0x1fcc   :  { %v4503_v2 = vpop.eup %4502 }
0x1fcd   :  { %3482 = vrot.lane.b32.xlu1 %v4503_v2, %s4711_s4 }
0x1fce   :  { %v4505_v3 = vpop.eup %4504 }
0x1fcf   :  { %3506 = vrot.lane.b32.xlu0 %v4505_v3, %s4711_s4  ;;  %v4507_v6 = vpop.eup %4506 }
0x1fd0   :  { %v4509_v1 = vpop.eup %4508  ;;  %v3476_v7 = vadd.f32 1.0, %v4507_v6 }
0x1fd1   :  { %v3500_v8 = vadd.f32 1.0, %v4509_v1 }
0x1fd2   :  { %4510 = vrcp.f32 %v3476_v7 }
0x1fd3   :  { %4512 = vrcp.f32 %v3500_v8 }
0x1fdf   :  { %v4511_v10 = vpop.eup %4510 }
0x1fe0   :  { %v4513_v22 = vpop.eup %4512  ;;  %v3480_v12 = vmul.f32 %v4511_v10, %v5738_v53 }
0x1fe1   :  { %v3504_v18 = vmul.f32 %v4513_v22, %v5742_v43 }
0x203f   :  { %v3483_v9 = vpop.permute.xlu1 %3482 }
0x2040   :  { %v3485_v63 = vmul.f32 %v4511_v10, %v3483_v9 }
0x2041   :  { %v3507_v24 = vpop.permute.xlu0 %3506 }
0x2042   :  { %3487 = vrot.lane.b32.xlu1 %v3485_v63, %s4711_s4  ;;  %v3509_v19 = vmul.f32 %v4513_v22, %v3507_v24 }
0x2044   :  { %3511 = vrot.lane.b32.xlu0 %v3509_v19, %s4711_s4 }
0x20b4   :  { %v3488_v13 = vpop.permute.xlu1 %3487 }
0x20b5   :  { %v5775_v11 = vadd.f32 %v3488_v13, %v3480_v12 }
0x20b6   :  { %v3512_v45 = vpop.permute.xlu0 %3511 }
0x20b7   :  { %4514 = vtanh.f32 %v5775_v11  ;;  %v5779_v48 = vadd.f32 %v3512_v45, %v3504_v18 }
0x20b9   :  { %4516 = vtanh.f32 %v5779_v48 }
0x20c4   :  { %v4515_v49 = vpop.eup %4514 }
0x20c5   :  { %3493 = vrot.lane.b32.xlu1 %v4515_v49, %s4711_s4 }
0x20c6   :  { %v4517_v50 = vpop.eup %4516 }
0x20c7   :  { %3517 = vrot.lane.b32.xlu0 %v4517_v50, %s4711_s4 }
0x2137   :  { %v3494_v51 = vpop.permute.xlu1 %3493 }
0x2138   :  { %v3496_v52 = vmul.f32 %v4511_v10, %v3494_v51 }
0x2139   :  { %v3518_v54 = vpop.permute.xlu0 %3517 }
0x213a   :  { %v3528_v53 = vrot.slane %v3496_v52, %v5105_v28  ;;  %v3520_v42 = vmul.f32 %v4513_v22, %v3518_v54 }
0x213c   :  { %3529 = vrot.lane.b32.xlu1 %v3528_v53, %s4713_s6  ;;  %v3539_v43 = vrot.slane %v3520_v42, %v5105_v28 }
0x213e   :  { %3540 = vrot.lane.b32.xlu0 %v3539_v43, %s4714_s14 }
0x21ae   :  { %v3530_v55 = vpop.permute.xlu1 %3529 }
0x21b0   :  { %v3541_v29 = vpop.permute.xlu0 %3540 }
0x21b1   :  { %v3543_v30 = vsel %vm125_vm1, %v3530_v55, %v3541_v29 }
0x21b2   :  { %4300 = vmatmul.mubr.msk.f32.vlgmr.msra.gmra.mxu0 %vm891_vm3, %v3543_v30 }
0x21b3   :  { %3862 = vmatpush1.msra.mxu0 %v5539_v15  ;;  %3909 = vmatprep.mubr.f32.mxu0 %v4710_v0 }
0x21b4   :  { %3863 = vmatprep.subr.mxu0 %v5542_v40 }
0x21b5   :  { %3864 = vmatpush1.msra.mxu0 %v5546_v46 }
0x21b6   :  { %3865 = vmatprep.subr.mxu0 %v5550_v47 }
0x21b7   :  { %3866 = vmatpush1.msra.mxu0 %v5554_v38 }
0x21b8   :  { %3867 = vmatprep.subr.mxu0 %v5558_v56 }
0x21b9   :  { %3868 = vmatpush1.msra.mxu0 %v5562_v16 }
0x21ba   :  { %3869 = vmatprep.subr.mxu0 %v5566_v21 }
0x21bb   :  { %3870 = vmatpush1.msra.mxu0 %v5570_v14 }
0x21bc   :  { %3871 = vmatprep.subr.mxu0 %v5574_v23 }
0x21bd   :  { %3872 = vmatpush1.msra.mxu0 %v5578_v34 }
0x21be   :  { %3873 = vmatprep.subr.mxu0 %v5588_v25 }
0x21bf   :  { %3874 = vmatpush1.msra.mxu0 %v5591_v26 }
0x21c0   :  { %3875 = vmatprep.subr.mxu0 %v5595_v27 }
0x21c1   :  { %3876 = vmatpush1.msra.mxu0 %v5599_v20 }
0x2272   :  { %v3613_v31 = vpop.f32.mrf.mxu0 }
0x2273   :  { %v3619_v33 = vadd.f32 %v3618_v32, %v3613_v31 }
0x2274   :  { %v3615_v58 = vpop.f32.mrf.mxu0 }
0x2275   :  { %4518 = vtanh.f32 %v3619_v33  ;;  %v3621_v61 = vadd.f32 %v3620_v59, %v3615_v58  ;;  %v4301_v37 = vmul.f32 -1.442695, %v3619_v33 }
0x2277   :  { %4520 = vtanh.f32 %v3621_v61  ;;  %v4302_v39 = vmul.f32 -1.442695, %v3621_v61 }
0x2278   :  { %4522 = vpow2.f32 %v4301_v37 }
0x2279   :  { %4524 = vpow2.f32 %v4302_v39 }
0x2282   :  { %v4519_v35 = vpop.eup %4518 }
0x2283   :  { %3631 = vrot.lane.b32.xlu1 %v4519_v35, %s4711_s4 }
0x2284   :  { %v4521_v36 = vpop.eup %4520 }
0x2285   :  { %3655 = vrot.lane.b32.xlu0 %v4521_v36, %s4711_s4  ;;  %v4523_v44 = vpop.eup %4522 }
0x2286   :  { %v4525_v41 = vpop.eup %4524  ;;  %v3625_v57 = vadd.f32 1.0, %v4523_v44 }
0x2287   :  { %v3649_v60 = vadd.f32 1.0, %v4525_v41 }
0x2288   :  { %4526 = vrcp.f32 %v3625_v57 }
0x2289   :  { %4528 = vrcp.f32 %v3649_v60 }
0x2295   :  { %v4527_v2 = vpop.eup %4526 }
0x2296   :  { %v4529_v5 = vpop.eup %4528  ;;  %v3629_v7 = vmul.f32 %v4527_v2, %v5775_v11 }
0x2297   :  { %v3653_v9 = vmul.f32 %v4529_v5, %v5779_v48 }
0x22f5   :  { %v3632_v3 = vpop.permute.xlu1 %3631 }
0x22f6   :  { %v3634_v4 = vmul.f32 %v4527_v2, %v3632_v3 }
0x22f7   :  { %v3656_v6 = vpop.permute.xlu0 %3655 }
0x22f8   :  { %3636 = vrot.lane.b32.xlu1 %v3634_v4, %s4711_s4  ;;  %v3658_v1 = vmul.f32 %v4529_v5, %v3656_v6 }
0x22fa   :  { %3660 = vrot.lane.b32.xlu0 %v3658_v1, %s4711_s4 }
0x236a   :  { %v3637_v8 = vpop.permute.xlu1 %3636 }
0x236b   :  { %v5811_v10 = vadd.f32 %v3637_v8, %v3629_v7 }
0x236c   :  { %v3661_v63 = vpop.permute.xlu0 %3660 }
0x236d   :  { %4530 = vtanh.f32 %v5811_v10  ;;  %v5815_v22 = vadd.f32 %v3661_v63, %v3653_v9 }
0x236f   :  { %4532 = vtanh.f32 %v5815_v22 }
0x237a   :  { %v4531_v24 = vpop.eup %4530 }
0x237b   :  { %3642 = vrot.lane.b32.xlu1 %v4531_v24, %s4711_s4 }
0x237c   :  { %v4533_v19 = vpop.eup %4532 }
0x237d   :  { %3666 = vrot.lane.b32.xlu0 %v4533_v19, %s4711_s4 }
0x23ed   :  { %v3643_v12 = vpop.permute.xlu1 %3642 }
0x23ee   :  { %v3645_v13 = vmul.f32 %v4527_v2, %v3643_v12  ;;  %v3916_v2 = vld [vmem:[#allocation4 + $0x18] sm:$0x3] }
0x23ef   :  { %v3667_v18 = vpop.permute.xlu0 %3666 }
0x23f0   :  { %v3677_v11 = vrot.slane %v3645_v13, %v5105_v28  ;;  %v3669_v45 = vmul.f32 %v4529_v5, %v3667_v18  ;;  %v3918_v5 = vld [vmem:[#allocation4 + $0x6] sm:$0x3] }
0x23f2   :  { %3678 = vrot.lane.b32.xlu1 %v3677_v11, %s4713_s6  ;;  %v3688_v48 = vrot.slane %v3669_v45, %v5105_v28 }
0x23f4   :  { %3689 = vrot.lane.b32.xlu0 %v3688_v48, %s4714_s14 }
0x2464   :  { %v3679_v49 = vpop.permute.xlu1 %3678 }
0x2466   :  { %v3690_v50 = vpop.permute.xlu0 %3689 }
0x2467   :  { %v3692_v51 = vsel %vm125_vm1, %v3679_v49, %v3690_v50 }
0x2468   :  { %4303 = vmatmul.mubr.msk.f32.vlgmr.msra.gmra.mxu1 %vm891_vm3, %v3692_v51 }
0x2469   :  { %4011 = vmatpush1.msra.mxu1 %v5539_v15  ;;  %4058 = vmatprep.mubr.f32.mxu1 %v4710_v0  ;;  %v3767_v15 = vld [vmem:[#allocation4 + $0x14] sm:$0x3] }
0x246a   :  { %4012 = vmatprep.subr.mxu1 %v5542_v40 }
0x246b   :  { %4013 = vmatpush1.msra.mxu1 %v5546_v46 }
0x246c   :  { %4014 = vmatprep.subr.mxu1 %v5550_v47  ;;  %v3769_v47 = vld [vmem:[#allocation4 + $0xa] sm:$0x3] }
0x246d   :  { %4015 = vmatpush1.msra.mxu1 %v5554_v38 }
0x246e   :  { %4016 = vmatprep.subr.mxu1 %v5558_v56 }
0x246f   :  { %4017 = vmatpush1.msra.mxu1 %v5562_v16 }
0x2470   :  { %4018 = vmatprep.subr.mxu1 %v5566_v21 }
0x2471   :  { %4019 = vmatpush1.msra.mxu1 %v5570_v14 }
0x2472   :  { %4020 = vmatprep.subr.mxu1 %v5574_v23 }
0x2473   :  { %4021 = vmatpush1.msra.mxu1 %v5578_v34 }
0x2474   :  { %4022 = vmatprep.subr.mxu1 %v5588_v25 }
0x2475   :  { %4023 = vmatpush1.msra.mxu1 %v5591_v26 }
0x2476   :  { %4024 = vmatprep.subr.mxu1 %v5595_v27 }
0x2477   :  { %4025 = vmatpush1.msra.mxu1 %v5599_v20 }
0x2528   :  { %v3762_v0 = vpop.f32.mrf.mxu1 }
0x2529   :  { %v3768_v40 = vadd.f32 %v3767_v15, %v3762_v0 }
0x252a   :  { %v3764_v46 = vpop.f32.mrf.mxu1 }
0x252b   :  { %4534 = vtanh.f32 %v3768_v40  ;;  %v3770_v38 = vadd.f32 %v3769_v47, %v3764_v46  ;;  %v4304_v21 = vmul.f32 -1.442695, %v3768_v40 }
0x252d   :  { %4536 = vtanh.f32 %v3770_v38  ;;  %v4305_v14 = vmul.f32 -1.442695, %v3770_v38 }
0x252e   :  { %4538 = vpow2.f32 %v4304_v21 }
0x252f   :  { %4540 = vpow2.f32 %v4305_v14 }
0x2538   :  { %v4535_v56 = vpop.eup %4534 }
0x2539   :  { %3780 = vrot.lane.b32.xlu1 %v4535_v56, %s4711_s4 }
0x253a   :  { %v4537_v16 = vpop.eup %4536 }
0x253b   :  { %3804 = vrot.lane.b32.xlu0 %v4537_v16, %s4711_s4  ;;  %v4539_v23 = vpop.eup %4538 }
0x253c   :  { %v4541_v34 = vpop.eup %4540  ;;  %v3774_v25 = vadd.f32 1.0, %v4539_v23 }
0x253d   :  { %v3798_v26 = vadd.f32 1.0, %v4541_v34 }
0x253e   :  { %4542 = vrcp.f32 %v3774_v25 }
0x253f   :  { %4544 = vrcp.f32 %v3798_v26 }
0x254b   :  { %v4543_v27 = vpop.eup %4542 }
0x254c   :  { %v4545_v53 = vpop.eup %4544  ;;  %v3778_v43 = vmul.f32 %v4543_v27, %v5811_v10 }
0x254d   :  { %v3802_v30 = vmul.f32 %v4545_v53, %v5815_v22 }
0x25ab   :  { %v3781_v20 = vpop.permute.xlu1 %3780 }
0x25ac   :  { %v3783_v52 = vmul.f32 %v4543_v27, %v3781_v20 }
0x25ad   :  { %v3805_v54 = vpop.permute.xlu0 %3804 }
0x25ae   :  { %3785 = vrot.lane.b32.xlu1 %v3783_v52, %s4711_s4  ;;  %v3807_v42 = vmul.f32 %v4545_v53, %v3805_v54 }
0x25b0   :  { %3809 = vrot.lane.b32.xlu0 %v3807_v42, %s4711_s4 }
0x2620   :  { %v3786_v55 = vpop.permute.xlu1 %3785 }
0x2621   :  { %v3788_v29 = vadd.f32 %v3786_v55, %v3778_v43 }
0x2622   :  { %v3810_v31 = vpop.permute.xlu0 %3809 }
0x2623   :  { %4546 = vtanh.f32 %v3788_v29  ;;  %v3812_v32 = vadd.f32 %v3810_v31, %v3802_v30 }
0x2625   :  { %4548 = vtanh.f32 %v3812_v32 }
0x2630   :  { %v4547_v33 = vpop.eup %4546 }
0x2631   :  { %3791 = vrot.lane.b32.xlu1 %v4547_v33, %s4711_s4 }
0x2632   :  { %v4549_v58 = vpop.eup %4548 }
0x2633   :  { %3815 = vrot.lane.b32.xlu0 %v4549_v58, %s4711_s4 }
0x26a3   :  { %v3792_v59 = vpop.permute.xlu1 %3791 }
0x26a4   :  { %v3794_v61 = vmul.f32 %v4543_v27, %v3792_v59  ;;  %v4065_v27 = vld [vmem:[#allocation4 + $0x1c] sm:$0x3] }
0x26a5   :  { %v3816_v36 = vpop.permute.xlu0 %3815 }
0x26a6   :  { %v3826_v35 = vrot.slane %v3794_v61, %v5105_v28  ;;  %v3818_v37 = vmul.f32 %v4545_v53, %v3816_v36  ;;  %v4067_v53 = vld [vmem:[#allocation4 + $0x2] sm:$0x3] }
0x26a8   :  { %3827 = vrot.lane.b32.xlu1 %v3826_v35, %s4713_s6  ;;  %v3837_v39 = vrot.slane %v3818_v37, %v5105_v28 }
0x26aa   :  { %3838 = vrot.lane.b32.xlu0 %v3837_v39, %s4714_s14 }
0x271a   :  { %v3828_v44 = vpop.permute.xlu1 %3827 }
0x271c   :  { %v3839_v41 = vpop.permute.xlu0 %3838 }
0x271d   :  { %v3841_v57 = vsel %vm125_vm1, %v3828_v44, %v3839_v41 }
0x271e   :  { %4306 = vmatmul.mubr.msk.f32.vlgmr.msra.gmra.mxu0 %vm891_vm3, %v3841_v57 }
0x27de   :  { %v3911_v60 = vpop.f32.mrf.mxu0 }
0x27df   :  { %v3917_v3 = vadd.f32 %v3916_v2, %v3911_v60 }
0x27e0   :  { %v3913_v4 = vpop.f32.mrf.mxu0 }
0x27e1   :  { %4550 = vtanh.f32 %v3917_v3  ;;  %v3919_v6 = vadd.f32 %v3918_v5, %v3913_v4  ;;  %v4307_v8 = vmul.f32 -1.442695, %v3917_v3  ;;  %v2145_v5 = vrot.slane %v5370_v17, %v5105_v28 }
0x27e3   :  { %4552 = vtanh.f32 %v3919_v6  ;;  %v4308_v10 = vmul.f32 -1.442695, %v3919_v6  ;;  %v2157_v6 = vrot.slane %v5346_v62, %v5105_v28 }
0x27e4   :  { %4554 = vpow2.f32 %v4307_v8 }
0x27e5   :  { %4556 = vpow2.f32 %v4308_v10 }
0x27ee   :  { %v4551_v1 = vpop.eup %4550 }
0x27ef   :  { %3929 = vrot.lane.b32.xlu1 %v4551_v1, %s4711_s4 }
0x27f0   :  { %v4553_v7 = vpop.eup %4552 }
0x27f1   :  { %3953 = vrot.lane.b32.xlu0 %v4553_v7, %s4711_s4  ;;  %v4555_v9 = vpop.eup %4554 }
0x27f2   :  { %v4557_v63 = vpop.eup %4556  ;;  %v3923_v22 = vadd.f32 1.0, %v4555_v9 }
0x27f3   :  { %v3947_v24 = vadd.f32 1.0, %v4557_v63 }
0x27f4   :  { %4558 = vrcp.f32 %v3923_v22 }
0x27f5   :  { %4560 = vrcp.f32 %v3947_v24 }
0x2801   :  { %v4559_v19 = vpop.eup %4558 }
0x2802   :  { %v4561_v11 = vpop.eup %4560  ;;  %v3927_v48 = vmul.f32 %v4559_v19, %v3788_v29 }
0x2803   :  { %v3951_v51 = vmul.f32 %v4561_v11, %v3812_v32 }
0x2861   :  { %v3930_v12 = vpop.permute.xlu1 %3929 }
0x2862   :  { %v3932_v13 = vmul.f32 %v4559_v19, %v3930_v12 }
0x2863   :  { %v3954_v18 = vpop.permute.xlu0 %3953 }
0x2864   :  { %3934 = vrot.lane.b32.xlu1 %v3932_v13, %s4711_s4  ;;  %v3956_v45 = vmul.f32 %v4561_v11, %v3954_v18 }
0x2866   :  { %3958 = vrot.lane.b32.xlu0 %v3956_v45, %s4711_s4 }
0x28d6   :  { %v3935_v49 = vpop.permute.xlu1 %3934 }
0x28d7   :  { %v3937_v50 = vadd.f32 %v3935_v49, %v3927_v48 }
0x28d8   :  { %v3959_v0 = vpop.permute.xlu0 %3958 }
0x28d9   :  { %4562 = vtanh.f32 %v3937_v50  ;;  %v3961_v15 = vadd.f32 %v3959_v0, %v3951_v51 }
0x28db   :  { %4564 = vtanh.f32 %v3961_v15 }
0x28e6   :  { %v4563_v40 = vpop.eup %4562 }
0x28e7   :  { %3940 = vrot.lane.b32.xlu1 %v4563_v40, %s4711_s4 }
0x28e8   :  { %v4565_v46 = vpop.eup %4564 }
0x28e9   :  { %3964 = vrot.lane.b32.xlu0 %v4565_v46, %s4711_s4 }
0x2959   :  { %v3941_v47 = vpop.permute.xlu1 %3940 }
0x295a   :  { %v3943_v38 = vmul.f32 %v4559_v19, %v3941_v47 }
0x295b   :  { %v3965_v16 = vpop.permute.xlu0 %3964 }
0x295c   :  { %v3975_v56 = vrot.slane %v3943_v38, %v5105_v28  ;;  %v3967_v21 = vmul.f32 %v4561_v11, %v3965_v16 }
0x295e   :  { %3976 = vrot.lane.b32.xlu1 %v3975_v56, %s4713_s6  ;;  %v3986_v14 = vrot.slane %v3967_v21, %v5105_v28 }
0x2960   :  { %3987 = vrot.lane.b32.xlu0 %v3986_v14, %s4714_s14 }
0x29d0   :  { %v3977_v23 = vpop.permute.xlu1 %3976 }
0x29d2   :  { %v3988_v34 = vpop.permute.xlu0 %3987 }
0x29d3   :  { %v3990_v25 = vsel %vm125_vm1, %v3977_v23, %v3988_v34 }
0x29d4   :  { %4309 = vmatmul.mubr.msk.f32.vlgmr.msra.gmra.mxu1 %vm891_vm3, %v3990_v25 }
0x2a94   :  { %v4060_v26 = vpop.f32.mrf.mxu1 }
0x2a95   :  { %v4066_v20 = vadd.f32 %v4065_v27, %v4060_v26 }
0x2a96   :  { %v4062_v52 = vpop.f32.mrf.mxu1 }
0x2a97   :  { %4566 = vtanh.f32 %v4066_v20  ;;  %v4068_v54 = vadd.f32 %v4067_v53, %v4062_v52  ;;  %v4310_v55 = vmul.f32 -1.442695, %v4066_v20 }
0x2a99   :  { %4568 = vtanh.f32 %v4068_v54  ;;  %v4311_v29 = vmul.f32 -1.442695, %v4068_v54 }
0x2a9a   :  { %4570 = vpow2.f32 %v4310_v55 }
0x2a9b   :  { %4572 = vpow2.f32 %v4311_v29 }
0x2aa4   :  { %v4567_v42 = vpop.eup %4566 }
0x2aa5   :  { %4078 = vrot.lane.b32.xlu1 %v4567_v42, %s4711_s4 }
0x2aa6   :  { %v4569_v43 = vpop.eup %4568 }
0x2aa7   :  { %4102 = vrot.lane.b32.xlu0 %v4569_v43, %s4711_s4  ;;  %v4571_v30 = vpop.eup %4570 }
0x2aa8   :  { %v4573_v31 = vpop.eup %4572  ;;  %v4072_v32 = vadd.f32 1.0, %v4571_v30 }
0x2aa9   :  { %v4096_v33 = vadd.f32 1.0, %v4573_v31 }
0x2aaa   :  { %4574 = vrcp.f32 %v4072_v32 }
0x2aab   :  { %4576 = vrcp.f32 %v4096_v33 }
0x2ab7   :  { %v4575_v58 = vpop.eup %4574 }
0x2ab8   :  { %v4577_v35 = vpop.eup %4576  ;;  %v4076_v39 = vmul.f32 %v4575_v58, %v3937_v50 }
0x2ab9   :  { %v4100_v57 = vmul.f32 %v4577_v35, %v3961_v15 }
0x2b17   :  { %v4079_v59 = vpop.permute.xlu1 %4078 }
0x2b18   :  { %v4081_v61 = vmul.f32 %v4575_v58, %v4079_v59 }
0x2b19   :  { %v4103_v36 = vpop.permute.xlu0 %4102 }
0x2b1a   :  { %4083 = vrot.lane.b32.xlu1 %v4081_v61, %s4711_s4  ;;  %v4105_v37 = vmul.f32 %v4577_v35, %v4103_v36 }
0x2b1c   :  { %4107 = vrot.lane.b32.xlu0 %v4105_v37, %s4711_s4 }
0x2b8c   :  { %v4084_v44 = vpop.permute.xlu1 %4083 }
0x2b8d   :  { %v4086_v41 = vadd.f32 %v4084_v44, %v4076_v39 }
0x2b8e   :  { %v4108_v60 = vpop.permute.xlu0 %4107 }
0x2b8f   :  { %4578 = vtanh.f32 %v4086_v41  ;;  %v4110_v2 = vadd.f32 %v4108_v60, %v4100_v57  ;;  %v4150_v22 = vrot.slane %v4086_v41, %v5105_v28 }
0x2b91   :  { %4580 = vtanh.f32 %v4110_v2  ;;  %v4163_v62 = vrot.slane %v4110_v2, %v5105_v28 }
0x2b9c   :  { %v4579_v3 = vpop.eup %4578 }
0x2b9d   :  { %4089 = vrot.lane.b32.xlu1 %v4579_v3, %s4711_s4 }
0x2b9e   :  { %v4581_v4 = vpop.eup %4580 }
0x2b9f   :  { %4113 = vrot.lane.b32.xlu0 %v4581_v4, %s4711_s4 }
0x2ba1   :  { %2146 = vrot.lane.b32.xlu1 %v2145_v5, %s4714_s14 }
0x2ba3   :  { %2158 = vrot.lane.b32.xlu0 %v2157_v6, %s4714_s14 }
0x2c0f   :  { %v4090_v1 = vpop.permute.xlu1 %4089 }
0x2c10   :  { %v4092_v7 = vmul.f32 %v4575_v58, %v4090_v1 }
0x2c11   :  { %v4114_v10 = vpop.permute.xlu0 %4113 }
0x2c12   :  { %v4124_v8 = vrot.slane %v4092_v7, %v5105_v28  ;;  %v4116_v9 = vmul.f32 %v4577_v35, %v4114_v10 }
0x2c13   :  { %v2147_v63 = vpop.permute.xlu1 %2146 }
0x2c14   :  { %2149 = vst.msk [vmem:[#allocation14] sm:$0x3] %vm1029_vm2, %v2147_v63  ;;  %4125 = vrot.lane.b32.xlu1 %v4124_v8, %s4713_s6  ;;  %v4137_v17 = vrot.slane %v4116_v9, %v5105_v28 }
0x2c15   :  { %v2159_v24 = vpop.permute.xlu0 %2158 }
0x2c16   :  { %2162 = vst.msk [vmem:[#allocation14 + $0x2] sm:$0x3] %vm1029_vm2, %v2159_v24  ;;  %4138 = vrot.lane.b32.xlu0 %v4137_v17, %s4713_s6 }
0x2c18   :  { %4151 = vrot.lane.b32.xlu1 %v4150_v22, %s4714_s14 }
0x2c1a   :  { %4164 = vrot.lane.b32.xlu0 %v4163_v62, %s4714_s14 }
0x2c86   :  { %v4126_v19 = vpop.permute.xlu1 %4125 }
0x2c87   :  { %4129 = vst.msk [vmem:[#allocation13 + $0x4] sm:$0x3] %vm1029_vm2, %v4126_v19 }
0x2c88   :  { %v4139_v12 = vpop.permute.xlu0 %4138 }
0x2c89   :  { %4142 = vst.msk [vmem:[#allocation13 + $0x6] sm:$0x3] %vm1029_vm2, %v4139_v12 }
0x2c8a   :  { %v4152_v13 = vpop.permute.xlu1 %4151 }
0x2c8b   :  { %4155 = vst.msk [vmem:[#allocation14 + $0x4] sm:$0x3] %vm1029_vm2, %v4152_v13 }
0x2c8c   :  { %4665 = shalt.err (!%p4662_p10)
}
0x2c8d   :  { %s4717_s18 = smov 2   ;;  %v4165_v28 = vpop.permute.xlu0 %4164  ;;  %s4674_s2 = scalar_lea.vmem %s4187_s17, 128 }
0x2c8e   :  { %4180 = dma.vmem_to_hbm [thread:$0]  %s4175_s0, 128, %s5912_s8, [#allocation9], %s4711_s4, %s4711_s4, %s4717_s18   ;;  %4168 = vst.msk [vmem:[#allocation14 + $0x6] sm:$0x3] %vm1029_vm2, %v4165_v28 }
0x2c8f   :  { %p4675_p11 = scmp.ne.s32.totalorder %s4187_s17, %s4674_s2  ;;  %p4679_p12 = scmp.lt.s32.totalorder %s4187_s17, %s4187_s17 }
0x2c90   :  { %p4680_p13 = scmp.lt.s32.totalorder %s4674_s2, %s4674_s2 }
0x2c92   :  { %p4681_p0 = por %p4680_p13, %p4679_p12 }
0x2c94   :  { %p4682_p1 = pnand %p4681_p0, %p4675_p11 }
0x2c96   :  { %4685 = shalt.err (!%p4682_p1)
}
0x2c97   :  { %4192 = dma.vmem_to_hbm [thread:$0]  %s4187_s17, 128, %s5913_s9, [#allocation15], %s4711_s4, %s4711_s4, %s4717_s18  }
0x2c98   :  { %4700 = dma.done.wait [#allocation9], 128  }
0x2c99   :  { %4701 = vsyncadd [#allocation9], 4294967168 }
0x2c9a   :  { %4702 = dma.done.wait [#allocation15], 128  }
0x2c9b   :  { %4703 = vsyncadd [#allocation15], 4294967168 }
0x2c9c   :  { %4199 = vsyncpa [#allocation8], 1 }
0x2c9d   :  { %4200 = vsyncpa [#allocation11], 1 }
0x2c9e   :  { %4201 = vsyncpa [#allocation9], 1 }
0x2c9f   :  { %4202 = vsyncpa [#allocation15], 1 }

</bundles_post_ra>
